<compile_context>
chip_gen: v6e
topology: v6e:2x2x1
jax: 0.10.0
libtpu: 0.0.40
codegen_flags: <defaults>
</compile_context>

<pallas_src>
import jax
import jax.numpy as jnp
from jax import lax
from jax.experimental import pallas as pl
from jax.experimental.pallas import tpu as pltpu

# ---- hyper-parameters (the module's `self.p`) ---------------------------------
NUM_ENT = 16        # p.num_ent          (N)
NUM_RELS = 5        # num_rels
NUM_FACTORS = 4     # p.num_factors      (K)
GCN_DIM = 32        # in/out_channels == p.gcn_dim (F)
NUM_BASE_EDGES = 48 # edge_index.shape[1]
BN_EPS = 1e-5
LRELU_SLOPE = 0.2


# ---- Pallas kernel -------------------------------------------------------------
def _disen_kernel(x_i_ref, x_j_ref, rel_e_ref, rel_w_ref, S_ref, ss_ref, ent_out_ref):
    x_i = x_i_ref[...]          # [E, K, F]
    x_j = x_j_ref[...]          # [E, K, F]
    rel_e = rel_e_ref[...]      # [E, F]
    rel_w = rel_w_ref[...]      # [E, K, F]
    S = S_ref[...]              # [N, E] one-hot: S[n, e] = 1 <=> edge e targets node n

    E, K, F = x_j.shape
    N = S.shape[0]

    # ---- attention logits (att_mode='dot_weight'); obj is reused by the message path ----
    obj = x_j * rel_w                                               # [E, K, F]
    sub = x_i * rel_w                                               # [E, K, F]
    logits = jnp.sum(sub * obj, axis=-1)                            # [E, K]
    logits = jnp.where(logits >= 0, logits, LRELU_SLOPE * logits)   # LeakyReLU(0.2)

    # ---- per-target-node segment max (softmax stabilizer) ----
    # TODO(synk): dense [N,E,K] broadcast is fine at toy size; use CSR + node-block grid for
    # large graphs.
    masked = jnp.where(S[:, :, None] > 0.5, logits[None, :, :], jnp.float32(-1e30))
    node_max = jnp.max(masked, axis=1)                              # [N, K]
    edge_max = lax.dot_general(S, node_max, (((0,), (0,)), ((), ())),
                               preferred_element_type=jnp.float32)  # [E, K] gather-back
    ex = jnp.exp(logits - edge_max)                                 # [E, K]
    node_sum = jnp.dot(S, ex, preferred_element_type=jnp.float32) + 1e-16   # [N, K]
    # dropout(p.gcn_drop) on attention: identity in eval mode

    # ---- message (opn='cross') weighted by un-normalized attention, scatter-sum ----
    xj_rel = obj * (rel_e[:, None, :] + 1.0)                        # [E, K, F]
    msg = (xj_rel * ex[:, :, None]).reshape(E, K * F)               # [E, K*F]
    aggr = jnp.dot(S, msg, preferred_element_type=jnp.float32)      # [N, K*F]

    # ---- softmax normalization once per node (EUP reciprocal, lane-dense layout) ----
    inv = pl.reciprocal(node_sum, approx=True)                      # [N, K]
    aggr = (aggr.reshape(N, K, F) * inv[:, :, None]).reshape(N, K * F)

    # ---- folded bias + eval-mode BatchNorm1d (+ identity act) ----
    scale = ss_ref[0:1, :]                                          # [1, K*F]
    shift = ss_ref[1:2, :]                                          # [1, K*F]
    ent_out_ref[...] = aggr * scale + shift                         # [N, K*F] lane-dense


# ---- wrapper (glue: concat, gathers, one-hot scatter matrix, param fold, pallas_call) ---
def disen_layer_forward(x, rel_embed, edge_index, edge_type, params):
    N, K, F = x.shape
    loop_rel = params["loop_rel"]                  # [1, F]
    rel_weight = params["rel_weight"]              # [2*num_rels+1, K, F]
    w_rel = params["w_rel"]                        # [F, F]

    # rel_embed = cat([rel_embed, loop_rel]); edges = cat([edges, self-loops])
    rel_cat = jnp.concatenate([rel_embed, loop_rel], axis=0)           # [2R+1, F]
    loop_index = jnp.stack([jnp.arange(N), jnp.arange(N)]).astype(edge_index.dtype)
    full_index = jnp.concatenate([edge_index, loop_index], axis=1)     # [2, E]
    loop_type = jnp.full((N,), rel_cat.shape[0] - 1, dtype=edge_type.dtype)
    full_type = jnp.concatenate([edge_type, loop_type])                # [E]

    ei = full_index[0]                                                 # targets
    ej = full_index[1]                                                 # sources

    # gathers (glue)
    x_i = jnp.take(x, ei, axis=0)                                      # [E, K, F]
    x_j = jnp.take(x, ej, axis=0)                                      # [E, K, F]
    rel_e = jnp.take(rel_cat, full_type, axis=0)                       # [E, F]
    rel_w = jnp.take(rel_weight, full_type, axis=0)                    # [E, K, F]

    # one-hot scatter matrix for the target-node grouping
    S = (ei[None, :] == jnp.arange(N)[:, None]).astype(jnp.float32)    # [N, E]

    # bias + eval-mode BatchNorm folded to a single scale/shift (coalesced to one input)
    scale = params["bn_gamma"] * lax.rsqrt(params["bn_var"] + BN_EPS)          # [K*F]
    shift = params["bn_beta"] + (jnp.tile(params["bias"], K) - params["bn_mean"]) * scale
    scale_shift = jnp.stack([scale, shift], axis=0)                    # [2, K*F]

    vmem = pl.BlockSpec(memory_space=pltpu.MemorySpace.VMEM)
    ent_flat = pl.pallas_call(
        _disen_kernel,
        out_shape=jax.ShapeDtypeStruct((N, K * F), jnp.float32),
        in_specs=[vmem] * 6,
        out_specs=vmem,
    )(x_i, x_j, rel_e, rel_w, S, scale_shift)

    # relation update is independent of the entity path -> plain XLA (hoisted out of kernel)
    rel_out = jnp.matmul(rel_cat, w_rel)[:-1]
    return ent_flat.reshape(N, K, F), rel_out


# ---- pure-JAX reference (same math, segment ops) for validation -----------------
def reference_forward(x, rel_embed, edge_index, edge_type, params):
    N, K, F = x.shape
    rel_cat = jnp.concatenate([rel_embed, params["loop_rel"]], axis=0)
    loop_index = jnp.stack([jnp.arange(N), jnp.arange(N)]).astype(edge_index.dtype)
    full_index = jnp.concatenate([edge_index, loop_index], axis=1)
    loop_type = jnp.full((N,), rel_cat.shape[0] - 1, dtype=edge_type.dtype)
    full_type = jnp.concatenate([edge_type, loop_type])
    ei, ej = full_index[0], full_index[1]

    x_i, x_j = x[ei], x[ej]
    rel_e = rel_cat[full_type]
    rel_w = params["rel_weight"][full_type]

    xj_rel = x_j * rel_e[:, None, :] * rel_w + x_j * rel_w
    logits = jnp.sum((x_i * rel_w) * (x_j * rel_w), axis=-1)
    logits = jnp.where(logits >= 0, logits, LRELU_SLOPE * logits)
    node_max = jax.ops.segment_max(logits, ei, num_segments=N)
    ex = jnp.exp(logits - node_max[ei])
    node_sum = jax.ops.segment_sum(ex, ei, num_segments=N) + 1e-16
    alpha = ex / node_sum[ei]
    aggr = jax.ops.segment_sum(xj_rel * alpha[:, :, None], ei, num_segments=N)
    out = aggr + params["bias"][None, None, :]
    flat = out.reshape(N, K * F)
    normed = (flat - params["bn_mean"]) / jnp.sqrt(params["bn_var"] + BN_EPS)
    normed = normed * params["bn_gamma"] + params["bn_beta"]
    return normed.reshape(N, K, F), (rel_cat @ params["w_rel"])[:-1]


def _xavier_normal(key, shape):
    # torch.nn.init.xavier_normal_ fan computation for >=2D tensors
    recep = 1
    for d in shape[2:]:
        recep *= d
    fan_in = shape[1] * recep
    fan_out = shape[0] * recep
    std = (2.0 / (fan_in + fan_out)) ** 0.5
    return std * jax.random.normal(key, shape, dtype=jnp.float32)


if __name__ == "__main__":
    key = jax.random.PRNGKey(0)
    keys = jax.random.split(key, 8)

    N, K, F, R, E0 = NUM_ENT, NUM_FACTORS, GCN_DIM, NUM_RELS, NUM_BASE_EDGES

    # inputs
    x = jax.random.normal(keys[0], (N, K, F), dtype=jnp.float32)
    rel_embed = jax.random.normal(keys[1], (2 * R, F), dtype=jnp.float32)
    edge_index = jax.random.randint(keys[2], (2, E0), 0, N, dtype=jnp.int32)
    half = E0 // 2
    edge_type = jnp.concatenate([
        jax.random.randint(keys[3], (half,), 0, R, dtype=jnp.int32),
        jax.random.randint(keys[4], (half,), R, 2 * R, dtype=jnp.int32),
    ])

    # parameters (deterministic synthetic init, shapes from __init__)
    params = {
        "rel_weight": _xavier_normal(keys[5], (2 * R + 1, K, F)),
        "loop_rel": _xavier_normal(keys[6], (1, F)),
        "w_rel": _xavier_normal(keys[7], (F, F)),
        "bias": jnp.zeros((F,), jnp.float32),
        "bn_gamma": jnp.ones((K * F,), jnp.float32),
        "bn_beta": jnp.zeros((K * F,), jnp.float32),
        "bn_mean": jnp.zeros((K * F,), jnp.float32),
        "bn_var": jnp.ones((K * F,), jnp.float32),
    }

    ent, rel_out = disen_layer_forward(x, rel_embed, edge_index, edge_type, params)
    ent = jax.block_until_ready(ent)
    rel_out = jax.block_until_ready(rel_out)

    ent_ref, rel_ref = reference_forward(x, rel_embed, edge_index, edge_type, params)
    assert ent.shape == (N, K, F) and rel_out.shape == (2 * R, F)
    # tolerance 1e-3: allows for the EUP approximate-reciprocal softmax normalization
    assert jnp.allclose(ent, ent_ref, atol=1e-3, rtol=1e-3), "entity output mismatch"
    assert jnp.allclose(rel_out, rel_ref, atol=1e-4, rtol=1e-4), "relation output mismatch"

    print("KERNEL_OK")
</pallas_src>

<mosaic_0001>
module attributes {stable_mosaic.version = 11 : i64} {
  func.func @_disen_kernel(%arg0: memref<64x4x32xf32, #tpu.memory_space<vmem>>, %arg1: memref<64x4x32xf32, #tpu.memory_space<vmem>>, %arg2: memref<64x32xf32, #tpu.memory_space<vmem>>, %arg3: memref<64x4x32xf32, #tpu.memory_space<vmem>>, %arg4: memref<16x64xf32, #tpu.memory_space<vmem>>, %arg5: memref<2x128xf32, #tpu.memory_space<vmem>>, %arg6: memref<16x128xf32, #tpu.memory_space<vmem>>) attributes {dimension_semantics = [], scalar_prefetch = 0 : i64, scratch_operands = 0 : i64, tpu.core_type = #tpu.core_type<tc>} {
    %c0 = arith.constant 0 : index
    %c0_0 = arith.constant 0 : index
    %c0_1 = arith.constant 0 : index
    %0 = vector.load %arg0[%c0, %c0_0, %c0_1] : memref<64x4x32xf32, #tpu.memory_space<vmem>>, vector<64x4x32xf32>
    %c0_2 = arith.constant 0 : index
    %c0_3 = arith.constant 0 : index
    %c0_4 = arith.constant 0 : index
    %1 = vector.load %arg1[%c0_2, %c0_3, %c0_4] : memref<64x4x32xf32, #tpu.memory_space<vmem>>, vector<64x4x32xf32>
    %c0_5 = arith.constant 0 : index
    %c0_6 = arith.constant 0 : index
    %2 = vector.load %arg2[%c0_5, %c0_6] : memref<64x32xf32, #tpu.memory_space<vmem>>, vector<64x32xf32>
    %c0_7 = arith.constant 0 : index
    %c0_8 = arith.constant 0 : index
    %c0_9 = arith.constant 0 : index
    %3 = vector.load %arg3[%c0_7, %c0_8, %c0_9] : memref<64x4x32xf32, #tpu.memory_space<vmem>>, vector<64x4x32xf32>
    %c0_10 = arith.constant 0 : index
    %c0_11 = arith.constant 0 : index
    %4 = vector.load %arg4[%c0_10, %c0_11] : memref<16x64xf32, #tpu.memory_space<vmem>>, vector<16x64xf32>
    %5 = arith.mulf %1, %3 : vector<64x4x32xf32>
    %6 = arith.mulf %0, %3 : vector<64x4x32xf32>
    %7 = arith.mulf %6, %5 : vector<64x4x32xf32>
    %cst = arith.constant dense<0.000000e+00> : vector<64x4xf32>
    %8 = vector.multi_reduction <add>, %7, %cst [2] : vector<64x4x32xf32> to vector<64x4xf32>
    %cst_12 = arith.constant 0.000000e+00 : f32
    %9 = vector.broadcast %cst_12 : f32 to vector<64x4xf32>
    %10 = arith.cmpf oge, %8, %9 : vector<64x4xf32>
    %cst_13 = arith.constant 2.000000e-01 : f32
    %11 = vector.broadcast %cst_13 : f32 to vector<64x4xf32>
    %12 = arith.mulf %11, %8 : vector<64x4xf32>
    %13 = arith.select %10, %8, %12 : vector<64x4xi1>, vector<64x4xf32>
    %14 = vector.shape_cast %4 : vector<16x64xf32> to vector<16x64x1xf32>
    %cst_14 = arith.constant 5.000000e-01 : f32
    %15 = vector.broadcast %cst_14 : f32 to vector<16x64x1xf32>
    %16 = arith.cmpf ogt, %14, %15 : vector<16x64x1xf32>
    %17 = vector.shape_cast %13 : vector<64x4xf32> to vector<1x64x4xf32>
    %cst_15 = arith.constant -1.000000e+30 : f32
    %18 = vector.shape_cast %16 : vector<16x64x1xi1> to vector<16x64x1xi1>
    %19 = vector.broadcast %18 : vector<16x64x1xi1> to vector<16x64x4xi1>
    %20 = vector.shape_cast %17 : vector<1x64x4xf32> to vector<1x64x4xf32>
    %21 = vector.broadcast %20 : vector<1x64x4xf32> to vector<16x64x4xf32>
    %22 = vector.broadcast %cst_15 : f32 to vector<16x64x4xf32>
    %23 = arith.select %19, %21, %22 : vector<16x64x4xi1>, vector<16x64x4xf32>
    %cst_16 = arith.constant dense<0xFF800000> : vector<16x4xf32>
    %24 = vector.multi_reduction <maximumf>, %23, %cst_16 [1] : vector<16x64x4xf32> to vector<16x4xf32>
    %cst_17 = arith.constant dense<0.000000e+00> : vector<64x4xf32>
    %25 = tpu.matmul %4, %24, %cst_17 {dimension_numbers = #tpu.dot_dimension_numbers<[0], [0], [1], [1], [0, 1, 1, 1], [], []>} : vector<16x64xf32>, vector<16x4xf32>, vector<64x4xf32> -> vector<64x4xf32>
    %26 = arith.subf %13, %25 : vector<64x4xf32>
    %27 = math.exp %26 : vector<64x4xf32>
    %cst_18 = arith.constant dense<0.000000e+00> : vector<16x4xf32>
    %28 = tpu.matmul %4, %27, %cst_18 {dimension_numbers = #tpu.dot_dimension_numbers<[1], [0], [0], [1], [0, 0, 1, 1], [], []>} : vector<16x64xf32>, vector<64x4xf32>, vector<16x4xf32> -> vector<16x4xf32>
    %cst_19 = arith.constant 1.000000e-16 : f32
    %29 = vector.broadcast %cst_19 : f32 to vector<16x4xf32>
    %30 = arith.addf %28, %29 : vector<16x4xf32>
    %31 = vector.shape_cast %2 : vector<64x32xf32> to vector<64x1x32xf32>
    %cst_20 = arith.constant 1.000000e+00 : f32
    %32 = vector.broadcast %cst_20 : f32 to vector<64x1x32xf32>
    %33 = arith.addf %31, %32 : vector<64x1x32xf32>
    %34 = vector.broadcast %33 : vector<64x1x32xf32> to vector<64x4x32xf32>
    %35 = arith.mulf %5, %34 : vector<64x4x32xf32>
    %36 = vector.shape_cast %27 : vector<64x4xf32> to vector<64x4x1xf32>
    %37 = vector.broadcast %36 : vector<64x4x1xf32> to vector<64x4x32xf32>
    %38 = arith.mulf %35, %37 : vector<64x4x32xf32>
    %39 = vector.shape_cast %38 : vector<64x4x32xf32> to vector<64x128xf32>
    %cst_21 = arith.constant dense<0.000000e+00> : vector<16x128xf32>
    %40 = tpu.matmul %4, %39, %cst_21 {dimension_numbers = #tpu.dot_dimension_numbers<[1], [0], [0], [1], [0, 0, 1, 1], [], []>} : vector<16x64xf32>, vector<64x128xf32>, vector<16x128xf32> -> vector<16x128xf32>
    %41 = tpu.reciprocal %30 {approx = true} : vector<16x4xf32> -> vector<16x4xf32>
    %42 = vector.shape_cast %40 : vector<16x128xf32> to vector<16x4x32xf32>
    %43 = vector.shape_cast %41 : vector<16x4xf32> to vector<16x4x1xf32>
    %44 = vector.broadcast %43 : vector<16x4x1xf32> to vector<16x4x32xf32>
    %45 = arith.mulf %42, %44 : vector<16x4x32xf32>
    %46 = vector.shape_cast %45 : vector<16x4x32xf32> to vector<16x128xf32>
    %c0_22 = arith.constant 0 : index
    %c0_23 = arith.constant 0 : index
    %47 = vector.load %arg5[%c0_22, %c0_23] : memref<2x128xf32, #tpu.memory_space<vmem>>, vector<1x128xf32>
    %c1 = arith.constant 1 : index
    %c0_24 = arith.constant 0 : index
    %48 = vector.load %arg5[%c1, %c0_24] : memref<2x128xf32, #tpu.memory_space<vmem>>, vector<1x128xf32>
    %49 = vector.broadcast %47 : vector<1x128xf32> to vector<16x128xf32>
    %50 = arith.mulf %46, %49 : vector<16x128xf32>
    %51 = vector.broadcast %48 : vector<1x128xf32> to vector<16x128xf32>
    %52 = arith.addf %50, %51 : vector<16x128xf32>
    %c0_25 = arith.constant 0 : index
    %c0_26 = arith.constant 0 : index
    %53 = vector.load %arg6[%c0_25, %c0_26] : memref<16x128xf32, #tpu.memory_space<vmem>>, vector<16x128xf32>
    tpu.vector_store %arg6[%c0_25, %c0_26], %52 {strides = array<i32>} : memref<16x128xf32, #tpu.memory_space<vmem>>, vector<16x128xf32>,
    return
  }
}

</mosaic_0001>

<bundles_post_ra>
// kernel: tpu_custom_call.1
= control target key start
LH: loop header
LB: loop body
LE: loop exit
PB: predicated region body
PF: predicated region fallthrough
CT: control target
= control target key end

     0   :  { %vm418_vm0 = vcmask 257024   ;;  %s10689_s0 = inlined_call_operand.vmem [shape: f32[64,4,32], index: 0, kind: input, shape index: {}]   ;;  %s10690_s1 = inlined_call_operand.vmem [shape: f32[64,4,32], index: 1, kind: input, shape index: {}]   ;;  %s10691_s2 = inlined_call_operand.vmem [shape: f32[64,32], index: 2, kind: input, shape index: {}]   ;;  %s10692_s3 = inlined_call_operand.vmem [shape: f32[64,4,32], index: 3, kind: input, shape index: {}]   ;;  %s10693_s4 = inlined_call_operand.vmem [shape: f32[16,64], index: 4, kind: input, shape index: {}]   ;;  %s10694_s5 = inlined_call_operand.vmem [shape: f32[2,128], index: 5, kind: input, shape index: {}]   ;;  %s10695_s6 = inlined_call_operand.hbm [shape: f32[16,128], index: 6, kind: output, shape index: {}]  }
   0x1   :  { %v26_v0 = vld [vmem:[%s10689_s0 + $0x8] sm:$0xf]  ;;  %v24_v5 = vld [vmem:[%s10689_s0] sm:$0xf]  ;;  %v27_v8 = vld [vmem:[%s10689_s0 + $0xc] sm:$0xf] }
   0x2   :  { %v90_v1 = vld [vmem:[%s10690_s1 + $0x8] sm:$0xf]  ;;  %v88_v6 = vld [vmem:[%s10690_s1] sm:$0xf]  ;;  %v91_v9 = vld [vmem:[%s10690_s1 + $0xc] sm:$0xf] }
   0x3   :  { %v162_v2 = vld [vmem:[%s10692_s3 + $0x8] sm:$0xf]  ;;  %v160_v7 = vld [vmem:[%s10692_s3] sm:$0xf]  ;;  %v163_v13 = vld [vmem:[%s10692_s3 + $0xc] sm:$0xf] }
   0x4   :  { %v6830_v3 = vmul.f32 %v162_v2, %v90_v1  ;;  %v292_v4 = vmul.f32 %v162_v2, %v26_v0  ;;  %v6848_v11 = vmul.f32 %v160_v7, %v88_v6  ;;  %v290_v12 = vmul.f32 %v160_v7, %v24_v5  ;;  %v25_v14 = vld [vmem:[%s10689_s0 + $0x4] sm:$0xf]  ;;  %v29_v19 = vld [vmem:[%s10689_s0 + $0x14] sm:$0xf]  ;;  %v28_v26 = vld [vmem:[%s10689_s0 + $0x10] sm:$0xf] }
   0x5   :  { %v89_v15 = vld [vmem:[%s10690_s1 + $0x4] sm:$0xf]  ;;  %v6859_v16 = vmul.f32 %v163_v13, %v91_v9  ;;  %v293_v17 = vmul.f32 %v163_v13, %v27_v8  ;;  %v93_v20 = vld [vmem:[%s10690_s1 + $0x14] sm:$0xf]  ;;  %v92_v30 = vld [vmem:[%s10690_s1 + $0x10] sm:$0xf] }
   0x6   :  { %10881 = vst [vmem:[#allocation5_spill] sm:$0xff] %v6830_v3  ;;  %v356_v10 = vmul.f32 %v292_v4, %v6830_v3  ;;  %10882 = vst [vmem:[#allocation6_spill] sm:$0xff] %v6848_v11  ;;  %v161_v18 = vld [vmem:[%s10692_s3 + $0x4] sm:$0xf]  ;;  %v354_v22 = vmul.f32 %v290_v12, %v6848_v11  ;;  %v165_v25 = vld [vmem:[%s10692_s3 + $0x14] sm:$0xf] }
   0x7   :  { %10883 = vst [vmem:[#allocation7_spill] sm:$0xff] %v6859_v16  ;;  %v6872_v23 = vmul.f32 %v161_v18, %v89_v15  ;;  %v291_v24 = vmul.f32 %v161_v18, %v25_v14  ;;  %v357_v27 = vmul.f32 %v293_v17, %v6859_v16  ;;  %v6881_v28 = vmul.f32 %v165_v25, %v93_v20  ;;  %v164_v31 = vld [vmem:[%s10692_s3 + $0x10] sm:$0xf]  ;;  %v31_v32 = vld [vmem:[%s10689_s0 + $0x1c] sm:$0xf] }
   0x8   :  { %v425_v21 = vsel %vm418_vm0, %v356_v10, 0.0  ;;  %v295_v29 = vmul.f32 %v165_v25, %v29_v19  ;;  %v419_v33 = vsel %vm418_vm0, %v354_v22, 0.0  ;;  %v6894_v35 = vmul.f32 %v164_v31, %v92_v30  ;;  %v95_v37 = vld [vmem:[%s10690_s1 + $0x1c] sm:$0xf]  ;;  %v30_v43 = vld [vmem:[%s10689_s0 + $0x18] sm:$0xf] }
   0x9   :  { %10884 = vst [vmem:[#allocation8_spill] sm:$0xff] %v6872_v23  ;;  %426 = vadd.xlane.f32.xlu1 %v425_v21  ;;  %10885 = vst [vmem:[#allocation9_spill] sm:$0xff] %v6881_v28  ;;  %v355_v34 = vmul.f32 %v291_v24, %v6872_v23  ;;  %v294_v36 = vmul.f32 %v164_v31, %v28_v26  ;;  %v167_v38 = vld [vmem:[%s10692_s3 + $0x1c] sm:$0xf]  ;;  %420 = vadd.xlane.f32.xlu0 %v419_v33  ;;  %v428_v39 = vsel %vm418_vm0, %v357_v27, 0.0 }
   0xa   :  { %10886 = vst [vmem:[#allocation10_spill] sm:$0xff] %v6894_v35  ;;  %v359_v40 = vmul.f32 %v295_v29, %v6881_v28  ;;  %v6904_v41 = vmul.f32 %v167_v38, %v95_v37  ;;  %v297_v42 = vmul.f32 %v167_v38, %v31_v32  ;;  %v94_v44 = vld [vmem:[%s10690_s1 + $0x18] sm:$0xf]  ;;  %v33_v48 = vld [vmem:[%s10689_s0 + $0x24] sm:$0xf] }
   0xb   :  { %v422_v45 = vsel %vm418_vm0, %v355_v34, 0.0  ;;  %v358_v46 = vmul.f32 %v294_v36, %v6894_v35  ;;  %v166_v47 = vld [vmem:[%s10692_s3 + $0x18] sm:$0xf]  ;;  %v97_v51 = vld [vmem:[%s10690_s1 + $0x24] sm:$0xf] }
   0xc   :  { %10887 = vst [vmem:[#allocation11_spill] sm:$0xff] %v6904_v41  ;;  %v6920_v49 = vmul.f32 %v166_v47, %v94_v44  ;;  %v296_v50 = vmul.f32 %v166_v47, %v30_v43  ;;  %v169_v52 = vld [vmem:[%s10692_s3 + $0x24] sm:$0xf]  ;;  %v434_v53 = vsel %vm418_vm0, %v359_v40, 0.0  ;;  %v361_v54 = vmul.f32 %v297_v42, %v6904_v41  ;;  %v32_v57 = vld [vmem:[%s10689_s0 + $0x20] sm:$0xf] }
   0xd   :  { %429 = vadd.xlane.f32.xlu1 %v428_v39  ;;  %v6930_v55 = vmul.f32 %v169_v52, %v97_v51  ;;  %v299_v56 = vmul.f32 %v169_v52, %v33_v48  ;;  %v96_v58 = vld [vmem:[%s10690_s1 + $0x20] sm:$0xf]  ;;  %423 = vadd.xlane.f32.xlu0 %v422_v45  ;;  %v35_v60 = vld [vmem:[%s10689_s0 + $0x2c] sm:$0xf]  ;;  %v431_v61 = vsel %vm418_vm0, %v358_v46, 0.0 }
   0xe   :  { %10888 = vst [vmem:[#allocation12_spill] sm:$0xff] %v6920_v49  ;;  %v168_v59 = vld [vmem:[%s10692_s3 + $0x20] sm:$0xf]  ;;  %v360_v62 = vmul.f32 %v296_v50, %v6920_v49  ;;  %v99_v1 = vld [vmem:[%s10690_s1 + $0x2c] sm:$0xf]  ;;  %v440_v7 = vsel %vm418_vm0, %v361_v54, 0.0 }
   0xf   :  { %10889 = vst [vmem:[#allocation13_spill] sm:$0xff] %v6930_v55  ;;  %v6946_v63 = vmul.f32 %v168_v59, %v96_v58  ;;  %v298_v0 = vmul.f32 %v168_v59, %v32_v57  ;;  %v171_v2 = vld [vmem:[%s10692_s3 + $0x2c] sm:$0xf]  ;;  %v34_v4 = vld [vmem:[%s10689_s0 + $0x28] sm:$0xf]  ;;  %v363_v8 = vmul.f32 %v299_v56, %v6930_v55 }
  0x10   :  { %v98_v5 = vld [vmem:[%s10690_s1 + $0x28] sm:$0xf]  ;;  %v6965_v9 = vmul.f32 %v171_v2, %v99_v1  ;;  %v301_v10 = vmul.f32 %v171_v2, %v35_v60  ;;  %v37_v12 = vld [vmem:[%s10689_s0 + $0x34] sm:$0xf]  ;;  %v437_v15 = vsel %vm418_vm0, %v360_v62, 0.0 }
  0x11   :  { %10890 = vst [vmem:[#allocation14_spill] sm:$0xff] %v6946_v63  ;;  %435 = vadd.xlane.f32.xlu1 %v434_v53  ;;  %v170_v6 = vld [vmem:[%s10692_s3 + $0x28] sm:$0xf]  ;;  %432 = vadd.xlane.f32.xlu0 %v431_v61  ;;  %v101_v13 = vld [vmem:[%s10690_s1 + $0x34] sm:$0xf]  ;;  %v362_v17 = vmul.f32 %v298_v0, %v6946_v63  ;;  %v446_v24 = vsel %vm418_vm0, %v363_v8, 0.0 }
  0x12   :  { %10891 = vst [vmem:[#allocation15_spill] sm:$0xff] %v6965_v9  ;;  %v173_v14 = vld [vmem:[%s10692_s3 + $0x34] sm:$0xf]  ;;  %v6978_v18 = vmul.f32 %v170_v6, %v98_v5  ;;  %v300_v19 = vmul.f32 %v170_v6, %v34_v4  ;;  %v36_v20 = vld [vmem:[%s10689_s0 + $0x30] sm:$0xf]  ;;  %v365_v25 = vmul.f32 %v301_v10, %v6965_v9 }
  0x13   :  { %v100_v21 = vld [vmem:[%s10690_s1 + $0x30] sm:$0xf]  ;;  %v6991_v26 = vmul.f32 %v173_v14, %v101_v13  ;;  %v303_v27 = vmul.f32 %v173_v14, %v37_v12  ;;  %v39_v29 = vld [vmem:[%s10689_s0 + $0x3c] sm:$0xf]  ;;  %v443_v32 = vsel %vm418_vm0, %v362_v17, 0.0 }
  0x14   :  { %10892 = vst [vmem:[#allocation16_spill] sm:$0xff] %v6978_v18  ;;  %v172_v22 = vld [vmem:[%s10692_s3 + $0x30] sm:$0xf]  ;;  %v103_v30 = vld [vmem:[%s10690_s1 + $0x3c] sm:$0xf]  ;;  %v364_v33 = vmul.f32 %v300_v19, %v6978_v18  ;;  %v452_v40 = vsel %vm418_vm0, %v365_v25, 0.0 }
  0x15   :  { %441 = vadd.xlane.f32.xlu1 %v440_v7  ;;  %10893 = vst [vmem:[#allocation17_spill] sm:$0xff] %v6991_v26  ;;  %438 = vadd.xlane.f32.xlu0 %v437_v15  ;;  %v175_v31 = vld [vmem:[%s10692_s3 + $0x3c] sm:$0xf]  ;;  %v7004_v34 = vmul.f32 %v172_v22, %v100_v21  ;;  %v302_v36 = vmul.f32 %v172_v22, %v36_v20  ;;  %v38_v37 = vld [vmem:[%s10689_s0 + $0x38] sm:$0xf] }
  0x16   :  { %v102_v38 = vld [vmem:[%s10690_s1 + $0x38] sm:$0xf]  ;;  %v367_v42 = vmul.f32 %v303_v27, %v6991_v26  ;;  %v7017_v43 = vmul.f32 %v175_v31, %v103_v30  ;;  %v305_v44 = vmul.f32 %v175_v31, %v39_v29  ;;  %v41_v45 = vld [vmem:[%s10689_s0 + $0x44] sm:$0xf]  ;;  %v449_v48 = vsel %vm418_vm0, %v364_v33, 0.0 }
  0x17   :  { %10894 = vst [vmem:[#allocation18_spill] sm:$0xff] %v7004_v34  ;;  %v174_v39 = vld [vmem:[%s10692_s3 + $0x38] sm:$0xf]  ;;  %v105_v46 = vld [vmem:[%s10690_s1 + $0x44] sm:$0xf]  ;;  %v366_v50 = vmul.f32 %v302_v36, %v7004_v34 }
  0x18   :  { %10895 = vst [vmem:[#allocation19_spill] sm:$0xff] %v7017_v43  ;;  %v177_v47 = vld [vmem:[%s10692_s3 + $0x44] sm:$0xf]  ;;  %v7030_v51 = vmul.f32 %v174_v39, %v102_v38  ;;  %v304_v52 = vmul.f32 %v174_v39, %v38_v37  ;;  %v40_v53 = vld [vmem:[%s10689_s0 + $0x40] sm:$0xf]  ;;  %v458_v57 = vsel %vm418_vm0, %v367_v42, 0.0  ;;  %v369_v58 = vmul.f32 %v305_v44, %v7017_v43 }
  0x19   :  { %447 = vadd.xlane.f32.xlu1 %v446_v24  ;;  %444 = vadd.xlane.f32.xlu0 %v443_v32  ;;  %v104_v54 = vld [vmem:[%s10690_s1 + $0x40] sm:$0xf]  ;;  %v7043_v59 = vmul.f32 %v177_v47, %v105_v46  ;;  %v307_v60 = vmul.f32 %v177_v47, %v41_v45  ;;  %v43_v61 = vld [vmem:[%s10689_s0 + $0x4c] sm:$0xf]  ;;  %v455_v1 = vsel %vm418_vm0, %v366_v50, 0.0 }
  0x1a   :  { %10896 = vst [vmem:[#allocation20_spill] sm:$0xff] %v7030_v51  ;;  %v176_v56 = vld [vmem:[%s10692_s3 + $0x40] sm:$0xf]  ;;  %v107_v62 = vld [vmem:[%s10690_s1 + $0x4c] sm:$0xf]  ;;  %v368_v2 = vmul.f32 %v304_v52, %v7030_v51  ;;  %v464_v10 = vsel %vm418_vm0, %v369_v58, 0.0 }
  0x1b   :  { %10897 = vst [vmem:[#allocation21_spill] sm:$0xff] %v7043_v59  ;;  %v179_v0 = vld [vmem:[%s10692_s3 + $0x4c] sm:$0xf]  ;;  %v7056_v4 = vmul.f32 %v176_v56, %v104_v54  ;;  %v306_v5 = vmul.f32 %v176_v56, %v40_v53  ;;  %v42_v6 = vld [vmem:[%s10689_s0 + $0x48] sm:$0xf]  ;;  %v371_v12 = vmul.f32 %v307_v60, %v7043_v59 }
  0x1c   :  { %v106_v7 = vld [vmem:[%s10690_s1 + $0x48] sm:$0xf]  ;;  %v7069_v13 = vmul.f32 %v179_v0, %v107_v62  ;;  %v309_v14 = vmul.f32 %v179_v0, %v43_v61  ;;  %v49_v15 = vld [vmem:[%s10689_s0 + $0x64] sm:$0xf]  ;;  %v461_v20 = vsel %vm418_vm0, %v368_v2, 0.0 }
  0x1d   :  { %453 = vadd.xlane.f32.xlu1 %v452_v40  ;;  %450 = vadd.xlane.f32.xlu0 %v449_v48  ;;  %10898 = vst [vmem:[#allocation22_spill] sm:$0xff] %v7056_v4  ;;  %v178_v8 = vld [vmem:[%s10692_s3 + $0x48] sm:$0xf]  ;;  %v113_v17 = vld [vmem:[%s10690_s1 + $0x64] sm:$0xf]  ;;  %v370_v21 = vmul.f32 %v306_v5, %v7056_v4  ;;  %v470_v30 = vsel %vm418_vm0, %v371_v12, 0.0 }
  0x1e   :  { %10899 = vst [vmem:[#allocation23_spill] sm:$0xff] %v7069_v13  ;;  %v185_v19 = vld [vmem:[%s10692_s3 + $0x64] sm:$0xf]  ;;  %v7082_v22 = vmul.f32 %v178_v8, %v106_v7  ;;  %v308_v24 = vmul.f32 %v178_v8, %v42_v6  ;;  %v48_v25 = vld [vmem:[%s10689_s0 + $0x60] sm:$0xf]  ;;  %v373_v31 = vmul.f32 %v309_v14, %v7069_v13 }
  0x1f   :  { %v112_v27 = vld [vmem:[%s10690_s1 + $0x60] sm:$0xf]  ;;  %v7095_v32 = vmul.f32 %v185_v19, %v113_v17  ;;  %v315_v33 = vmul.f32 %v185_v19, %v49_v15  ;;  %v50_v36 = vld [vmem:[%s10689_s0 + $0x68] sm:$0xf]  ;;  %v467_v39 = vsel %vm418_vm0, %v370_v21, 0.0 }
  0x20   :  { %10900 = vst [vmem:[#allocation24_spill] sm:$0xff] %v7082_v22  ;;  %v184_v29 = vld [vmem:[%s10692_s3 + $0x60] sm:$0xf]  ;;  %v114_v37 = vld [vmem:[%s10690_s1 + $0x68] sm:$0xf]  ;;  %v372_v40 = vmul.f32 %v308_v24, %v7082_v22  ;;  %v476_v48 = vsel %vm418_vm0, %v373_v31, 0.0 }
  0x21   :  { %459 = vadd.xlane.f32.xlu1 %v458_v57  ;;  %456 = vadd.xlane.f32.xlu0 %v455_v1  ;;  %10901 = vst [vmem:[#allocation25_spill] sm:$0xff] %v7095_v32  ;;  %v186_v38 = vld [vmem:[%s10692_s3 + $0x68] sm:$0xf]  ;;  %v7108_v42 = vmul.f32 %v184_v29, %v112_v27  ;;  %v314_v44 = vmul.f32 %v184_v29, %v48_v25  ;;  %v44_v45 = vld [vmem:[%s10689_s0 + $0x50] sm:$0xf] }
  0x22   :  { %v108_v46 = vld [vmem:[%s10690_s1 + $0x50] sm:$0xf]  ;;  %v379_v50 = vmul.f32 %v315_v33, %v7095_v32  ;;  %v7121_v52 = vmul.f32 %v186_v38, %v114_v37  ;;  %v316_v53 = vmul.f32 %v186_v38, %v50_v36  ;;  %v51_v54 = vld [vmem:[%s10689_s0 + $0x6c] sm:$0xf]  ;;  %v473_v58 = vsel %vm418_vm0, %v372_v40, 0.0 }
  0x23   :  { %10902 = vst [vmem:[#allocation26_spill] sm:$0xff] %v7108_v42  ;;  %v180_v47 = vld [vmem:[%s10692_s3 + $0x50] sm:$0xf]  ;;  %v115_v56 = vld [vmem:[%s10690_s1 + $0x6c] sm:$0xf]  ;;  %v378_v60 = vmul.f32 %v314_v44, %v7108_v42 }
  0x24   :  { %10903 = vst [vmem:[#allocation27_spill] sm:$0xff] %v7121_v52  ;;  %v187_v57 = vld [vmem:[%s10692_s3 + $0x6c] sm:$0xf]  ;;  %v7134_v61 = vmul.f32 %v180_v47, %v108_v46  ;;  %v310_v62 = vmul.f32 %v180_v47, %v44_v45  ;;  %v45_v0 = vld [vmem:[%s10689_s0 + $0x54] sm:$0xf]  ;;  %v494_v5 = vsel %vm418_vm0, %v379_v50, 0.0  ;;  %v380_v6 = vmul.f32 %v316_v53, %v7121_v52 }
  0x25   :  { %465 = vadd.xlane.f32.xlu1 %v464_v10  ;;  %462 = vadd.xlane.f32.xlu0 %v461_v20  ;;  %v109_v1 = vld [vmem:[%s10690_s1 + $0x54] sm:$0xf]  ;;  %v7147_v7 = vmul.f32 %v187_v57, %v115_v56  ;;  %v317_v8 = vmul.f32 %v187_v57, %v51_v54  ;;  %v57_v10 = vld [vmem:[%s10689_s0 + $0x84] sm:$0xf]  ;;  %v491_v15 = vsel %vm418_vm0, %v378_v60, 0.0 }
  0x26   :  { %10904 = vst [vmem:[#allocation28_spill] sm:$0xff] %v7134_v61  ;;  %v181_v2 = vld [vmem:[%s10692_s3 + $0x54] sm:$0xf]  ;;  %v121_v12 = vld [vmem:[%s10690_s1 + $0x84] sm:$0xf]  ;;  %v374_v17 = vmul.f32 %v310_v62, %v7134_v61  ;;  %v497_v27 = vsel %vm418_vm0, %v380_v6, 0.0 }
  0x27   :  { %10905 = vst [vmem:[#allocation29_spill] sm:$0xff] %v7147_v7  ;;  %v193_v14 = vld [vmem:[%s10692_s3 + $0x84] sm:$0xf]  ;;  %v7160_v19 = vmul.f32 %v181_v2, %v109_v1  ;;  %v311_v20 = vmul.f32 %v181_v2, %v45_v0  ;;  %v56_v21 = vld [vmem:[%s10689_s0 + $0x80] sm:$0xf]  ;;  %v381_v29 = vmul.f32 %v317_v8, %v7147_v7 }
  0x28   :  { %v120_v24 = vld [vmem:[%s10690_s1 + $0x80] sm:$0xf]  ;;  %v323_v31 = vmul.f32 %v193_v14, %v57_v10  ;;  %v52_v33 = vld [vmem:[%s10689_s0 + $0x70] sm:$0xf]  ;;  %v479_v38 = vsel %vm418_vm0, %v374_v17, 0.0 }
  0x29   :  { %471 = vadd.xlane.f32.xlu1 %v470_v30  ;;  %468 = vadd.xlane.f32.xlu0 %v467_v39  ;;  %10906 = vst [vmem:[#allocation30_spill] sm:$0xff] %v7160_v19  ;;  %v192_v25 = vld [vmem:[%s10692_s3 + $0x80] sm:$0xf]  ;;  %v7173_v30 = vmul.f32 %v193_v14, %v121_v12  ;;  %v116_v36 = vld [vmem:[%s10690_s1 + $0x70] sm:$0xf]  ;;  %v375_v39 = vmul.f32 %v311_v20, %v7160_v19 }
  0x2a   :  { %v188_v37 = vld [vmem:[%s10692_s3 + $0x70] sm:$0xf]  ;;  %v7186_v40 = vmul.f32 %v192_v25, %v120_v24  ;;  %v322_v44 = vmul.f32 %v192_v25, %v56_v21  ;;  %v46_v45 = vld [vmem:[%s10689_s0 + $0x58] sm:$0xf]  ;;  %v47_v56 = vld [vmem:[%s10689_s0 + $0x5c] sm:$0xf] }
  0x2b   :  { %10907 = vst [vmem:[#allocation31_spill] sm:$0xff] %v7173_v30  ;;  %v110_v46 = vld [vmem:[%s10690_s1 + $0x58] sm:$0xf]  ;;  %v387_v50 = vmul.f32 %v323_v31, %v7173_v30  ;;  %v7199_v53 = vmul.f32 %v188_v37, %v116_v36  ;;  %v318_v54 = vmul.f32 %v188_v37, %v52_v33  ;;  %v111_v57 = vld [vmem:[%s10690_s1 + $0x5c] sm:$0xf]  ;;  %v482_v60 = vsel %vm418_vm0, %v375_v39, 0.0 }
  0x2c   :  { %10908 = vst [vmem:[#allocation32_spill] sm:$0xff] %v7186_v40  ;;  %v182_v47 = vld [vmem:[%s10692_s3 + $0x58] sm:$0xf]  ;;  %v386_v62 = vmul.f32 %v322_v44, %v7186_v40  ;;  %v58_v2 = vld [vmem:[%s10689_s0 + $0x88] sm:$0xf] }
  0x2d   :  { %477 = vadd.xlane.f32.xlu1 %v476_v48  ;;  %474 = vadd.xlane.f32.xlu0 %v473_v58  ;;  %v500_v48 = vsel %vm418_vm0, %v381_v29, 0.0  ;;  %10909 = vst [vmem:[#allocation33_spill] sm:$0xff] %v7199_v53  ;;  %v183_v58 = vld [vmem:[%s10692_s3 + $0x5c] sm:$0xf]  ;;  %v7212_v0 = vmul.f32 %v182_v47, %v110_v46  ;;  %v312_v1 = vmul.f32 %v182_v47, %v46_v45  ;;  %v194_v6 = vld [vmem:[%s10692_s3 + $0x88] sm:$0xf] }
  0x2e   :  { %v518_v8 = vsel %vm418_vm0, %v387_v50, 0.0  ;;  %v382_v10 = vmul.f32 %v318_v54, %v7199_v53  ;;  %v7225_v12 = vmul.f32 %v183_v58, %v111_v57  ;;  %v313_v14 = vmul.f32 %v183_v58, %v47_v56  ;;  %v123_v17 = vld [vmem:[%s10690_s1 + $0x8c] sm:$0xf]  ;;  %v53_v29 = vld [vmem:[%s10689_s0 + $0x74] sm:$0xf] }
  0x2f   :  { %10910 = vst [vmem:[#allocation34_spill] sm:$0xff] %v7212_v0  ;;  %v195_v20 = vld [vmem:[%s10692_s3 + $0x8c] sm:$0xf]  ;;  %v515_v21 = vsel %vm418_vm0, %v386_v62, 0.0  ;;  %v376_v24 = vmul.f32 %v312_v1, %v7212_v0  ;;  %v117_v31 = vld [vmem:[%s10690_s1 + $0x74] sm:$0xf] }
  0x30   :  { %10911 = vst [vmem:[#allocation35_spill] sm:$0xff] %v7225_v12  ;;  %v189_v33 = vld [vmem:[%s10692_s3 + $0x74] sm:$0xf]  ;;  %v503_v36 = vsel %vm418_vm0, %v382_v10, 0.0  ;;  %v377_v37 = vmul.f32 %v313_v14, %v7225_v12  ;;  %v65_v44 = vld [vmem:[%s10689_s0 + $0xa4] sm:$0xf] }
  0x31   :  { %495 = vadd.xlane.f32.xlu1 %v494_v5  ;;  %492 = vadd.xlane.f32.xlu0 %v491_v15  ;;  %v122_v5 = vld [vmem:[%s10690_s1 + $0x88] sm:$0xf]  ;;  %v59_v15 = vld [vmem:[%s10689_s0 + $0x8c] sm:$0xf]  ;;  %v129_v45 = vld [vmem:[%s10690_s1 + $0xa4] sm:$0xf]  ;;  %v7264_v50 = vmul.f32 %v189_v33, %v117_v31  ;;  %v319_v54 = vmul.f32 %v189_v33, %v53_v29 }
  0x32   :  { %v7238_v25 = vmul.f32 %v194_v6, %v122_v5  ;;  %v325_v39 = vmul.f32 %v195_v20, %v59_v15  ;;  %v201_v46 = vld [vmem:[%s10692_s3 + $0xa4] sm:$0xf]  ;;  %v485_v47 = vsel %vm418_vm0, %v376_v24, 0.0  ;;  %v64_v56 = vld [vmem:[%s10689_s0 + $0xa0] sm:$0xf] }
  0x33   :  { %10914 = vst [vmem:[#allocation38_spill] sm:$0xff] %v7264_v50  ;;  %v128_v57 = vld [vmem:[%s10690_s1 + $0xa0] sm:$0xf]  ;;  %v7277_v1 = vmul.f32 %v201_v46, %v129_v45  ;;  %v60_v5 = vld [vmem:[%s10689_s0 + $0x90] sm:$0xf]  ;;  %v383_v14 = vmul.f32 %v319_v54, %v7264_v50 }
  0x34   :  { %10912 = vst [vmem:[#allocation36_spill] sm:$0xff] %v7238_v25  ;;  %v200_v58 = vld [vmem:[%s10692_s3 + $0xa0] sm:$0xf]  ;;  %v190_v24 = vld [vmem:[%s10692_s3 + $0x78] sm:$0xf] }
  0x35   :  { %498 = vadd.xlane.f32.xlu1 %v497_v27  ;;  %480 = vadd.xlane.f32.xlu0 %v479_v38  ;;  %v324_v27 = vmul.f32 %v194_v6, %v58_v2  ;;  %v7251_v38 = vmul.f32 %v195_v20, %v123_v17  ;;  %10915 = vst [vmem:[#allocation39_spill] sm:$0xff] %v7277_v1  ;;  %v124_v6 = vld [vmem:[%s10690_s1 + $0x90] sm:$0xf]  ;;  %v54_v20 = vld [vmem:[%s10689_s0 + $0x78] sm:$0xf] }
  0x36   :  { %v331_v2 = vmul.f32 %v201_v46, %v65_v44  ;;  %v7290_v15 = vmul.f32 %v200_v58, %v128_v57  ;;  %v330_v17 = vmul.f32 %v200_v58, %v64_v56  ;;  %v506_v44 = vsel %vm418_vm0, %v383_v14, 0.0  ;;  %v130_v54 = vld [vmem:[%s10690_s1 + $0xa8] sm:$0xf] }
  0x37   :  { %10913 = vst [vmem:[#allocation37_spill] sm:$0xff] %v7251_v38  ;;  %v389_v62 = vmul.f32 %v325_v39, %v7251_v38  ;;  %v191_v39 = vld [vmem:[%s10692_s3 + $0x7c] sm:$0xf]  ;;  %v202_v56 = vld [vmem:[%s10692_s3 + $0xa8] sm:$0xf] }
  0x38   :  { %10916 = vst [vmem:[#allocation40_spill] sm:$0xff] %v7290_v15  ;;  %v395_v29 = vmul.f32 %v331_v2, %v7277_v1  ;;  %v394_v45 = vmul.f32 %v330_v17, %v7290_v15  ;;  %v67_v2 = vld [vmem:[%s10689_s0 + $0xac] sm:$0xf]  ;;  %v7342_v14 = vmul.f32 %v202_v56, %v130_v54 }
  0x39   :  { %501 = vadd.xlane.f32.xlu1 %v500_v48  ;;  %483 = vadd.xlane.f32.xlu0 %v482_v60  ;;  %v388_v48 = vmul.f32 %v324_v27, %v7238_v25  ;;  %v488_v60 = vsel %vm418_vm0, %v377_v37, 0.0  ;;  %v524_v27 = vsel %vm418_vm0, %v389_v62, 0.0  ;;  %v119_v37 = vld [vmem:[%s10690_s1 + $0x7c] sm:$0xf] }
  0x3a   :  { %v542_v57 = vsel %vm418_vm0, %v395_v29, 0.0  ;;  %10920 = vst [vmem:[#allocation44_spill] sm:$0xff] %v7342_v14 }
  0x3b   :  { %v521_v10 = vsel %vm418_vm0, %v388_v48, 0.0  ;;  %v66_v48 = vld [vmem:[%s10689_s0 + $0xa8] sm:$0xf] }
  0x3c   :  { %v332_v17 = vmul.f32 %v202_v56, %v66_v48  ;;  %v72_v56 = vld [vmem:[%s10689_s0 + $0xc0] sm:$0xf] }
  0x3d   :  { %519 = vadd.xlane.f32.xlu1 %v518_v8  ;;  %516 = vadd.xlane.f32.xlu0 %v515_v21  ;;  %v196_v8 = vld [vmem:[%s10692_s3 + $0x90] sm:$0xf]  ;;  %v118_v21 = vld [vmem:[%s10690_s1 + $0x78] sm:$0xf] }
  0x3e   :  { %v7303_v31 = vmul.f32 %v196_v8, %v124_v6  ;;  %v326_v33 = vmul.f32 %v196_v8, %v60_v5  ;;  %v7316_v46 = vmul.f32 %v190_v24, %v118_v21  ;;  %v131_v5 = vld [vmem:[%s10690_s1 + $0xac] sm:$0xf]  ;;  %v539_v8 = vsel %vm418_vm0, %v394_v45, 0.0  ;;  %v125_v21 = vld [vmem:[%s10690_s1 + $0x94] sm:$0xf] }
  0x3f   :  { %v203_v6 = vld [vmem:[%s10692_s3 + $0xac] sm:$0xf] }
  0x40   :  { %10917 = vst [vmem:[#allocation41_spill] sm:$0xff] %v7303_v31  ;;  %10918 = vst [vmem:[#allocation42_spill] sm:$0xff] %v7316_v46  ;;  %v390_v58 = vmul.f32 %v326_v33, %v7303_v31  ;;  %v7355_v33 = vmul.f32 %v203_v6, %v131_v5 }
  0x41   :  { %504 = vadd.xlane.f32.xlu1 %v503_v36  ;;  %486 = vadd.xlane.f32.xlu0 %v485_v47  ;;  %v55_v36 = vld [vmem:[%s10689_s0 + $0x7c] sm:$0xf]  ;;  %v320_v47 = vmul.f32 %v190_v24, %v54_v20  ;;  %v61_v20 = vld [vmem:[%s10689_s0 + $0x94] sm:$0xf] }
  0x42   :  { %v321_v62 = vmul.f32 %v191_v39, %v55_v36  ;;  %v197_v24 = vld [vmem:[%s10692_s3 + $0x94] sm:$0xf]  ;;  %10921 = vst [vmem:[#allocation45_spill] sm:$0xff] %v7355_v33  ;;  %v333_v36 = vmul.f32 %v203_v6, %v67_v2 }
  0x43   :  { %v7368_v48 = vmul.f32 %v197_v24, %v125_v21  ;;  %v327_v54 = vmul.f32 %v197_v24, %v61_v20 }
  0x44   :  { %v397_v2 = vmul.f32 %v333_v36, %v7355_v33  ;;  %v126_v36 = vld [vmem:[%s10690_s1 + $0x98] sm:$0xf] }
  0x45   :  { %489 = vadd.xlane.f32.xlu1 %v488_v60  ;;  %522 = vadd.xlane.f32.xlu0 %v521_v10  ;;  %v7329_v60 = vmul.f32 %v191_v39, %v119_v37  ;;  %v384_v10 = vmul.f32 %v320_v47, %v7316_v46  ;;  %v73_v37 = vld [vmem:[%s10689_s0 + $0xc4] sm:$0xf]  ;;  %v396_v47 = vmul.f32 %v332_v17, %v7342_v14  ;;  %v204_v17 = vld [vmem:[%s10692_s3 + $0xb0] sm:$0xf] }
  0x46   :  { %v137_v39 = vld [vmem:[%s10690_s1 + $0xc4] sm:$0xf]  ;;  %10922 = vst [vmem:[#allocation46_spill] sm:$0xff] %v7368_v48  ;;  %v391_v21 = vmul.f32 %v327_v54, %v7368_v48  ;;  %v63_v54 = vld [vmem:[%s10689_s0 + $0x9c] sm:$0xf] }
  0x47   :  { %10919 = vst [vmem:[#allocation43_spill] sm:$0xff] %v7329_v60  ;;  %v385_v29 = vmul.f32 %v321_v62, %v7329_v60  ;;  %v509_v45 = vsel %vm418_vm0, %v384_v10, 0.0  ;;  %v132_v10 = vld [vmem:[%s10690_s1 + $0xb0] sm:$0xf]  ;;  %v545_v20 = vsel %vm418_vm0, %v396_v47, 0.0 }
  0x49   :  { %525 = vadd.xlane.f32.xlu1 %v524_v27  ;;  %507 = vadd.xlane.f32.xlu0 %v506_v44  ;;  %v527_v27 = vsel %vm418_vm0, %v390_v58, 0.0  ;;  %v209_v44 = vld [vmem:[%s10692_s3 + $0xc4] sm:$0xf]  ;;  %v208_v58 = vld [vmem:[%s10692_s3 + $0xc0] sm:$0xf]  ;;  %v512_v62 = vsel %vm418_vm0, %v385_v29, 0.0 }
  0x4a   :  { %v7381_v5 = vmul.f32 %v209_v44, %v137_v39  ;;  %v339_v6 = vmul.f32 %v209_v44, %v73_v37  ;;  %v62_v29 = vld [vmem:[%s10689_s0 + $0x98] sm:$0xf]  ;;  %v548_v39 = vsel %vm418_vm0, %v397_v2, 0.0 }
  0x4b   :  { %v198_v37 = vld [vmem:[%s10692_s3 + $0x98] sm:$0xf] }
  0x4c   :  { %10923 = vst [vmem:[#allocation47_spill] sm:$0xff] %v7381_v5  ;;  %v403_v44 = vmul.f32 %v339_v6, %v7381_v5 }
  0x4d   :  { %543 = vadd.xlane.f32.xlu1 %v542_v57  ;;  %540 = vadd.xlane.f32.xlu0 %v539_v8  ;;  %v136_v57 = vld [vmem:[%s10690_s1 + $0xc0] sm:$0xf]  ;;  %v68_v8 = vld [vmem:[%s10689_s0 + $0xb0] sm:$0xf] }
  0x4e   :  { %v7394_v24 = vmul.f32 %v208_v58, %v136_v57  ;;  %v334_v47 = vmul.f32 %v204_v17, %v68_v8  ;;  %v199_v57 = vld [vmem:[%s10692_s3 + $0x9c] sm:$0xf] }
  0x50   :  { %10924 = vst [vmem:[#allocation48_spill] sm:$0xff] %v7394_v24 }
  0x51   :  { %528 = vadd.xlane.f32.xlu1 %v527_v27  ;;  %510 = vadd.xlane.f32.xlu0 %v509_v45  ;;  %v338_v27 = vmul.f32 %v208_v58, %v72_v56  ;;  %v7407_v45 = vmul.f32 %v204_v17, %v132_v10  ;;  %v127_v56 = vld [vmem:[%s10690_s1 + $0x9c] sm:$0xf] }
  0x53   :  { %10925 = vst [vmem:[#allocation49_spill] sm:$0xff] %v7407_v45 }
  0x55   :  { %513 = vadd.xlane.f32.xlu1 %v512_v62  ;;  %546 = vadd.xlane.f32.xlu0 %v545_v20 }
  0x56   :  { %11 = vsyncpa [#allocation3], 0  ;;  %v530_v58 = vsel %vm418_vm0, %v391_v21, 0.0  ;;  %v402_v62 = vmul.f32 %v338_v27, %v7394_v24  ;;  %v7420_v2 = vmul.f32 %v198_v37, %v126_v36  ;;  %v328_v6 = vmul.f32 %v198_v37, %v62_v29  ;;  %v74_v8 = vld [vmem:[%s10689_s0 + $0xc8] sm:$0xf]  ;;  %s6779_s16 = smov 64  }
  0x57   :  { %v138_v10 = vld [vmem:[%s10690_s1 + $0xc8] sm:$0xf]  ;;  %v566_v20 = vsel %vm418_vm0, %v403_v44, 0.0  ;;  %v398_v21 = vmul.f32 %v334_v47, %v7407_v45  ;;  %v7433_v27 = vmul.f32 %v199_v57, %v127_v56  ;;  %v329_v29 = vmul.f32 %v199_v57, %v63_v54  ;;  %v75_v36 = vld [vmem:[%s10689_s0 + $0xcc] sm:$0xf]  ;;  %s6780_s17 = smov 32  }
  0x58   :  { %10926 = vst [vmem:[#allocation50_spill] sm:$0xff] %v7420_v2  ;;  %v210_v17 = vld [vmem:[%s10692_s3 + $0xc8] sm:$0xf]  ;;  %v139_v37 = vld [vmem:[%s10690_s1 + $0xcc] sm:$0xf]  ;;  %v563_v44 = vsel %vm418_vm0, %v402_v62, 0.0  ;;  %v392_v47 = vmul.f32 %v328_v6, %v7420_v2 }
  0x59   :  { %549 = vadd.xlane.f32.xlu1 %v548_v39  ;;  %10927 = vst [vmem:[#allocation51_spill] sm:$0xff] %v7433_v27  ;;  %531 = vadd.xlane.f32.xlu0 %v530_v58  ;;  %v211_v39 = vld [vmem:[%s10692_s3 + $0xcc] sm:$0xf]  ;;  %v7446_v56 = vmul.f32 %v210_v17, %v138_v10  ;;  %v340_v54 = vmul.f32 %v210_v17, %v74_v8  ;;  %v69_v57 = vld [vmem:[%s10689_s0 + $0xb4] sm:$0xf]  ;;  %v551_v62 = vsel %vm418_vm0, %v398_v21, 0.0 }
  0x5a   :  { %v133_v58 = vld [vmem:[%s10690_s1 + $0xb4] sm:$0xf]  ;;  %v393_v6 = vmul.f32 %v329_v29, %v7433_v27  ;;  %v7459_v10 = vmul.f32 %v211_v39, %v139_v37  ;;  %v341_v8 = vmul.f32 %v211_v39, %v75_v36  ;;  %v81_v17 = vld [vmem:[%s10689_s0 + $0xe4] sm:$0xf]  ;;  %v533_v21 = vsel %vm418_vm0, %v392_v47, 0.0  ;;  %s6781_s18 = smov 96  }
  0x5b   :  { %10928 = vst [vmem:[#allocation52_spill] sm:$0xff] %v7446_v56  ;;  %v205_v49 = vld [vmem:[%s10692_s3 + $0xb4] sm:$0xf]  ;;  %v217_v41 = vld [vmem:[%s10692_s3 + $0xe4] sm:$0xf]  ;;  %v404_v29 = vmul.f32 %v340_v54, %v7446_v56  ;;  %vm2069_vm5 = vcmask 1041409  }
  0x5c   :  { %10929 = vst [vmem:[#allocation53_spill] sm:$0xff] %v7459_v10  ;;  %v7472_v37 = vmul.f32 %v205_v49, %v133_v58  ;;  %v335_v36 = vmul.f32 %v205_v49, %v69_v57  ;;  %v80_v39 = vld [vmem:[%s10689_s0 + $0xe0] sm:$0xf]  ;;  %v536_v47 = vsel %vm418_vm0, %v393_v6, 0.0  ;;  %v405_v54 = vmul.f32 %v341_v8, %v7459_v10  ;;  %v76_v57 = vld [vmem:[%s10689_s0 + $0xd0] sm:$0xf] }
  0x5d   :  { %567 = vadd.xlane.f32.xlu1 %v566_v20  ;;  %564 = vadd.xlane.f32.xlu0 %v563_v44  ;;  %v145_v20 = vld [vmem:[%s10690_s1 + $0xe4] sm:$0xf]  ;;  %v144_v44 = vld [vmem:[%s10690_s1 + $0xe0] sm:$0xf]  ;;  %v347_v49 = vmul.f32 %v217_v41, %v81_v17  ;;  %v212_v35 = vld [vmem:[%s10692_s3 + $0xd0] sm:$0xf] }
  0x5e   :  { %10930 = vst [vmem:[#allocation54_spill] sm:$0xff] %v7472_v37  ;;  %v216_v28 = vld [vmem:[%s10692_s3 + $0xe0] sm:$0xf]  ;;  %v7485_v58 = vmul.f32 %v217_v41, %v145_v20  ;;  %v569_v6 = vsel %vm418_vm0, %v404_v29, 0.0  ;;  %v399_v8 = vmul.f32 %v335_v36, %v7472_v37  ;;  %v70_v17 = vld [vmem:[%s10689_s0 + $0xb8] sm:$0xf] }
  0x5f   :  { %v7498_v20 = vmul.f32 %v216_v28, %v144_v44  ;;  %v346_v41 = vmul.f32 %v216_v28, %v80_v39  ;;  %v206_v11 = vld [vmem:[%s10692_s3 + $0xb8] sm:$0xf]  ;;  %v572_v29 = vsel %vm418_vm0, %v405_v54, 0.0  ;;  %v342_v28 = vmul.f32 %v212_v35, %v76_v57  ;;  %v71_v39 = vld [vmem:[%s10689_s0 + $0xbc] sm:$0xf]  ;;  %s6783_s24 = smov [#allocation2]  }
  0x60   :  { %10931 = vst [vmem:[#allocation55_spill] sm:$0xff] %v7485_v58  ;;  %v411_v36 = vmul.f32 %v347_v49, %v7485_v58  ;;  %v207_v3 = vld [vmem:[%s10692_s3 + $0xbc] sm:$0xf]  ;;  %v554_v54 = vsel %vm418_vm0, %v399_v8, 0.0  ;;  %v82_v57 = vld [vmem:[%s10689_s0 + $0xe8] sm:$0xf] }
  0x61   :  { %552 = vadd.xlane.f32.xlu1 %v551_v62  ;;  %534 = vadd.xlane.f32.xlu0 %v533_v21  ;;  %v140_v62 = vld [vmem:[%s10690_s1 + $0xd0] sm:$0xf]  ;;  %10932 = vst [vmem:[#allocation56_spill] sm:$0xff] %v7498_v20  ;;  %v134_v21 = vld [vmem:[%s10690_s1 + $0xb8] sm:$0xf]  ;;  %v410_v49 = vmul.f32 %v346_v41, %v7498_v20  ;;  %vm2071_vm7 = vcmask 1042434  }
  0x62   :  { %v7511_v44 = vmul.f32 %v212_v35, %v140_v62  ;;  %v7524_v62 = vmul.f32 %v206_v11, %v134_v21  ;;  %v336_v35 = vmul.f32 %v206_v11, %v70_v17  ;;  %v218_v16 = vld [vmem:[%s10692_s3 + $0xe8] sm:$0xf]  ;;  %v590_v8 = vsel %vm418_vm0, %v411_v36, 0.0  ;;  %v83_v17 = vld [vmem:[%s10689_s0 + $0xec] sm:$0xf]  ;;  %s6487_s25 = sshll.u32 %s6783_s24, 4  ;;  %s6488_s25 = int_to_ptr.vmem [resolvable:$true] %s6487_s25 }
  0x63   :  { %v337_v11 = vmul.f32 %v207_v3, %v71_v39  ;;  %v219_v23 = vld [vmem:[%s10692_s3 + $0xec] sm:$0xf]  ;;  %v587_v36 = vsel %vm418_vm0, %v410_v49, 0.0  ;;  %v77_v39 = vld [vmem:[%s10689_s0 + $0xd4] sm:$0xf]  ;;  %vm2073_vm9 = vcmask 1043459   ;;  %p6758_p1 = scmp.lt.s32.totalorder %s6488_s25, %s6488_s25 }
  0x64   :  { %10933 = vst [vmem:[#allocation57_spill] sm:$0xff] %v7511_v44  ;;  %10934 = vst [vmem:[#allocation58_spill] sm:$0xff] %v7524_v62  ;;  %v406_v41 = vmul.f32 %v342_v28, %v7511_v44  ;;  %v400_v28 = vmul.f32 %v336_v35, %v7524_v62  ;;  %v213_v51 = vld [vmem:[%s10692_s3 + $0xd4] sm:$0xf]  ;;  %v220_v43 = vld [vmem:[%s10692_s3 + $0xf0] sm:$0xf] }
  0x65   :  { %537 = vadd.xlane.f32.xlu1 %v536_v47  ;;  %570 = vadd.xlane.f32.xlu0 %v569_v6  ;;  %v135_v47 = vld [vmem:[%s10690_s1 + $0xbc] sm:$0xf]  ;;  %v146_v6 = vld [vmem:[%s10690_s1 + $0xe8] sm:$0xf]  ;;  %v214_v34 = vld [vmem:[%s10692_s3 + $0xd8] sm:$0xf] }
  0x66   :  { %v7537_v21 = vmul.f32 %v207_v3, %v135_v47  ;;  %v7550_v47 = vmul.f32 %v218_v16, %v146_v6  ;;  %v348_v3 = vmul.f32 %v218_v16, %v82_v57  ;;  %v575_v49 = vsel %vm418_vm0, %v406_v41, 0.0  ;;  %v84_v57 = vld [vmem:[%s10689_s0 + $0xf0] sm:$0xf]  ;;  %v221_v26 = vld [vmem:[%s10692_s3 + $0xf4] sm:$0xf]  ;;  %s6753_s26 = scalar_lea.vmem %s6488_s25, 256 }
  0x67   :  { %v349_v16 = vmul.f32 %v219_v23, %v83_v17  ;;  %v557_v41 = vsel %vm418_vm0, %v400_v28, 0.0  ;;  %v78_v17 = vld [vmem:[%s10689_s0 + $0xd8] sm:$0xf]  ;;  %v215_v18 = vld [vmem:[%s10692_s3 + $0xdc] sm:$0xf]  ;;  %vm2075_vm15 = vcmask 1044484   ;;  %p6754_p0 = scmp.ne.s32.totalorder %s6488_s25, %s6753_s26  ;;  %p6759_p2 = scmp.lt.s32.totalorder %s6753_s26, %s6753_s26 }
  0x68   :  { %10935 = vst [vmem:[#allocation59_spill] sm:$0xff] %v7537_v21  ;;  %10936 = vst [vmem:[#allocation60_spill] sm:$0xff] %v7550_v47  ;;  %v401_v35 = vmul.f32 %v337_v11, %v7537_v21  ;;  %v412_v11 = vmul.f32 %v348_v3, %v7550_v47  ;;  %v223_v9 = vld [vmem:[%s10692_s3 + $0xfc] sm:$0xf]  ;;  %v222_v55 = vld [vmem:[%s10692_s3 + $0xf8] sm:$0xf] }
  0x69   :  { %573 = vadd.xlane.f32.xlu1 %v572_v29  ;;  %555 = vadd.xlane.f32.xlu0 %v554_v54  ;;  %v147_v29 = vld [vmem:[%s10690_s1 + $0xec] sm:$0xf]  ;;  %v141_v54 = vld [vmem:[%s10690_s1 + $0xd4] sm:$0xf]  ;;  %p6760_p3 = por %p6759_p2, %p6758_p1 }
  0x6a   :  { %v7563_v6 = vmul.f32 %v219_v23, %v147_v29  ;;  %v7576_v29 = vmul.f32 %v213_v51, %v141_v54  ;;  %v343_v23 = vmul.f32 %v213_v51, %v77_v39  ;;  %v560_v28 = vsel %vm418_vm0, %v401_v35, 0.0  ;;  %v85_v39 = vld [vmem:[%s10689_s0 + $0xf4] sm:$0xf] }
  0x6b   :  { %v350_v51 = vmul.f32 %v220_v43, %v84_v57  ;;  %v593_v35 = vsel %vm418_vm0, %v412_v11, 0.0  ;;  %v79_v57 = vld [vmem:[%s10689_s0 + $0xdc] sm:$0xf]  ;;  %p6761_p4 = pnand %p6760_p3, %p6754_p0 }
  0x6c   :  { %10937 = vst [vmem:[#allocation61_spill] sm:$0xff] %v7563_v6  ;;  %10938 = vst [vmem:[#allocation62_spill] sm:$0xff] %v7576_v29  ;;  %v413_v3 = vmul.f32 %v349_v16, %v7563_v6  ;;  %v407_v16 = vmul.f32 %v343_v23, %v7576_v29 }
  0x6d   :  { %591 = vadd.xlane.f32.xlu1 %v590_v8  ;;  %588 = vadd.xlane.f32.xlu0 %v587_v36  ;;  %v148_v8 = vld [vmem:[%s10690_s1 + $0xf0] sm:$0xf]  ;;  %v142_v36 = vld [vmem:[%s10690_s1 + $0xd8] sm:$0xf] }
  0x6e   :  { %v7589_v54 = vmul.f32 %v220_v43, %v148_v8  ;;  %v7602_v8 = vmul.f32 %v214_v34, %v142_v36  ;;  %v344_v43 = vmul.f32 %v214_v34, %v78_v17  ;;  %v596_v11 = vsel %vm418_vm0, %v413_v3, 0.0  ;;  %v87_v17 = vld [vmem:[%s10689_s0 + $0xfc] sm:$0xf] }
  0x6f   :  { %v351_v34 = vmul.f32 %v221_v26, %v85_v39  ;;  %v578_v3 = vsel %vm418_vm0, %v407_v16, 0.0  ;;  %v86_v39 = vld [vmem:[%s10689_s0 + $0xf8] sm:$0xf] }
  0x70   :  { %10939 = vst [vmem:[#allocation63_spill] sm:$0xff] %v7589_v54  ;;  %10940 = vst [vmem:[#allocation64_spill] sm:$0xff] %v7602_v8  ;;  %v414_v23 = vmul.f32 %v350_v51, %v7589_v54  ;;  %v408_v51 = vmul.f32 %v344_v43, %v7602_v8  ;;  %v352_v0 = vmul.f32 %v222_v55, %v86_v39 }
  0x71   :  { %576 = vadd.xlane.f32.xlu1 %v575_v49  ;;  %558 = vadd.xlane.f32.xlu0 %v557_v41  ;;  %v149_v49 = vld [vmem:[%s10690_s1 + $0xf4] sm:$0xf]  ;;  %v143_v41 = vld [vmem:[%s10690_s1 + $0xdc] sm:$0xf] }
  0x72   :  { %v7615_v36 = vmul.f32 %v221_v26, %v149_v49  ;;  %v7628_v49 = vmul.f32 %v215_v18, %v143_v41  ;;  %v345_v26 = vmul.f32 %v215_v18, %v79_v57  ;;  %v599_v16 = vsel %vm418_vm0, %v414_v23, 0.0 }
  0x73   :  { %v353_v18 = vmul.f32 %v223_v9, %v87_v17  ;;  %v581_v57 = vsel %vm418_vm0, %v408_v51, 0.0  ;;  %v7662_v51 = vld [vmem:[%s10693_s4 + $0x8] sm:$0xff] }
  0x74   :  { %10941 = vst [vmem:[#allocation65_spill] sm:$0xff] %v7615_v36  ;;  %10942 = vst [vmem:[#allocation66_spill] sm:$0xff] %v7628_v49  ;;  %v415_v43 = vmul.f32 %v351_v34, %v7615_v36 }
  0x75   :  { %561 = vadd.xlane.f32.xlu1 %v560_v28  ;;  %594 = vadd.xlane.f32.xlu0 %v593_v35  ;;  %v151_v28 = vld [vmem:[%s10690_s1 + $0xfc] sm:$0xf]  ;;  %v150_v35 = vld [vmem:[%s10690_s1 + $0xf8] sm:$0xf] }
  0x76   :  { %v7641_v41 = vmul.f32 %v223_v9, %v151_v28  ;;  %v7645_v63 = vmul.f32 %v222_v55, %v150_v35  ;;  %v602_v12 = vsel %vm418_vm0, %v415_v43, 0.0  ;;  %v10715_v28 = vlaneseq }
  0x78   :  { %10943 = vst [vmem:[#allocation67_spill] sm:$0xff] %v7641_v41  ;;  %10944 = vst [vmem:[#allocation68_spill] sm:$0xff] %v7645_v63  ;;  %v417_v61 = vmul.f32 %v353_v18, %v7641_v41  ;;  %v416_v34 = vmul.f32 %v352_v0, %v7645_v63  ;;  %v7654_v55 = vshrl.u32 %v10715_v28, 7 }
  0x79   :  { %597 = vadd.xlane.f32.xlu1 %v596_v11  ;;  %579 = vadd.xlane.f32.xlu0 %v578_v3  ;;  %v409_v11 = vmul.f32 %v345_v26, %v7628_v49 }
  0x7a   :  { %v608_v9 = vsel %vm418_vm0, %v417_v61, 0.0  ;;  %v605_v17 = vsel %vm418_vm0, %v416_v34, 0.0  ;;  %10945 = vst [vmem:[#allocation69_spill] sm:$0xff] %v7654_v55  ;;  %v7657_v3 = vsub.s32 0, %v7654_v55  ;;  %v7667_v61 = vsub.s32 1, %v7654_v55  ;;  %v7702_v34 = vld [vmem:[%s10693_s4] sm:$0xff] }
  0x7b   :  { %v584_v23 = vsel %vm418_vm0, %v409_v11, 0.0  ;;  %v7685_v43 = vsub.s32 2, %v7654_v55  ;;  %v7729_v4 = vsub.s32 3, %v7654_v55  ;;  %v7757_v2 = vsub.s32 4, %v7654_v55 }
  0x7c   :  { %10946 = vst [vmem:[#allocation70_spill] sm:$0xff] %v7657_v3  ;;  %10947 = vst [vmem:[#allocation71_spill] sm:$0xff] %v7667_v61  ;;  %v7673_v26 = vrot.slane %v7662_v51, %v7657_v3  ;;  %v7680_v35 = vrot.slane %v7662_v51, %v7667_v61  ;;  %v7720_v22 = vrot.slane %v7702_v34, %v7667_v61  ;;  %v7793_v33 = vsub.s32 5, %v7654_v55 }
  0x7d   :  { %600 = vadd.xlane.f32.xlu1 %v599_v16  ;;  %582 = vadd.xlane.f32.xlu0 %v581_v57  ;;  %10948 = vst [vmem:[#allocation72_spill] sm:$0xff] %v7685_v43  ;;  %v7695_v11 = vrot.slane %v7662_v51, %v7685_v43  ;;  %10949 = vst [vmem:[#allocation73_spill] sm:$0xff] %v7729_v4  ;;  %v7739_v50 = vrot.slane %v7662_v51, %v7729_v4  ;;  %v7827_v36 = vsub.s32 6, %v7654_v55  ;;  %vm2077_vm0 = vcmask 1045509  }
  0x7e   :  { %v7749_v7 = vrot.slane %v7702_v34, %v7685_v43  ;;  %10950 = vst [vmem:[#allocation74_spill] sm:$0xff] %v7757_v2  ;;  %v7767_v31 = vrot.slane %v7662_v51, %v7757_v2  ;;  %v7783_v21 = vrot.slane %v7702_v34, %v7729_v4  ;;  %10951 = vst [vmem:[#allocation75_spill] sm:$0xff] %v7793_v33  ;;  %v7869_v61 = vsub.s32 7, %v7654_v55 }
  0x7f   :  { %v7803_v49 = vrot.slane %v7662_v51, %v7793_v33  ;;  %v7818_v5 = vrot.slane %v7702_v34, %v7757_v2  ;;  %10952 = vst [vmem:[#allocation76_spill] sm:$0xff] %v7827_v36  ;;  %v7837_v47 = vrot.slane %v7662_v51, %v7827_v36  ;;  %v7854_v54 = vrot.slane %v7702_v34, %v7793_v33 }
  0x80   :  { %10960 = vst [vmem:[#allocation84_spill] sm:$0xff] %v7869_v61 }
  0x81   :  { %603 = vadd.xlane.f32.xlu1 %v602_v12  ;;  %585 = vadd.xlane.f32.xlu0 %v584_v23 }
  0x85   :  { %609 = vadd.xlane.f32.xlu1 %v608_v9  ;;  %606 = vadd.xlane.f32.xlu0 %v605_v17  ;;  %v7710_v17 = vrot.slane %v7702_v34, %v7657_v3 }
  0x92   :  { %v7664_v0 = vpop.xlane.xlu1 %426  ;;  %v7669_v12 = vpop.xlane.xlu0 %420 }
  0x93   :  { %vm611_vm2 = vcmp.ge.f32.partialorder %v7669_v12, 0.0  ;;  %vm613_vm3 = vcmp.ge.f32.partialorder %v7664_v0, 0.0 }
  0x96   :  { %v7675_v39 = vpop.xlane.xlu1 %429  ;;  %1092 = vbcast.lane.b32.xlu1 %v7673_v26, 264  ;;  %v7682_v16 = vpop.xlane.xlu0 %423 }
  0x97   :  { %vm612_vm1 = vcmp.ge.f32.partialorder %v7682_v16, 0.0  ;;  %vm614_vm4 = vcmp.ge.f32.partialorder %v7675_v39, 0.0 }
  0x9a   :  { %v7687_v18 = vpop.xlane.xlu1 %435  ;;  %1123 = vbcast.lane.b32.xlu1 %v7680_v35, 256  ;;  %v7690_v57 = vpop.xlane.xlu0 %432 }
  0x9b   :  { %1088 = vbcast.lane.b32.xlu0 %v7673_v26, 256  ;;  %vm615_vm6 = vcmp.ge.f32.partialorder %v7690_v57, 0.0  ;;  %vm616_vm8 = vcmp.ge.f32.partialorder %v7687_v18, 0.0 }
  0x9e   :  { %v7697_v23 = vpop.xlane.xlu1 %441  ;;  %1127 = vbcast.lane.b32.xlu1 %v7680_v35, 264  ;;  %v7705_v9 = vpop.xlane.xlu0 %438 }
  0x9f   :  { %1158 = vbcast.lane.b32.xlu0 %v7695_v11, 256  ;;  %vm617_vm10 = vcmp.ge.f32.partialorder %v7705_v9, 0.0  ;;  %vm618_vm13 = vcmp.ge.f32.partialorder %v7697_v23, 0.0 }
  0xa2   :  { %v7712_v28 = vpop.xlane.xlu1 %447  ;;  %1162 = vbcast.lane.b32.xlu1 %v7695_v11, 264  ;;  %v7715_v19 = vpop.xlane.xlu0 %444 }
  0xa3   :  { %808 = vbcast.lane.b32.xlu0 %v7710_v17, 256  ;;  %vm620_vm11 = vcmp.ge.f32.partialorder %v7712_v28, 0.0  ;;  %vm619_vm12 = vcmp.ge.f32.partialorder %v7715_v19, 0.0 }
  0xa6   :  { %v7722_v13 = vpop.xlane.xlu1 %453  ;;  %812 = vbcast.lane.b32.xlu1 %v7710_v17, 264  ;;  %v7725_v59 = vpop.xlane.xlu0 %450 }
  0xa7   :  { %843 = vbcast.lane.b32.xlu0 %v7720_v22, 256  ;;  %vm621_vm14 = vcmp.ge.f32.partialorder %v7725_v59, 0.0 }
  0xaa   :  { %v7731_v46 = vpop.xlane.xlu1 %459  ;;  %847 = vbcast.lane.b32.xlu1 %v7720_v22, 264  ;;  %v7734_v60 = vpop.xlane.xlu0 %456 }
  0xab   :  { %1096 = vbcast.lane.b32.xlu0 %v7673_v26, 272 }
  0xae   :  { %v7741_v53 = vpop.xlane.xlu1 %465  ;;  %1131 = vbcast.lane.b32.xlu1 %v7680_v35, 272  ;;  %v7744_v52 = vpop.xlane.xlu0 %462 }
  0xaf   :  { %1193 = vbcast.lane.b32.xlu0 %v7739_v50, 256 }
  0xb2   :  { %v7751_v32 = vpop.xlane.xlu1 %471  ;;  %1197 = vbcast.lane.b32.xlu1 %v7739_v50, 264  ;;  %v7754_v42 = vpop.xlane.xlu0 %468 }
  0xb3   :  { %878 = vbcast.lane.b32.xlu0 %v7749_v7, 256 }
  0xb6   :  { %v7760_v27 = vpop.xlane.xlu1 %477  ;;  %882 = vbcast.lane.b32.xlu1 %v7749_v7, 264  ;;  %v7763_v48 = vpop.xlane.xlu0 %474 }
  0xb7   :  { %1166 = vbcast.lane.b32.xlu0 %v7695_v11, 272 }
  0xba   :  { %v7770_v25 = vpop.xlane.xlu1 %495  ;;  %1228 = vbcast.lane.b32.xlu1 %v7767_v31, 256  ;;  %v7773_v38 = vpop.xlane.xlu0 %492 }
  0xbb   :  { %1232 = vbcast.lane.b32.xlu0 %v7767_v31, 264 }
  0xbe   :  { %v7776_v30 = vpop.xlane.xlu1 %498  ;;  %816 = vbcast.lane.b32.xlu1 %v7710_v17, 272  ;;  %v7779_v40 = vpop.xlane.xlu0 %480 }
  0xbf   :  { %851 = vbcast.lane.b32.xlu0 %v7720_v22, 272 }
  0xc2   :  { %v7786_v62 = vpop.xlane.xlu1 %501  ;;  %913 = vbcast.lane.b32.xlu1 %v7783_v21, 256  ;;  %v7789_v37 = vpop.xlane.xlu0 %483 }
  0xc3   :  { %917 = vbcast.lane.b32.xlu0 %v7783_v21, 264 }
  0xc6   :  { %v7795_v45 = vpop.xlane.xlu1 %519  ;;  %1100 = vbcast.lane.b32.xlu1 %v7673_v26, 280  ;;  %v7798_v1 = vpop.xlane.xlu0 %516 }
  0xc7   :  { %1135 = vbcast.lane.b32.xlu0 %v7680_v35, 280 }
  0xca   :  { %v7805_v14 = vpop.xlane.xlu1 %504  ;;  %1201 = vbcast.lane.b32.xlu1 %v7739_v50, 272  ;;  %v7808_v29 = vpop.xlane.xlu0 %486 }
  0xcb   :  { %1263 = vbcast.lane.b32.xlu0 %v7803_v49, 256 }
  0xce   :  { %v7811_v10 = vpop.xlane.xlu1 %489  ;;  %1267 = vbcast.lane.b32.xlu1 %v7803_v49, 264  ;;  %v7814_v15 = vpop.xlane.xlu0 %522 }
  0xcf   :  { %886 = vbcast.lane.b32.xlu0 %v7749_v7, 272 }
  0xd2   :  { %v7821_v41 = vpop.xlane.xlu1 %525  ;;  %948 = vbcast.lane.b32.xlu1 %v7818_v5, 256  ;;  %v7824_v8 = vpop.xlane.xlu0 %507 }
  0xd3   :  { %952 = vbcast.lane.b32.xlu0 %v7818_v5, 264 }
  0xd6   :  { %v7830_v6 = vpop.xlane.xlu1 %543  ;;  %1170 = vbcast.lane.b32.xlu1 %v7695_v11, 280  ;;  %v7833_v44 = vpop.xlane.xlu0 %540 }
  0xd7   :  { %1236 = vbcast.lane.b32.xlu0 %v7767_v31, 272 }
  0xda   :  { %v7840_v20 = vpop.xlane.xlu1 %528  ;;  %1298 = vbcast.lane.b32.xlu1 %v7837_v47, 256  ;;  %v7843_v56 = vpop.xlane.xlu0 %510 }
  0xdb   :  { %10953 = vst [vmem:[#allocation77_spill] sm:$0xff] %v7843_v56  ;;  %1302 = vbcast.lane.b32.xlu0 %v7837_v47, 264  ;;  %v678_v56 = vmul.f32 0.2, %v7675_v39 }
  0xde   :  { %v7846_v24 = vpop.xlane.xlu1 %513  ;;  %820 = vbcast.lane.b32.xlu1 %v7710_v17, 280  ;;  %v7849_v63 = vpop.xlane.xlu0 %546 }
  0xdf   :  { %10954 = vst [vmem:[#allocation78_spill] sm:$0xff] %v7846_v24  ;;  %10955 = vst [vmem:[#allocation79_spill] sm:$0xff] %v7849_v63  ;;  %855 = vbcast.lane.b32.xlu0 %v7720_v22, 280 }
  0xe2   :  { %v7856_v58 = vpop.xlane.xlu1 %549  ;;  %921 = vbcast.lane.b32.xlu1 %v7783_v21, 272  ;;  %v7859_v2 = vpop.xlane.xlu0 %531 }
  0xe3   :  { %10956 = vst [vmem:[#allocation80_spill] sm:$0xff] %v7856_v58  ;;  %10957 = vst [vmem:[#allocation81_spill] sm:$0xff] %v7859_v2  ;;  %983 = vbcast.lane.b32.xlu0 %v7854_v54, 256 }
  0xe6   :  { %v7862_v4 = vpop.xlane.xlu1 %567  ;;  %987 = vbcast.lane.b32.xlu1 %v7854_v54, 264  ;;  %v7865_v43 = vpop.xlane.xlu0 %564 }
  0xe7   :  { %10958 = vst [vmem:[#allocation82_spill] sm:$0xff] %v7862_v4  ;;  %10959 = vst [vmem:[#allocation83_spill] sm:$0xff] %v7865_v43  ;;  %1104 = vbcast.lane.b32.xlu0 %v7673_v26, 288  ;;  %v7879_v4 = vrot.slane %v7662_v51, %v7869_v61  ;;  %v7895_v51 = vrot.slane %v7702_v34, %v7827_v36 }
  0xea   :  { %v7871_v33 = vpop.xlane.xlu1 %552  ;;  %1139 = vbcast.lane.b32.xlu1 %v7680_v35, 288  ;;  %v7874_v3 = vpop.xlane.xlu0 %534 }
  0xeb   :  { %10961 = vst [vmem:[#allocation85_spill] sm:$0xff] %v7871_v33  ;;  %10962 = vst [vmem:[#allocation86_spill] sm:$0xff] %v7874_v3  ;;  %1205 = vbcast.lane.b32.xlu0 %v7739_v50, 280 }
  0xee   :  { %v7881_v2 = vpop.xlane.xlu1 %537  ;;  %1271 = vbcast.lane.b32.xlu1 %v7803_v49, 272  ;;  %v7884_v43 = vpop.xlane.xlu0 %570 }
  0xef   :  { %10963 = vst [vmem:[#allocation87_spill] sm:$0xff] %v7881_v2  ;;  %10964 = vst [vmem:[#allocation88_spill] sm:$0xff] %v7884_v43  ;;  %1333 = vbcast.lane.b32.xlu0 %v7879_v4, 256 }
  0xf2   :  { %v7887_v58 = vpop.xlane.xlu1 %573  ;;  %1337 = vbcast.lane.b32.xlu1 %v7879_v4, 264  ;;  %v7890_v33 = vpop.xlane.xlu0 %555 }
  0xf3   :  { %10965 = vst [vmem:[#allocation89_spill] sm:$0xff] %v7887_v58  ;;  %10966 = vst [vmem:[#allocation90_spill] sm:$0xff] %v7890_v33  ;;  %890 = vbcast.lane.b32.xlu0 %v7749_v7, 280 }
  0xf6   :  { %v7897_v3 = vpop.xlane.xlu1 %591  ;;  %956 = vbcast.lane.b32.xlu1 %v7818_v5, 272  ;;  %v7900_v2 = vpop.xlane.xlu0 %588 }
  0xf7   :  { %10967 = vst [vmem:[#allocation91_spill] sm:$0xff] %v7897_v3  ;;  %10968 = vst [vmem:[#allocation92_spill] sm:$0xff] %v7900_v2  ;;  %1018 = vbcast.lane.b32.xlu0 %v7895_v51, 256 }
  0xfa   :  { %v7903_v43 = vpop.xlane.xlu1 %576  ;;  %1022 = vbcast.lane.b32.xlu1 %v7895_v51, 264  ;;  %v7906_v58 = vpop.xlane.xlu0 %558 }
  0xfb   :  { %10969 = vst [vmem:[#allocation93_spill] sm:$0xff] %v7903_v43  ;;  %10970 = vst [vmem:[#allocation94_spill] sm:$0xff] %v7906_v58  ;;  %1174 = vbcast.lane.b32.xlu0 %v7695_v11, 288 }
  0xfe   :  { %v7909_v33 = vpop.xlane.xlu1 %561  ;;  %1240 = vbcast.lane.b32.xlu1 %v7767_v31, 280  ;;  %v7912_v36 = vpop.xlane.xlu0 %594 }
  0xff   :  { %10971 = vst [vmem:[#allocation95_spill] sm:$0xff] %v7909_v33  ;;  %10972 = vst [vmem:[#allocation96_spill] sm:$0xff] %v7912_v36  ;;  %1306 = vbcast.lane.b32.xlu0 %v7837_v47, 272  ;;  %v7928_v33 = vrot.slane %v7702_v34, %v7869_v61 }
 0x102   :  { %v7915_v3 = vpop.xlane.xlu1 %597  ;;  %824 = vbcast.lane.b32.xlu1 %v7710_v17, 288  ;;  %v7918_v2 = vpop.xlane.xlu0 %579 }
 0x103   :  { %10973 = vst [vmem:[#allocation97_spill] sm:$0xff] %v7915_v3  ;;  %10974 = vst [vmem:[#allocation98_spill] sm:$0xff] %v7918_v2  ;;  %859 = vbcast.lane.b32.xlu0 %v7720_v22, 288 }
 0x106   :  { %v7921_v43 = vpop.xlane.xlu1 %600  ;;  %925 = vbcast.lane.b32.xlu1 %v7783_v21, 280  ;;  %v7924_v58 = vpop.xlane.xlu0 %582 }
 0x107   :  { %10975 = vst [vmem:[#allocation99_spill] sm:$0xff] %v7921_v43  ;;  %10976 = vst [vmem:[#allocation100_spill] sm:$0xff] %v7924_v58  ;;  %991 = vbcast.lane.b32.xlu0 %v7854_v54, 272 }
 0x10a   :  { %v7931_v36 = vpop.xlane.xlu1 %603  ;;  %1053 = vbcast.lane.b32.xlu1 %v7928_v33, 256  ;;  %v7934_v3 = vpop.xlane.xlu0 %585 }
 0x10b   :  { %10977 = vst [vmem:[#allocation101_spill] sm:$0xff] %v7931_v36  ;;  %10978 = vst [vmem:[#allocation102_spill] sm:$0xff] %v7934_v3  ;;  %1057 = vbcast.lane.b32.xlu0 %v7928_v33, 264 }
 0x10e   :  { %v7937_v2 = vpop.xlane.xlu1 %609  ;;  %1108 = vbcast.lane.b32.xlu1 %v7673_v26, 296  ;;  %v7940_v43 = vpop.xlane.xlu0 %606 }
 0x10f   :  { %10979 = vst [vmem:[#allocation103_spill] sm:$0xff] %v7937_v2  ;;  %10980 = vst [vmem:[#allocation104_spill] sm:$0xff] %v7940_v43  ;;  %1143 = vbcast.lane.b32.xlu0 %v7680_v35, 296 }
 0x112   :  { %v7943_v34 = vpop.permute.xlu1 %1092  ;;  %1209 = vbcast.lane.b32.xlu1 %v7739_v50, 288  ;;  %v7946_v61 = vpop.permute.xlu0 %1088 }
 0x113   :  { %10981 = vst [vmem:[#allocation105_spill] sm:$0xff] %v7943_v34  ;;  %10982 = vst [vmem:[#allocation106_spill] sm:$0xff] %v7946_v61  ;;  %1275 = vbcast.lane.b32.xlu0 %v7803_v49, 280 }
 0x116   :  { %v7949_v36 = vpop.permute.xlu1 %1123  ;;  %1341 = vbcast.lane.b32.xlu1 %v7879_v4, 272  ;;  %v7952_v3 = vpop.permute.xlu0 %1158 }
 0x117   :  { %10983 = vst [vmem:[#allocation107_spill] sm:$0xff] %v7949_v36  ;;  %10984 = vst [vmem:[#allocation108_spill] sm:$0xff] %v7952_v3  ;;  %894 = vbcast.lane.b32.xlu0 %v7749_v7, 288 }
 0x11a   :  { %v7955_v2 = vpop.permute.xlu1 %1127  ;;  %960 = vbcast.lane.b32.xlu1 %v7818_v5, 280  ;;  %v7958_v43 = vpop.permute.xlu0 %808 }
 0x11b   :  { %10985 = vst [vmem:[#allocation109_spill] sm:$0xff] %v7955_v2  ;;  %10986 = vst [vmem:[#allocation110_spill] sm:$0xff] %v7958_v43  ;;  %1026 = vbcast.lane.b32.xlu0 %v7895_v51, 272 }
 0x11e   :  { %v7961_v34 = vpop.permute.xlu1 %1162  ;;  %1178 = vbcast.lane.b32.xlu1 %v7695_v11, 296  ;;  %v7964_v61 = vpop.permute.xlu0 %843 }
 0x11f   :  { %10987 = vst [vmem:[#allocation111_spill] sm:$0xff] %v7961_v34  ;;  %10988 = vst [vmem:[#allocation112_spill] sm:$0xff] %v7964_v61  ;;  %1244 = vbcast.lane.b32.xlu0 %v7767_v31, 288  ;;  %v10994_v61 = vlaneseq }
 0x121   :  { %v1812_v58 = vand.u32 127, %v10994_v61 }
 0x122   :  { %v7967_v36 = vpop.permute.xlu1 %812  ;;  %1310 = vbcast.lane.b32.xlu1 %v7837_v47, 280  ;;  %v7970_v3 = vpop.permute.xlu0 %1096 }
 0x123   :  { %10989 = vst [vmem:[#allocation113_spill] sm:$0xff] %v7967_v36  ;;  %10990 = vst [vmem:[#allocation114_spill] sm:$0xff] %v7970_v3  ;;  %828 = vbcast.lane.b32.xlu0 %v7710_v17, 296  ;;  %v676_v36 = vmul.f32 0.2, %v7682_v16 }
 0x125   :  { %v7996_v61 = vsel %vm612_vm1, %v7682_v16, %v676_v36  ;;  %vm622_vm1 = vcmp.ge.f32.partialorder %v7722_v13, 0.0 }
 0x126   :  { %v7973_v2 = vpop.permute.xlu1 %847  ;;  %863 = vbcast.lane.b32.xlu1 %v7720_v22, 296  ;;  %v7976_v43 = vpop.permute.xlu0 %1193  ;;  %10997 = vst [vmem:[#allocation120_spill] sm:$0xff] %v7996_v61 }
 0x127   :  { %10991 = vst [vmem:[#allocation115_spill] sm:$0xff] %v7973_v2  ;;  %10992 = vst [vmem:[#allocation116_spill] sm:$0xff] %v7976_v43  ;;  %929 = vbcast.lane.b32.xlu0 %v7783_v21, 288  ;;  %v675_v2 = vmul.f32 0.2, %v7669_v12 }
 0x128   :  { %v677_v43 = vmul.f32 0.2, %v7664_v0 }
 0x129   :  { %v8004_v63 = vsel %vm611_vm2, %v7669_v12, %v675_v2  ;;  %vm624_vm2 = vcmp.ge.f32.partialorder %v7731_v46, 0.0 }
 0x12a   :  { %v7979_v34 = vpop.permute.xlu1 %1131  ;;  %995 = vbcast.lane.b32.xlu1 %v7854_v54, 280  ;;  %v7985_v3 = vpop.permute.xlu0 %878  ;;  %11000 = vst [vmem:[#allocation123_spill] sm:$0xff] %v8004_v63 }
 0x12b   :  { %10993 = vst [vmem:[#allocation117_spill] sm:$0xff] %v7979_v34  ;;  %10995 = vst [vmem:[#allocation118_spill] sm:$0xff] %v7985_v3  ;;  %1061 = vbcast.lane.b32.xlu0 %v7928_v33, 272  ;;  %v7999_v34 = vsub.s32 %v1812_v58, %v7654_v55  ;;  %v679_v58 = vmul.f32 0.2, %v7690_v57 }
 0x12d   :  { %10998 = vst [vmem:[#allocation121_spill] sm:$0xff] %v7999_v34  ;;  %v1820_v36 = vrot.slane %v7996_v61, %v7999_v34  ;;  %v1816_v2 = vrot.slane %v8004_v63, %v7999_v34  ;;  %v680_v61 = vmul.f32 0.2, %v7687_v18 }
 0x12e   :  { %v7991_v24 = vpop.permute.xlu1 %1197  ;;  %1112 = vbcast.lane.b32.xlu1 %v7673_v26, 304  ;;  %v8001_v3 = vpop.permute.xlu0 %1166 }
 0x12f   :  { %10996 = vst [vmem:[#allocation119_spill] sm:$0xff] %v7991_v24  ;;  %10999 = vst [vmem:[#allocation122_spill] sm:$0xff] %v8001_v3  ;;  %1147 = vbcast.lane.b32.xlu0 %v7680_v35, 304  ;;  %v8009_v24 = vsel %vm613_vm3, %v7664_v0, %v677_v43  ;;  %v8025_v43 = vsel %vm614_vm4, %v7675_v39, %v678_v56  ;;  %v2070_v55 = vsel %vm2069_vm5, %v1820_v36, %v1816_v2  ;;  %vm2079_vm4 = vcmask 1046534  }
 0x130   :  { %11001 = vst [vmem:[#allocation124_spill] sm:$0xff] %v8009_v24  ;;  %v1824_v0 = vrot.slane %v8009_v24, %v7999_v34  ;;  %11004 = vst [vmem:[#allocation127_spill] sm:$0xff] %v8025_v43  ;;  %v1828_v56 = vrot.slane %v8025_v43, %v7999_v34  ;;  %v8038_v39 = vsel %vm615_vm6, %v7690_v57, %v679_v58  ;;  %v682_v24 = vmul.f32 0.2, %v7697_v23 }
 0x131   :  { %11006 = vst [vmem:[#allocation129_spill] sm:$0xff] %v8038_v39  ;;  %v8046_v2 = vsel %vm616_vm8, %v7687_v18, %v680_v61  ;;  %v683_v3 = vmul.f32 0.2, %v7715_v19  ;;  %v685_v57 = vmul.f32 0.2, %v7725_v59  ;;  %vm623_vm3 = vcmp.ge.f32.partialorder %v7734_v60, 0.0 }
 0x132   :  { %v8014_v16 = vpop.permute.xlu1 %882  ;;  %1213 = vbcast.lane.b32.xlu1 %v7739_v50, 296  ;;  %v8020_v12 = vpop.permute.xlu0 %1232  ;;  %v2072_v36 = vsel %vm2071_vm7, %v1824_v0, %v2070_v55  ;;  %11007 = vst [vmem:[#allocation130_spill] sm:$0xff] %v8046_v2  ;;  %v1832_v55 = vrot.slane %v8038_v39, %v7999_v34  ;;  %v1836_v0 = vrot.slane %v8046_v2, %v7999_v34  ;;  %v688_v2 = vmul.f32 0.2, %v7731_v46 }
 0x133   :  { %11002 = vst [vmem:[#allocation125_spill] sm:$0xff] %v8014_v16  ;;  %11003 = vst [vmem:[#allocation126_spill] sm:$0xff] %v8020_v12  ;;  %1279 = vbcast.lane.b32.xlu0 %v7803_v49, 288  ;;  %v681_v12 = vmul.f32 0.2, %v7705_v9  ;;  %v2074_v18 = vsel %vm2073_vm9, %v1828_v56, %v2072_v36  ;;  %v8074_v39 = vsel %vm619_vm12, %v7715_v19, %v683_v3  ;;  %vm628_vm6 = vcmp.ge.f32.partialorder %v7751_v32, 0.0 }
 0x134   :  { %11012 = vst [vmem:[#allocation135_spill] sm:$0xff] %v8074_v39  ;;  %v8078_v56 = vsel %vm618_vm13, %v7697_v23, %v682_v24  ;;  %v686_v36 = vmul.f32 0.2, %v7722_v13  ;;  %v687_v19 = vmul.f32 0.2, %v7734_v60  ;;  %vm627_vm8 = vcmp.ge.f32.partialorder %v7754_v42, 0.0 }
 0x135   :  { %v8068_v43 = vsel %vm617_vm10, %v7705_v9, %v681_v12  ;;  %11013 = vst [vmem:[#allocation136_spill] sm:$0xff] %v8078_v56  ;;  %vm626_vm10 = vcmp.ge.f32.partialorder %v7741_v53, 0.0  ;;  %vm629_vm12 = vcmp.ge.f32.partialorder %v7763_v48, 0.0  ;;  %vm10877_vm13 = vcmask 1047559  }
 0x136   :  { %v8032_v63 = vpop.permute.xlu1 %1228  ;;  %1345 = vbcast.lane.b32.xlu1 %v7879_v4, 280  ;;  %v8042_v16 = vpop.permute.xlu0 %851  ;;  %11010 = vst [vmem:[#allocation133_spill] sm:$0xff] %v8068_v43  ;;  %v1840_v24 = vrot.slane %v8068_v43, %v7999_v34  ;;  %v8105_v12 = vsel %vm622_vm1, %v7722_v13, %v686_v36  ;;  %vm636_vm1 = vcmp.ge.f32.partialorder %v7770_v25, 0.0 }
 0x137   :  { %11005 = vst [vmem:[#allocation128_spill] sm:$0xff] %v8032_v63  ;;  %v684_v63 = vmul.f32 0.2, %v7712_v28  ;;  %898 = vbcast.lane.b32.xlu0 %v7749_v7, 296  ;;  %11015 = vst [vmem:[#allocation138_spill] sm:$0xff] %v8105_v12 }
 0x13a   :  { %v8055_v58 = vpop.permute.xlu1 %816  ;;  %964 = vbcast.lane.b32.xlu1 %v7818_v5, 288  ;;  %v8063_v61 = vpop.permute.xlu0 %917 }
 0x13b   :  { %11008 = vst [vmem:[#allocation131_spill] sm:$0xff] %v8055_v58  ;;  %11009 = vst [vmem:[#allocation132_spill] sm:$0xff] %v8063_v61  ;;  %v8071_v58 = vsel %vm620_vm11, %v7712_v28, %v684_v63  ;;  %1030 = vbcast.lane.b32.xlu0 %v7895_v51, 280  ;;  %v8082_v61 = vsel %vm621_vm14, %v7725_v59, %v685_v57  ;;  %v2076_v63 = vsel %vm2075_vm15, %v1832_v55, %v2074_v18 }
 0x13c   :  { %11011 = vst [vmem:[#allocation134_spill] sm:$0xff] %v8071_v58  ;;  %11014 = vst [vmem:[#allocation137_spill] sm:$0xff] %v8082_v61  ;;  %v1852_v59 = vrot.slane %v8071_v58, %v7999_v34  ;;  %v1848_v28 = vrot.slane %v8074_v39, %v7999_v34  ;;  %v1856_v23 = vrot.slane %v8082_v61, %v7999_v34  ;;  %v692_v61 = vmul.f32 0.2, %v7751_v32 }
 0x13d   :  { %v8108_v57 = vsel %vm624_vm2, %v7731_v46, %v688_v2  ;;  %v2078_v43 = vsel %vm2077_vm0, %v1836_v0, %v2076_v63  ;;  %v8117_v39 = vsel %vm623_vm3, %v7734_v60, %v687_v19  ;;  %v691_v2 = vmul.f32 0.2, %v7754_v42 }
 0x13e   :  { %v8085_v9 = vpop.permute.xlu1 %913  ;;  %1182 = vbcast.lane.b32.xlu1 %v7695_v11, 304  ;;  %v8099_v3 = vpop.permute.xlu0 %1135  ;;  %11016 = vst [vmem:[#allocation139_spill] sm:$0xff] %v8108_v57  ;;  %11017 = vst [vmem:[#allocation140_spill] sm:$0xff] %v8117_v39  ;;  %v8121_v13 = vsel %vm2079_vm4, %v1840_v24, %v2078_v43  ;;  %v2083_v46 = vsel %vm2069_vm5, %v1852_v59, %v1848_v28  ;;  %v1860_v18 = vrot.slane %v8105_v12, %v7999_v34 }
 0x13f   :  { %1248 = vbcast.lane.b32.xlu0 %v7767_v31, 296  ;;  %v2084_v0 = vsel %vm2071_vm7, %v1856_v23, %v2083_v46  ;;  %v1868_v60 = vrot.slane %v8108_v57, %v7999_v34  ;;  %v1864_v43 = vrot.slane %v8117_v39, %v7999_v34  ;;  %v690_v63 = vmul.f32 0.2, %v7741_v53 }
 0x140   :  { %v693_v19 = vmul.f32 0.2, %v7763_v48  ;;  %vm625_vm11 = vcmp.ge.f32.partialorder %v7744_v52, 0.0  ;;  %v689_v59 = vmul.f32 0.2, %v7744_v52  ;;  %v8148_v28 = vsel %vm628_vm6, %v7751_v32, %v692_v61 }
 0x141   :  { %11019 = vst [vmem:[#allocation142_spill] sm:$0xff] %v8148_v28  ;;  %v8152_v23 = vsel %vm627_vm8, %v7754_v42, %v691_v2  ;;  %v694_v46 = vmul.f32 0.2, %v7760_v27  ;;  %v700_v39 = vmul.f32 0.2, %v7770_v25  ;;  %vm630_vm14 = vcmp.ge.f32.partialorder %v7760_v27, 0.0 }
 0x142   :  { %v8110_v55 = vpop.permute.xlu1 %1100  ;;  %1314 = vbcast.lane.b32.xlu1 %v7837_v47, 288  ;;  %v8126_v36 = vpop.permute.xlu0 %1263  ;;  %11020 = vst [vmem:[#allocation143_spill] sm:$0xff] %v8152_v23  ;;  %v699_v57 = vmul.f32 0.2, %v7773_v38  ;;  %vm635_vm2 = vcmp.ge.f32.partialorder %v7773_v38, 0.0  ;;  %v8165_v42 = vsel %vm629_vm12, %v7763_v48, %v693_v19  ;;  %vm637_vm3 = vcmp.ge.f32.partialorder %v7776_v30, 0.0 }
 0x143   :  { %11018 = vst [vmem:[#allocation141_spill] sm:$0xff] %v8126_v36  ;;  %832 = vbcast.lane.b32.xlu0 %v7710_v17, 304  ;;  %v701_v32 = vmul.f32 0.2, %v7776_v30  ;;  %11021 = vst [vmem:[#allocation144_spill] sm:$0xff] %v8165_v42  ;;  %v8176_v36 = vsel %vm626_vm10, %v7741_v53, %v690_v63  ;;  %v8181_v48 = vsel %vm625_vm11, %v7744_v52, %v689_v59  ;;  %vm631_vm6 = vcmp.ge.f32.partialorder %v7779_v40, 0.0 }
 0x144   :  { %v695_v61 = vmul.f32 0.2, %v7779_v40  ;;  %v702_v2 = vmul.f32 0.2, %v7786_v62  ;;  %11023 = vst [vmem:[#allocation146_spill] sm:$0xff] %v8176_v36  ;;  %11024 = vst [vmem:[#allocation147_spill] sm:$0xff] %v8181_v48  ;;  %v1884_v19 = vrot.slane %v8148_v28, %v7999_v34  ;;  %v8192_v53 = vsel %vm636_vm1, %v7770_v25, %v700_v39 }
 0x145   :  { %vm638_vm8 = vcmp.ge.f32.partialorder %v7786_v62, 0.0  ;;  %11025 = vst [vmem:[#allocation148_spill] sm:$0xff] %v8192_v53  ;;  %v8197_v52 = vsel %vm635_vm2, %v7773_v38, %v699_v57  ;;  %v2085_v59 = vsel %vm2073_vm9, %v1860_v18, %v2084_v0  ;;  %v8205_v28 = vsel %vm630_vm14, %v7760_v27, %v694_v46 }
 0x146   :  { %v8140_v24 = vpop.permute.xlu1 %1201  ;;  %867 = vbcast.lane.b32.xlu1 %v7720_v22, 304  ;;  %v8157_v12 = vpop.permute.xlu0 %886  ;;  %11026 = vst [vmem:[#allocation149_spill] sm:$0xff] %v8197_v52  ;;  %11027 = vst [vmem:[#allocation150_spill] sm:$0xff] %v8205_v28  ;;  %v8212_v25 = vsel %vm637_vm3, %v7776_v30, %v701_v32  ;;  %v2086_v38 = vsel %vm2075_vm15, %v1864_v43, %v2085_v59  ;;  %v1872_v39 = vrot.slane %v8181_v48, %v7999_v34 }
 0x147   :  { %933 = vbcast.lane.b32.xlu0 %v7783_v21, 296  ;;  %11028 = vst [vmem:[#allocation151_spill] sm:$0xff] %v8212_v25  ;;  %v8219_v57 = vsel %vm631_vm6, %v7779_v40, %v695_v61  ;;  %v8222_v27 = vsel %vm638_vm8, %v7786_v62, %v702_v2  ;;  %v1876_v30 = vrot.slane %v8176_v36, %v7999_v34  ;;  %v696_v46 = vmul.f32 0.2, %v7789_v37 }
 0x148   :  { %11029 = vst [vmem:[#allocation152_spill] sm:$0xff] %v8219_v57  ;;  %11030 = vst [vmem:[#allocation153_spill] sm:$0xff] %v8222_v27  ;;  %v1916_v0 = vrot.slane %v8192_v53, %v7999_v34  ;;  %v1912_v43 = vrot.slane %v8197_v52, %v7999_v34  ;;  %v1892_v62 = vrot.slane %v8205_v28, %v7999_v34  ;;  %vm632_vm10 = vcmp.ge.f32.partialorder %v7789_v37, 0.0 }
 0x149   :  { %v1920_v32 = vrot.slane %v8212_v25, %v7999_v34  ;;  %v2087_v61 = vsel %vm2077_vm0, %v1868_v60, %v2086_v38  ;;  %v1896_v59 = vrot.slane %v8219_v57, %v7999_v34  ;;  %v708_v48 = vmul.f32 0.2, %v7795_v45 }
 0x14a   :  { %v8170_v58 = vpop.permute.xlu1 %1267  ;;  %999 = vbcast.lane.b32.xlu1 %v7854_v54, 288  ;;  %v8199_v63 = vpop.permute.xlu0 %952  ;;  %v2097_v60 = vsel %vm2069_vm5, %v1916_v0, %v1912_v43  ;;  %vm644_vm11 = vcmp.ge.f32.partialorder %v7795_v45, 0.0  ;;  %v11032_v38 = vrot.slane %v8078_v56, %v7999_v34  ;;  %vm643_vm12 = vcmp.ge.f32.partialorder %v7798_v1, 0.0 }
 0x14b   :  { %11022 = vst [vmem:[#allocation145_spill] sm:$0xff] %v8170_v58  ;;  %v1880_v58 = vrot.slane %v8152_v23, %v7999_v34  ;;  %v1888_v23 = vrot.slane %v8165_v42, %v7999_v34  ;;  %1065 = vbcast.lane.b32.xlu0 %v7928_v33, 280  ;;  %vm639_vm14 = vcmp.ge.f32.partialorder %v7805_v14, 0.0  ;;  %vm633_vm1 = vcmp.ge.f32.partialorder %v7808_v29, 0.0 }
 0x14c   :  { %vm634_vm2 = vcmp.ge.f32.partialorder %v7811_v10, 0.0  ;;  %vm645_vm3 = vcmp.ge.f32.partialorder %v7814_v15, 0.0  ;;  %vm646_vm6 = vcmp.ge.f32.partialorder %v7821_v41, 0.0  ;;  %vm640_vm8 = vcmp.ge.f32.partialorder %v7824_v8, 0.0 }
 0x14d   :  { %v2090_v40 = vsel %vm2069_vm5, %v1884_v19, %v1880_v58  ;;  %v1924_v58 = vrot.slane %v8222_v27, %v7999_v34  ;;  %v2088_v19 = vsel %vm2079_vm4, %v1872_v39, %v2087_v61  ;;  %v2098_v39 = vsel %vm2071_vm7, %v1920_v32, %v2097_v60 }
 0x14e   :  { %v8224_v18 = vpop.permute.xlu1 %948  ;;  %1116 = vbcast.lane.b32.xlu1 %v7673_v26, 312  ;;  %v8240_v26 = vpop.permute.xlu0 %1236  ;;  %v2091_v2 = vsel %vm2071_vm7, %v1888_v23, %v2090_v40  ;;  %v8256_v23 = vsel %vm632_vm10, %v7789_v37, %v696_v46  ;;  %v8271_v0 = vsel %vm10877_vm13, %v1876_v30, %v2088_v19  ;;  %v707_v46 = vmul.f32 0.2, %v7798_v1 }
 0x14f   :  { %1151 = vbcast.lane.b32.xlu0 %v7680_v35, 312  ;;  %11031 = vst [vmem:[#allocation154_spill] sm:$0xff] %v8256_v23  ;;  %v8264_v35 = vsel %vm10877_vm13, %v11032_v38, %v8121_v13  ;;  %v2092_v40 = vsel %vm2073_vm9, %v1892_v62, %v2091_v2  ;;  %v8275_v43 = vsel %vm2073_vm9, %v1924_v58, %v2098_v39  ;;  %v703_v30 = vmul.f32 0.2, %v7805_v14 }
 0x150   :  { %v2093_v37 = vsel %vm2075_vm15, %v1896_v59, %v2092_v40  ;;  %v1900_v13 = vrot.slane %v8256_v23, %v7999_v34  ;;  %v8282_v32 = vsel %vm644_vm11, %v7795_v45, %v708_v48  ;;  %v697_v2 = vmul.f32 0.2, %v7808_v29 }
 0x151   :  { %11033 = vst [vmem:[#allocation155_spill] sm:$0xff] %v8282_v32  ;;  %v698_v59 = vmul.f32 0.2, %v7811_v10  ;;  %v709_v45 = vmul.f32 0.2, %v7814_v15  ;;  %v8300_v19 = vsel %vm643_vm12, %v7798_v1, %v707_v46  ;;  %v8307_v39 = vsel %vm639_vm14, %v7805_v14, %v703_v30  ;;  %v11036_v1 = vld [vmem:[#allocation77_spill] sm:$0xff] }
 0x152   :  { %v8251_v36 = vpop.permute.xlu1 %1170  ;;  %1217 = vbcast.lane.b32.xlu1 %v7739_v50, 304  ;;  %v8268_v61 = vpop.permute.xlu0 %1302  ;;  %v710_v48 = vmul.f32 0.2, %v7821_v41  ;;  %11034 = vst [vmem:[#allocation156_spill] sm:$0xff] %v8300_v19  ;;  %v704_v60 = vmul.f32 0.2, %v7824_v8  ;;  %v1948_v14 = vrot.slane %v8282_v32, %v7999_v34  ;;  %v8324_v30 = vsel %vm633_vm1, %v7808_v29, %v697_v2 }
 0x153   :  { %1283 = vbcast.lane.b32.xlu0 %v7803_v49, 296  ;;  %v716_v38 = vmul.f32 0.2, %v7830_v6  ;;  %11035 = vst [vmem:[#allocation157_spill] sm:$0xff] %v8307_v39  ;;  %v715_v40 = vmul.f32 0.2, %v7833_v44  ;;  %v8329_v42 = vsel %vm645_vm3, %v7814_v15, %v709_v45  ;;  %v1944_v28 = vrot.slane %v8300_v19, %v7999_v34 }
 0x154   :  { %v711_v56 = vmul.f32 0.2, %v7840_v20  ;;  %vm652_vm10 = vcmp.ge.f32.partialorder %v7830_v6, 0.0  ;;  %vm651_vm11 = vcmp.ge.f32.partialorder %v7833_v44, 0.0  ;;  %vm647_vm12 = vcmp.ge.f32.partialorder %v7840_v20, 0.0  ;;  %11037 = vst [vmem:[#allocation77_spill] sm:$0xff] %v8324_v30 }
 0x155   :  { %v705_v46 = vmul.f32 0.2, %v11036_v1  ;;  %11038 = vst [vmem:[#allocation158_spill] sm:$0xff] %v8329_v42  ;;  %vm641_vm14 = vcmp.ge.f32.partialorder %v11036_v1, 0.0  ;;  %v8339_v25 = vsel %vm634_vm2, %v7811_v10, %v698_v59  ;;  %v8344_v29 = vsel %vm646_vm6, %v7821_v41, %v710_v48  ;;  %v11061_v19 = vld [vmem:[#allocation89_spill] sm:$0xff]  ;;  %v11062_v32 = vld [vmem:[#allocation90_spill] sm:$0xff] }
 0x156   :  { %v8286_v62 = vpop.permute.xlu1 %1298  ;;  %1349 = vbcast.lane.b32.xlu1 %v7879_v4, 288  ;;  %v8297_v58 = vpop.permute.xlu0 %855  ;;  %11039 = vst [vmem:[#allocation159_spill] sm:$0xff] %v8339_v25  ;;  %11040 = vst [vmem:[#allocation160_spill] sm:$0xff] %v8344_v29  ;;  %v8349_v15 = vsel %vm640_vm8, %v7824_v8, %v704_v60  ;;  %v1928_v2 = vrot.slane %v8307_v39, %v7999_v34  ;;  %v8355_v45 = vsel %vm652_vm10, %v7830_v6, %v716_v38  ;;  %v11047_v39 = vld [vmem:[#allocation78_spill] sm:$0xff] }
 0x157   :  { %902 = vbcast.lane.b32.xlu0 %v7749_v7, 304  ;;  %11041 = vst [vmem:[#allocation161_spill] sm:$0xff] %v8349_v15  ;;  %11042 = vst [vmem:[#allocation162_spill] sm:$0xff] %v8355_v45  ;;  %v8358_v10 = vsel %vm651_vm11, %v7833_v44, %v715_v40  ;;  %v8361_v59 = vsel %vm647_vm12, %v7840_v20, %v711_v56  ;;  %v2094_v8 = vsel %vm2077_vm0, %v1900_v13, %v2093_v37  ;;  %v11046_v56 = vld [vmem:[#allocation79_spill] sm:$0xff] }
 0x158   :  { %11043 = vst [vmem:[#allocation163_spill] sm:$0xff] %v8358_v10  ;;  %11044 = vst [vmem:[#allocation164_spill] sm:$0xff] %v8361_v59  ;;  %v1904_v48 = vrot.slane %v8324_v30, %v7999_v34  ;;  %v1952_v60 = vrot.slane %v8329_v42, %v7999_v34  ;;  %v8374_v44 = vsel %vm641_vm14, %v11036_v1, %v705_v46  ;;  %v717_v37 = vmul.f32 0.2, %v11046_v56 }
 0x159   :  { %11045 = vst [vmem:[#allocation165_spill] sm:$0xff] %v8374_v44  ;;  %v1908_v20 = vrot.slane %v8339_v25, %v7999_v34  ;;  %v1956_v6 = vrot.slane %v8344_v29, %v7999_v34  ;;  %v1980_v38 = vrot.slane %v8355_v45, %v7999_v34  ;;  %v1976_v40 = vrot.slane %v8358_v10, %v7999_v34 }
 0x15a   :  { %v8312_v57 = vpop.permute.xlu1 %820  ;;  %968 = vbcast.lane.b32.xlu1 %v7818_v5, 296  ;;  %v8332_v23 = vpop.permute.xlu0 %983  ;;  %v1960_v1 = vrot.slane %v8361_v59, %v7999_v34  ;;  %vm653_vm1 = vcmp.ge.f32.partialorder %v11046_v56, 0.0  ;;  %v2104_v46 = vsel %vm2069_vm5, %v1948_v14, %v1944_v28  ;;  %v2100_v30 = vsel %vm2075_vm15, %v1928_v2, %v8275_v43  ;;  %v11048_v59 = vld [vmem:[#allocation80_spill] sm:$0xff] }
 0x15b   :  { %1034 = vbcast.lane.b32.xlu0 %v7895_v51, 288  ;;  %v1936_v25 = vrot.slane %v8374_v44, %v7999_v34  ;;  %v2095_v27 = vsel %vm2079_vm4, %v1904_v48, %v2094_v8  ;;  %v2105_v53 = vsel %vm2071_vm7, %v1952_v60, %v2104_v46  ;;  %vm642_vm2 = vcmp.ge.f32.partialorder %v11047_v39, 0.0  ;;  %v11050_v46 = vld [vmem:[#allocation81_spill] sm:$0xff] }
 0x15c   :  { %v718_v28 = vmul.f32 0.2, %v11048_v59  ;;  %v8407_v14 = vsel %vm10877_vm13, %v1908_v20, %v2095_v27  ;;  %v2106_v43 = vsel %vm2073_vm9, %v1956_v6, %v2105_v53  ;;  %v8411_v2 = vsel %vm653_vm1, %v11046_v56, %v717_v37  ;;  %v11052_v20 = vld [vmem:[#allocation82_spill] sm:$0xff] }
 0x15d   :  { %11049 = vst [vmem:[#allocation79_spill] sm:$0xff] %v8411_v2  ;;  %vm654_vm3 = vcmp.ge.f32.partialorder %v11048_v59, 0.0  ;;  %v2111_v48 = vsel %vm2069_vm5, %v1980_v38, %v1976_v40  ;;  %v8419_v60 = vsel %vm2075_vm15, %v1960_v1, %v2106_v43  ;;  %v712_v42 = vmul.f32 0.2, %v11050_v46  ;;  %v11056_v37 = vld [vmem:[#allocation86_spill] sm:$0xff] }
 0x15e   :  { %v8363_v41 = vpop.permute.xlu1 %921  ;;  %1186 = vbcast.lane.b32.xlu1 %v7695_v11, 312  ;;  %v1932_v11 = vrot.slane %v8349_v15, %v7999_v34  ;;  %v8383_v13 = vpop.permute.xlu0 %1104  ;;  %v706_v15 = vmul.f32 0.2, %v11047_v39  ;;  %vm648_vm6 = vcmp.ge.f32.partialorder %v11050_v46, 0.0  ;;  %v724_v6 = vmul.f32 0.2, %v11052_v20 }
 0x15f   :  { %1252 = vbcast.lane.b32.xlu0 %v7767_v31, 304  ;;  %vm660_vm8 = vcmp.ge.f32.partialorder %v11052_v20, 0.0  ;;  %v713_v38 = vmul.f32 0.2, %v11056_v37  ;;  %vm649_vm12 = vcmp.ge.f32.partialorder %v11056_v37, 0.0 }
 0x160   :  { %v2101_v8 = vsel %vm2077_vm0, %v1932_v11, %v2100_v30  ;;  %v8425_v27 = vsel %vm642_vm2, %v11047_v39, %v706_v15  ;;  %v1984_v30 = vrot.slane %v8411_v2, %v7999_v34  ;;  %v8435_v11 = vsel %vm654_vm3, %v11048_v59, %v718_v28  ;;  %v11055_v39 = vld [vmem:[#allocation85_spill] sm:$0xff]  ;;  %v11058_v59 = vld [vmem:[#allocation87_spill] sm:$0xff]  ;;  %v11059_v28 = vld [vmem:[#allocation88_spill] sm:$0xff] }
 0x161   :  { %v2102_v53 = vsel %vm2079_vm4, %v1936_v25, %v2101_v8  ;;  %11051 = vst [vmem:[#allocation78_spill] sm:$0xff] %v8425_v27  ;;  %11053 = vst [vmem:[#allocation80_spill] sm:$0xff] %v8435_v11  ;;  %vm655_vm11 = vcmp.ge.f32.partialorder %v11055_v39, 0.0  ;;  %v719_v15 = vmul.f32 0.2, %v11055_v39  ;;  %v8453_v8 = vsel %vm660_vm8, %v11052_v20, %v724_v6 }
 0x162   :  { %v8399_v52 = vpop.permute.xlu1 %987  ;;  %1318 = vbcast.lane.b32.xlu1 %v7837_v47, 296  ;;  %v8414_v44 = vpop.permute.xlu0 %1205  ;;  %v714_v1 = vmul.f32 0.2, %v11058_v59  ;;  %v725_v43 = vmul.f32 0.2, %v11059_v28  ;;  %11060 = vst [vmem:[#allocation82_spill] sm:$0xff] %v8453_v8  ;;  %v2112_v20 = vsel %vm2071_vm7, %v1984_v30, %v2111_v48  ;;  %v1988_v10 = vrot.slane %v8435_v11, %v7999_v34 }
 0x163   :  { %836 = vbcast.lane.b32.xlu0 %v7710_v17, 312  ;;  %v11054_v17 = vld [vmem:[#allocation83_spill] sm:$0xff]  ;;  %vm661_vm14 = vcmp.ge.f32.partialorder %v11059_v28, 0.0  ;;  %v726_v29 = vmul.f32 0.2, %v11061_v19  ;;  %vm650_vm1 = vcmp.ge.f32.partialorder %v11058_v59, 0.0  ;;  %v8475_v6 = vsel %vm655_vm11, %v11055_v39, %v719_v15 }
 0x164   :  { %v723_v25 = vmul.f32 0.2, %v11054_v17  ;;  %vm659_vm10 = vcmp.ge.f32.partialorder %v11054_v17, 0.0  ;;  %v720_v45 = vmul.f32 0.2, %v11062_v32  ;;  %vm662_vm2 = vcmp.ge.f32.partialorder %v11061_v19, 0.0 }
 0x165   :  { %vm656_vm3 = vcmp.ge.f32.partialorder %v11062_v32, 0.0  ;;  %11064 = vst [vmem:[#allocation85_spill] sm:$0xff] %v8475_v6  ;;  %v2012_v48 = vrot.slane %v8453_v8, %v7999_v34  ;;  %v8493_v30 = vsel %vm661_vm14, %v11059_v28, %v725_v43  ;;  %v8499_v15 = vsel %vm650_vm1, %v11058_v59, %v714_v1  ;;  %v11071_v11 = vld [vmem:[#allocation91_spill] sm:$0xff]  ;;  %v11072_v59 = vld [vmem:[#allocation92_spill] sm:$0xff] }
 0x166   :  { %v8429_v56 = vpop.permute.xlu1 %1139  ;;  %871 = vbcast.lane.b32.xlu1 %v7720_v22, 312  ;;  %v8443_v40 = vpop.permute.xlu0 %1333  ;;  %v8446_v22 = vsel %vm648_vm6, %v11050_v46, %v712_v42  ;;  %v8464_v42 = vsel %vm659_vm10, %v11054_v17, %v723_v25  ;;  %v1940_v46 = vrot.slane %v8425_v27, %v7999_v34  ;;  %v8480_v17 = vsel %vm649_vm12, %v11056_v37, %v713_v38 }
 0x167   :  { %11057 = vst [vmem:[#allocation81_spill] sm:$0xff] %v8446_v22  ;;  %937 = vbcast.lane.b32.xlu0 %v7783_v21, 304  ;;  %11063 = vst [vmem:[#allocation83_spill] sm:$0xff] %v8464_v42  ;;  %v1964_v27 = vrot.slane %v8446_v22, %v7999_v34  ;;  %v2008_v39 = vrot.slane %v8464_v42, %v7999_v34  ;;  %v8502_v37 = vsel %vm662_vm2, %v11061_v19, %v726_v29 }
 0x168   :  { %11065 = vst [vmem:[#allocation86_spill] sm:$0xff] %v8480_v17  ;;  %11066 = vst [vmem:[#allocation87_spill] sm:$0xff] %v8493_v30  ;;  %v8505_v38 = vsel %vm656_vm3, %v11062_v32, %v720_v45  ;;  %v1992_v28 = vrot.slane %v8475_v6, %v7999_v34  ;;  %v1968_v43 = vrot.slane %v8480_v17, %v7999_v34  ;;  %v732_v8 = vmul.f32 0.2, %v11071_v11  ;;  %v11073_v32 = vld [vmem:[#allocation93_spill] sm:$0xff] }
 0x169   :  { %11067 = vst [vmem:[#allocation88_spill] sm:$0xff] %v8499_v15  ;;  %11068 = vst [vmem:[#allocation89_spill] sm:$0xff] %v8502_v37  ;;  %v731_v1 = vmul.f32 0.2, %v11072_v59  ;;  %v2016_v19 = vrot.slane %v8493_v30, %v7999_v34  ;;  %vm668_vm6 = vcmp.ge.f32.partialorder %v11071_v11, 0.0  ;;  %vm667_vm8 = vcmp.ge.f32.partialorder %v11072_v59, 0.0 }
 0x16a   :  { %v8458_v2 = vpop.permute.xlu1 %1271  ;;  %1003 = vbcast.lane.b32.xlu1 %v7854_v54, 296  ;;  %v8482_v25 = vpop.permute.xlu0 %890  ;;  %11069 = vst [vmem:[#allocation90_spill] sm:$0xff] %v8505_v38  ;;  %v727_v29 = vmul.f32 0.2, %v11073_v32  ;;  %v1972_v45 = vrot.slane %v8499_v15, %v7999_v34  ;;  %v2020_v17 = vrot.slane %v8502_v37, %v7999_v34  ;;  %v1996_v6 = vrot.slane %v8505_v38, %v7999_v34 }
 0x16b   :  { %1069 = vbcast.lane.b32.xlu0 %v7928_v33, 288  ;;  %vm663_vm10 = vcmp.ge.f32.partialorder %v11073_v32, 0.0  ;;  %v8532_v30 = vsel %vm10877_vm13, %v1940_v46, %v2102_v53  ;;  %v2113_v42 = vsel %vm2073_vm9, %v1988_v10, %v2112_v20  ;;  %v2118_v15 = vsel %vm2069_vm5, %v2012_v48, %v2008_v39  ;;  %v11078_v53 = vld [vmem:[#allocation94_spill] sm:$0xff]  ;;  %v11081_v39 = vld [vmem:[#allocation96_spill] sm:$0xff] }
 0x16c   :  { %v2114_v38 = vsel %vm2075_vm15, %v1992_v28, %v2113_v42  ;;  %v8545_v37 = vsel %vm668_vm6, %v11071_v11, %v732_v8  ;;  %v8550_v10 = vsel %vm667_vm8, %v11072_v59, %v731_v1  ;;  %v2119_v46 = vsel %vm2071_vm7, %v2016_v19, %v2118_v15  ;;  %v11082_v59 = vld [vmem:[#allocation97_spill] sm:$0xff] }
 0x16d   :  { %11076 = vst [vmem:[#allocation93_spill] sm:$0xff] %v8545_v37  ;;  %11077 = vst [vmem:[#allocation167_spill] sm:$0xff] %v8550_v10  ;;  %v8556_v20 = vsel %vm663_vm10, %v11073_v32, %v727_v29  ;;  %vm657_vm11 = vcmp.ge.f32.partialorder %v11078_v53, 0.0  ;;  %v2120_v8 = vsel %vm2073_vm9, %v2020_v17, %v2119_v46  ;;  %v2115_v48 = vsel %vm2077_vm0, %v1996_v6, %v2114_v38  ;;  %v11086_v32 = vld [vmem:[#allocation98_spill] sm:$0xff] }
 0x16e   :  { %v8507_v22 = vpop.permute.xlu1 %1337  ;;  %1221 = vbcast.lane.b32.xlu1 %v7739_v50, 312  ;;  %v8521_v50 = vpop.permute.xlu0 %1018  ;;  %11079 = vst [vmem:[#allocation94_spill] sm:$0xff] %v8556_v20  ;;  %v733_v28 = vmul.f32 0.2, %v11081_v39  ;;  %v2044_v15 = vrot.slane %v8545_v37, %v7999_v34  ;;  %vm669_vm12 = vcmp.ge.f32.partialorder %v11081_v39, 0.0  ;;  %v2024_v6 = vrot.slane %v8556_v20, %v7999_v34  ;;  %v11091_v20 = vld [vmem:[#allocation101_spill] sm:$0xff] }
 0x16f   :  { %11070 = vst [vmem:[#allocation166_spill] sm:$0xff] %v8507_v22  ;;  %11074 = vst [vmem:[#allocation91_spill] sm:$0xff] %v8521_v50  ;;  %1287 = vbcast.lane.b32.xlu0 %v7803_v49, 304  ;;  %v2108_v50 = vsel %vm2077_vm0, %v1964_v27, %v8419_v60  ;;  %v721_v60 = vmul.f32 0.2, %v11078_v53  ;;  %vm670_vm14 = vcmp.ge.f32.partialorder %v11082_v59, 0.0 }
 0x170   :  { %v2109_v27 = vsel %vm2079_vm4, %v1968_v43, %v2108_v50  ;;  %v2040_v43 = vrot.slane %v8550_v10, %v7999_v34  ;;  %v734_v1 = vmul.f32 0.2, %v11082_v59  ;;  %vm664_vm2 = vcmp.ge.f32.partialorder %v11086_v32, 0.0  ;;  %v11087_v50 = vld [vmem:[#allocation99_spill] sm:$0xff] }
 0x171   :  { %v8562_v11 = vsel %vm10877_vm13, %v1972_v45, %v2109_v27  ;;  %v8580_v17 = vsel %vm657_vm11, %v11078_v53, %v721_v60  ;;  %v728_v29 = vmul.f32 0.2, %v11086_v32  ;;  %v735_v45 = vmul.f32 0.2, %v11087_v50  ;;  %v11090_v53 = vld [vmem:[#allocation100_spill] sm:$0xff] }
 0x172   :  { %v8538_v22 = vpop.permute.xlu1 %956  ;;  %1353 = vbcast.lane.b32.xlu1 %v7879_v4, 296  ;;  %v8559_v42 = vpop.permute.xlu0 %1174  ;;  %11084 = vst [vmem:[#allocation97_spill] sm:$0xff] %v8580_v17  ;;  %v8591_v46 = vsel %vm669_vm12, %v11081_v39, %v733_v28  ;;  %vm671_vm3 = vcmp.ge.f32.partialorder %v11087_v50, 0.0  ;;  %v729_v60 = vmul.f32 0.2, %v11090_v53  ;;  %v8598_v37 = vsel %vm670_vm14, %v11082_v59, %v734_v1  ;;  %v11096_v59 = vld [vmem:[#allocation104_spill] sm:$0xff] }
 0x173   :  { %11075 = vst [vmem:[#allocation92_spill] sm:$0xff] %v8538_v22  ;;  %11080 = vst [vmem:[#allocation168_spill] sm:$0xff] %v8559_v42  ;;  %906 = vbcast.lane.b32.xlu0 %v7749_v7, 312  ;;  %v11085_v7 = vld [vmem:[#allocation95_spill] sm:$0xff]  ;;  %v736_v10 = vmul.f32 0.2, %v11091_v20  ;;  %v2000_v39 = vrot.slane %v8580_v17, %v7999_v34  ;;  %v2048_v22 = vrot.slane %v8591_v46, %v7999_v34 }
 0x174   :  { %v722_v38 = vmul.f32 0.2, %v11085_v7  ;;  %vm658_vm1 = vcmp.ge.f32.partialorder %v11085_v7, 0.0  ;;  %11089 = vst [vmem:[#allocation98_spill] sm:$0xff] %v8591_v46  ;;  %11092 = vst [vmem:[#allocation99_spill] sm:$0xff] %v8598_v37  ;;  %vm665_vm6 = vcmp.ge.f32.partialorder %v11090_v53, 0.0  ;;  %v2052_v17 = vrot.slane %v8598_v37, %v7999_v34 }
 0x175   :  { %vm672_vm8 = vcmp.ge.f32.partialorder %v11091_v20, 0.0  ;;  %v737_v1 = vmul.f32 0.2, %v11096_v59  ;;  %vm673_vm11 = vcmp.ge.f32.partialorder %v11096_v59, 0.0  ;;  %vm2268_vm12 = vcmask 31744  }
 0x176   :  { %v8574_v19 = vpop.permute.xlu1 %1022  ;;  %972 = vbcast.lane.b32.xlu1 %v7818_v5, 304  ;;  %v8588_v27 = vpop.permute.xlu0 %1306  ;;  %v8611_v28 = vsel %vm658_vm1, %v11085_v7, %v722_v38  ;;  %v2125_v38 = vsel %vm2069_vm5, %v2044_v15, %v2040_v43 }
 0x177   :  { %11083 = vst [vmem:[#allocation96_spill] sm:$0xff] %v8574_v19  ;;  %11088 = vst [vmem:[#allocation95_spill] sm:$0xff] %v8588_v27  ;;  %1038 = vbcast.lane.b32.xlu0 %v7895_v51, 296  ;;  %v11093_v19 = vld [vmem:[#allocation102_spill] sm:$0xff]  ;;  %v2004_v15 = vrot.slane %v8611_v28, %v7999_v34 }
 0x178   :  { %v730_v27 = vmul.f32 0.2, %v11093_v19  ;;  %11095 = vst [vmem:[#allocation101_spill] sm:$0xff] %v8611_v28  ;;  %vm666_vm10 = vcmp.ge.f32.partialorder %v11093_v19, 0.0 }
 0x17a   :  { %v8603_v42 = vpop.permute.xlu1 %1240  ;;  %1256 = vbcast.lane.b32.xlu1 %v7767_v31, 312  ;;  %v8625_v31 = vsel %vm671_vm3, %v11087_v50, %v735_v45  ;;  %v8628_v7 = vpop.permute.xlu0 %859  ;;  %v2121_v50 = vsel %vm2075_vm15, %v2024_v6, %v2120_v8  ;;  %v8648_v43 = vsel %vm666_vm10, %v11093_v19, %v730_v27  ;;  %v11102_v45 = vld [vmem:[#allocation103_spill] sm:$0xff]  ;;  %v8662_v8 = vsel %vm673_vm11, %v11096_v59, %v737_v1  ;;  %v11105_v59 = vld [vmem:[#allocation106_spill] sm:$0xff]  ;;  %v11108_v1 = vld [vmem:[#allocation109_spill] sm:$0xff] }
 0x17b   :  { %11094 = vst [vmem:[#allocation100_spill] sm:$0xff] %v8603_v42  ;;  %v8620_v42 = vsel %vm664_vm2, %v11086_v32, %v728_v29  ;;  %11098 = vst [vmem:[#allocation104_spill] sm:$0xff] %v8625_v31  ;;  %v8636_v32 = vsel %vm665_vm6, %v11090_v53, %v729_v60  ;;  %v8641_v29 = vsel %vm672_vm8, %v11091_v20, %v736_v10  ;;  %1322 = vbcast.lane.b32.xlu0 %v7837_v47, 304 }
 0x17c   :  { %11097 = vst [vmem:[#allocation102_spill] sm:$0xff] %v8620_v42  ;;  %11099 = vst [vmem:[#allocation169_spill] sm:$0xff] %v8636_v32  ;;  %v738_v37 = vmul.f32 0.2, %v11102_v45  ;;  %v2028_v10 = vrot.slane %v8620_v42, %v7999_v34  ;;  %v2056_v20 = vrot.slane %v8625_v31, %v7999_v34  ;;  %vm674_vm14 = vcmp.ge.f32.partialorder %v11102_v45, 0.0  ;;  %v11104_v42 = vld [vmem:[#allocation105_spill] sm:$0xff] }
 0x17d   :  { %11100 = vst [vmem:[#allocation170_spill] sm:$0xff] %v8641_v29  ;;  %11101 = vst [vmem:[#allocation171_spill] sm:$0xff] %v8648_v43  ;;  %v2116_v19 = vsel %vm2079_vm4, %v2000_v39, %v2115_v48  ;;  %v2126_v6 = vsel %vm2071_vm7, %v2048_v22, %v2125_v38  ;;  %v2060_v27 = vrot.slane %v8641_v29, %v7999_v34  ;;  %vm1428_vm1 = vcmp.gt.f32.partialorder %v11104_v42, 0.5  ;;  %v11107_v39 = vld [vmem:[#allocation107_spill] sm:$0xff] }
 0x17e   :  { %v8651_v46 = vpop.permute.xlu1 %824  ;;  %941 = vbcast.lane.b32.xlu1 %v7783_v21, 312  ;;  %11103 = vst [vmem:[#allocation103_spill] sm:$0xff] %v8662_v8  ;;  %v2032_v21 = vrot.slane %v8636_v32, %v7999_v34  ;;  %v8670_v53 = vpop.permute.xlu0 %991  ;;  %v2127_v60 = vsel %vm2073_vm9, %v2052_v17, %v2126_v6  ;;  %v2036_v28 = vrot.slane %v8648_v43, %v7999_v34  ;;  %vm1427_vm2 = vcmp.gt.f32.partialorder %v11105_v59, 0.5 }
 0x17f   :  { %1007 = vbcast.lane.b32.xlu0 %v7854_v54, 304  ;;  %v8679_v22 = vsel %vm674_vm14, %v11102_v45, %v738_v37  ;;  %v2064_v48 = vrot.slane %v8662_v8, %v7999_v34  ;;  %vm1435_vm3 = vcmp.gt.f32.partialorder %v11107_v39, 0.5  ;;  %vm1436_vm6 = vcmp.gt.f32.partialorder %v11108_v1, 0.5  ;;  %v11109_v37 = vld [vmem:[#allocation108_spill] sm:$0xff]  ;;  %v11123_v8 = vld [vmem:[#allocation118_spill] sm:$0xff] }
 0x180   :  { %11106 = vst [vmem:[#allocation105_spill] sm:$0xff] %v8679_v22  ;;  %v8689_v42 = vsel %vm10877_vm13, %v2004_v15, %v2116_v19  ;;  %v2122_v38 = vsel %vm2077_vm0, %v2028_v10, %v2121_v50  ;;  %v2128_v6 = vsel %vm2075_vm15, %v2056_v20, %v2127_v60  ;;  %vm1443_vm8 = vcmp.gt.f32.partialorder %v11109_v37, 0.5  ;;  %v11114_v37 = vld [vmem:[#allocation113_spill] sm:$0xff] }
 0x181   :  { %v2123_v45 = vsel %vm2079_vm4, %v2032_v21, %v2122_v38  ;;  %v2129_v59 = vsel %vm2077_vm0, %v2060_v27, %v2128_v6  ;;  %v2205_v39 = vsel %vm1428_vm1, %v8271_v0, -1e+30  ;;  %v2204_v1 = vsel %vm1427_vm2, %v8264_v35, -1e+30  ;;  %v11111_v21 = vld [vmem:[#allocation110_spill] sm:$0xff]  ;;  %v11112_v27 = vld [vmem:[#allocation111_spill] sm:$0xff] }
 0x182   :  { %v8685_v17 = vpop.permute.xlu1 %925  ;;  %1073 = vbcast.lane.b32.xlu1 %v7928_v33, 296  ;;  %v8698_v43 = vpop.permute.xlu0 %1057  ;;  %v8701_v32 = vsel %vm10877_vm13, %v2036_v28, %v2123_v45  ;;  %v2068_v50 = vrot.slane %v8679_v22, %v7999_v34  ;;  %v2212_v15 = vsel %vm1435_vm3, %v8264_v35, -1e+30  ;;  %v2213_v10 = vsel %vm1436_vm6, %v8271_v0, -1e+30  ;;  %v11113_v6 = vld [vmem:[#allocation112_spill] sm:$0xff] }
 0x183   :  { %11110 = vst [vmem:[#allocation106_spill] sm:$0xff] %v8701_v32  ;;  %1291 = vbcast.lane.b32.xlu0 %v7803_v49, 312  ;;  %v2130_v20 = vsel %vm2079_vm4, %v2064_v48, %v2129_v59  ;;  %v2220_v19 = vsel %vm1443_vm8, %v8264_v35, -1e+30  ;;  %vm1363_vm10 = vcmp.gt.f32.partialorder %v11111_v21, 0.5  ;;  %vm1444_vm11 = vcmp.gt.f32.partialorder %v11112_v27, 0.5 }
 0x184   :  { %v2438_v28 = vsel %vm2268_vm12, %v2205_v39, -inf  ;;  %v2437_v38 = vsel %vm2268_vm12, %v2204_v1, -inf  ;;  %vm1371_vm14 = vcmp.gt.f32.partialorder %v11113_v6, 0.5  ;;  %vm1364_vm1 = vcmp.gt.f32.partialorder %v11114_v37, 0.5  ;;  %v11115_v45 = vld [vmem:[#allocation114_spill] sm:$0xff]  ;;  %v11116_v59 = vld [vmem:[#allocation115_spill] sm:$0xff] }
 0x185   :  { %v2458_v49 = vsel %vm2268_vm12, %v2212_v15, -inf  ;;  %v2459_v48 = vsel %vm2268_vm12, %v2213_v10, -inf  ;;  %vm1429_vm2 = vcmp.gt.f32.partialorder %v11115_v45, 0.5  ;;  %vm1372_vm3 = vcmp.gt.f32.partialorder %v11116_v59, 0.5  ;;  %v11118_v45 = vld [vmem:[#allocation117_spill] sm:$0xff]  ;;  %v11119_v34 = vld [vmem:[#allocation119_spill] sm:$0xff] }
 0x186   :  { %v8712_v60 = vpop.permute.xlu1 %1053  ;;  %1357 = vbcast.lane.b32.xlu1 %v7879_v4, 304  ;;  %v8723_v21 = vpop.permute.xlu0 %1143  ;;  %v8726_v27 = vsel %vm10877_vm13, %v2068_v50, %v2130_v20  ;;  %v2479_v39 = vsel %vm2268_vm12, %v2220_v19, -inf  ;;  %v2140_v1 = vsel %vm1363_vm10, %v8264_v35, -1e+30  ;;  %v2221_v6 = vsel %vm1444_vm11, %v8271_v0, -1e+30 }
 0x187   :  { %11117 = vst [vmem:[#allocation107_spill] sm:$0xff] %v8726_v27  ;;  %976 = vbcast.lane.b32.xlu0 %v7818_v5, 312  ;;  %v2439_v15 = vmax.f32 %v2437_v38, %v2438_v28  ;;  %v2148_v10 = vsel %vm1371_vm14, %v8264_v35, -1e+30  ;;  %v2141_v37 = vsel %vm1364_vm1, %v8271_v0, -1e+30  ;;  %v2460_v50 = vmax.f32 %v2458_v49, %v2459_v48 }
 0x188   :  { %vm1437_vm6 = vcmp.gt.f32.partialorder %v11118_v45, 0.5  ;;  %v2206_v20 = vsel %vm1429_vm2, %v8407_v14, -1e+30  ;;  %v2149_v19 = vsel %vm1372_vm3, %v8271_v0, -1e+30  ;;  %vm1452_vm8 = vcmp.gt.f32.partialorder %v11119_v34, 0.5 }
 0x189   :  { %v2480_v5 = vsel %vm2268_vm12, %v2221_v6, -inf  ;;  %v11120_v28 = vld [vmem:[#allocation116_spill] sm:$0xff]  ;;  %v11121_v38 = vld [vmem:[#allocation122_spill] sm:$0xff]  ;;  %v11122_v22 = vld [vmem:[#allocation125_spill] sm:$0xff]  ;;  %v8748_v29 = vsel %vm2268_vm12, %v2140_v1, -inf  ;;  %v8751_v49 = vsel %vm2268_vm12, %v2141_v37, -inf }
 0x18a   :  { %v8735_v59 = vpop.permute.xlu1 %1108  ;;  %1042 = vbcast.lane.b32.xlu1 %v7895_v51, 304  ;;  %vm1451_vm10 = vcmp.gt.f32.partialorder %v11120_v28, 0.5  ;;  %vm1445_vm11 = vcmp.gt.f32.partialorder %v11121_v38, 0.5  ;;  %vm1380_vm14 = vcmp.gt.f32.partialorder %v11122_v22, 0.5  ;;  %v8745_v45 = vpop.permute.xlu0 %1275  ;;  %v2214_v48 = vsel %vm1437_vm6, %v8407_v14, -1e+30 }
 0x18b   :  { %vm1379_vm1 = vcmp.gt.f32.partialorder %v11123_v8, 0.5  ;;  %1326 = vbcast.lane.b32.xlu0 %v7837_v47, 312  ;;  %v2290_v34 = vsel %vm2268_vm12, %v2148_v10, -inf  ;;  %v2440_v6 = vsel %vm2268_vm12, %v2206_v20, -inf  ;;  %v2291_v31 = vsel %vm2268_vm12, %v2149_v19, -inf }
 0x18c   :  { %v2229_v27 = vsel %vm1452_vm8, %v8271_v0, -1e+30  ;;  %v2481_v1 = vmax.f32 %v2479_v39, %v2480_v5  ;;  %v2228_v37 = vsel %vm1451_vm10, %v8264_v35, -1e+30  ;;  %v2222_v47 = vsel %vm1445_vm11, %v8407_v14, -1e+30 }
 0x18d   :  { %v2157_v8 = vsel %vm1380_vm14, %v8271_v0, -1e+30  ;;  %v2271_v10 = vmax.f32 %v8748_v29, %v8751_v49  ;;  %v2461_v20 = vsel %vm2268_vm12, %v2214_v48, -inf  ;;  %v11124_v39 = vld [vmem:[#allocation128_spill] sm:$0xff]  ;;  %v8779_v5 = vmax.f32 %v2439_v15, %v2440_v6  ;;  %v11125_v48 = vld [vmem:[#allocation126_spill] sm:$0xff] }
 0x18e   :  { %v8760_v32 = vpop.permute.xlu1 %1209  ;;  %1011 = vbcast.lane.b32.xlu1 %v7854_v54, 312  ;;  %v2156_v54 = vsel %vm1379_vm1, %v8264_v35, -1e+30  ;;  %vm1459_vm2 = vcmp.gt.f32.partialorder %v11124_v39, 0.5  ;;  %v8777_v19 = vpop.permute.xlu0 %894  ;;  %v2292_v28 = vmax.f32 %v2290_v34, %v2291_v31  ;;  %v8782_v38 = vsel %vm2268_vm12, %v2229_v27, -inf  ;;  %v11126_v34 = vld [vmem:[#allocation131_spill] sm:$0xff] }
 0x18f   :  { %vm1373_vm3 = vcmp.gt.f32.partialorder %v8042_v16, 0.5  ;;  %1077 = vbcast.lane.b32.xlu0 %v7928_v33, 304  ;;  %v8787_v29 = vsel %vm2268_vm12, %v2228_v37, -inf  ;;  %v2482_v22 = vsel %vm2268_vm12, %v2222_v47, -inf  ;;  %v8791_v49 = vsel %vm2268_vm12, %v2157_v8, -inf }
 0x190   :  { %vm1460_vm6 = vcmp.gt.f32.partialorder %v11125_v48, 0.5  ;;  %v8797_v31 = vmax.f32 %v2460_v50, %v2461_v20  ;;  %v2311_v16 = vsel %vm2268_vm12, %v2156_v54, -inf  ;;  %v2236_v27 = vsel %vm1459_vm2, %v8264_v35, -1e+30 }
 0x191   :  { %vm1365_vm8 = vcmp.gt.f32.partialorder %v11126_v34, 0.5  ;;  %v2502_v6 = vmax.f32 %v8787_v29, %v8782_v38  ;;  %v2150_v37 = vsel %vm1373_vm3, %v8407_v14, -1e+30  ;;  %vm1387_vm10 = vcmp.gt.f32.partialorder %v8085_v9, 0.5  ;;  %v11127_v9 = vld [vmem:[#allocation132_spill] sm:$0xff]  ;;  %v11128_v29 = vld [vmem:[#allocation141_spill] sm:$0xff] }
 0x192   :  { %v8794_v15 = vpop.permute.xlu1 %1341  ;;  %1361 = vbcast.lane.b32.xlu1 %v7879_v4, 312  ;;  %vm1438_vm11 = vcmp.gt.f32.partialorder %v8099_v3, 0.5  ;;  %v8807_v47 = vpop.permute.xlu0 %1026  ;;  %v8809_v4 = vmax.f32 %v2481_v1, %v2482_v22  ;;  %v2313_v50 = vmax.f32 %v2311_v16, %v8791_v49  ;;  %v2237_v8 = vsel %vm1460_vm6, %v8271_v0, -1e+30  ;;  %v11129_v22 = vld [vmem:[#allocation145_spill] sm:$0xff] }
 0x193   :  { %vm1430_vm14 = vcmp.gt.f32.partialorder %v8110_v55, 0.5  ;;  %1046 = vbcast.lane.b32.xlu0 %v7895_v51, 312  ;;  %v8816_v20 = vsel %vm2268_vm12, %v2236_v27, -inf  ;;  %v2142_v54 = vsel %vm1365_vm8, %v8407_v14, -1e+30  ;;  %vm1388_vm1 = vcmp.gt.f32.partialorder %v11127_v9, 0.5 }
 0x194   :  { %vm1453_vm2 = vcmp.gt.f32.partialorder %v8140_v24, 0.5  ;;  %v2293_v1 = vsel %vm2268_vm12, %v2150_v37, -inf  ;;  %v2164_v39 = vsel %vm1387_vm10, %v8264_v35, -1e+30  ;;  %v2215_v55 = vsel %vm1438_vm11, %v8532_v30, -1e+30 }
 0x195   :  { %vm1381_vm3 = vcmp.gt.f32.partialorder %v8157_v12, 0.5  ;;  %v2522_v51 = vsel %vm2268_vm12, %v2237_v8, -inf  ;;  %v2207_v38 = vsel %vm1430_vm14, %v8532_v30, -1e+30  ;;  %vm1467_vm6 = vcmp.gt.f32.partialorder %v11128_v29, 0.5 }
 0x196   :  { %v8821_v3 = vpop.permute.xlu1 %960  ;;  %1081 = vbcast.lane.b32.xlu1 %v7928_v33, 312  ;;  %vm1468_vm8 = vcmp.gt.f32.partialorder %v11129_v22, 0.5  ;;  %v8832_v24 = vpop.permute.xlu0 %1244  ;;  %v2523_v33 = vmax.f32 %v8816_v20, %v2522_v51  ;;  %v2272_v49 = vsel %vm2268_vm12, %v2142_v54, -inf  ;;  %v2165_v48 = vsel %vm1388_vm1, %v8271_v0, -1e+30 }
 0x197   :  { %v2230_v16 = vsel %vm1453_vm2, %v8407_v14, -1e+30  ;;  %v8838_v27 = vmax.f32 %v2292_v28, %v2293_v1  ;;  %v8841_v12 = vsel %vm2268_vm12, %v2164_v39, -inf  ;;  %v8844_v34 = vsel %vm2268_vm12, %v2215_v55, -inf }
 0x198   :  { %v2158_v37 = vsel %vm1381_vm3, %v8407_v14, -1e+30  ;;  %v8850_v20 = vsel %vm2268_vm12, %v2207_v38, -inf  ;;  %v2244_v54 = vsel %vm1467_vm6, %v8264_v35, -1e+30  ;;  %vm1395_vm10 = vcmp.gt.f32.partialorder %v8224_v18, 0.5 }
 0x199   :  { %v2245_v9 = vsel %vm1468_vm8, %v8271_v0, -1e+30  ;;  %v8855_v28 = vmax.f32 %v2271_v10, %v2272_v49  ;;  %v8858_v1 = vsel %vm2268_vm12, %v2165_v48, -inf  ;;  %v2503_v39 = vsel %vm2268_vm12, %v2230_v16, -inf  ;;  %v11138_v38 = vld [vmem:[#allocation96_spill] sm:$0xff] }
 0x19a   :  { %v8847_v8 = vpop.permute.xlu1 %1178  ;;  %vm1461_vm11 = vcmp.gt.f32.partialorder %v8240_v26, 0.5  ;;  %v8862_v55 = vpop.permute.xlu0 %828  ;;  %v2334_v51 = vmax.f32 %v8841_v12, %v8858_v1  ;;  %v2314_v29 = vsel %vm2268_vm12, %v2158_v37, -inf  ;;  %vm1396_vm14 = vcmp.gt.f32.partialorder %v8199_v63, 0.5 }
 0x19b   :  { %v2443_v18 = vmax.f32 %v8779_v5, %v8850_v20  ;;  %v8873_v10 = vsel %vm2268_vm12, %v2244_v54, -inf  ;;  %v8876_v26 = vsel %vm2268_vm12, %v2245_v9, -inf  ;;  %v2172_v22 = vsel %vm1395_vm10, %v8264_v35, -1e+30 }
 0x19c   :  { %v8881_v48 = vmax.f32 %v2502_v6, %v2503_v39  ;;  %v2238_v16 = vsel %vm1461_vm11, %v8407_v14, -1e+30  ;;  %vm1446_vm1 = vcmp.gt.f32.partialorder %v8251_v36, 0.5  ;;  %vm1475_vm2 = vcmp.gt.f32.partialorder %v8286_v62, 0.5  ;;  %v11136_v6 = vld [vmem:[#allocation168_spill] sm:$0xff] }
 0x19d   :  { %v8886_v63 = vmax.f32 %v2313_v50, %v2314_v29  ;;  %v2173_v5 = vsel %vm1396_vm14, %v8271_v0, -1e+30  ;;  %vm1374_vm3 = vcmp.gt.f32.partialorder %v8297_v58, 0.5  ;;  %vm1366_vm6 = vcmp.gt.f32.partialorder %v8312_v57, 0.5 }
 0x19e   :  { %v8879_v49 = vpop.permute.xlu1 %1310  ;;  %v8891_v12 = vpop.permute.xlu0 %929  ;;  %v8896_v37 = vsel %vm2268_vm12, %v2172_v22, -inf  ;;  %vm1476_vm8 = vcmp.gt.f32.partialorder %v8268_v61, 0.5  ;;  %vm1389_vm10 = vcmp.gt.f32.partialorder %v8363_v41, 0.5  ;;  %v2524_v36 = vsel %vm2268_vm12, %v2238_v16, -inf }
 0x19f   :  { %v2223_v62 = vsel %vm1446_vm1, %v8532_v30, -1e+30  ;;  %v2252_v58 = vsel %vm1475_vm2, %v8264_v35, -1e+30  ;;  %vm1431_vm11 = vcmp.gt.f32.partialorder %v8383_v13, 0.5  ;;  %v8907_v50 = vsel %vm2268_vm12, %v2173_v5, -inf }
 0x1a0   :  { %v2151_v20 = vsel %vm1374_vm3, %v8532_v30, -1e+30  ;;  %v2143_v54 = vsel %vm1366_vm6, %v8532_v30, -1e+30  ;;  %vm1404_vm14 = vcmp.gt.f32.partialorder %v8399_v52, 0.5  ;;  %vm1403_vm1 = vcmp.gt.f32.partialorder %v8332_v23, 0.5 }
 0x1a1   :  { %v2253_v41 = vsel %vm1476_vm8, %v8271_v0, -1e+30  ;;  %v2166_v13 = vsel %vm1389_vm10, %v8407_v14, -1e+30  ;;  %v8919_v1 = vmax.f32 %v2523_v33, %v2524_v36  ;;  %v8922_v39 = vsel %vm2268_vm12, %v2223_v62, -inf }
 0x1a2   :  { %v8904_v57 = vpop.permute.xlu1 %863  ;;  %v8917_v9 = vpop.permute.xlu0 %1061  ;;  %v8925_v29 = vsel %vm2268_vm12, %v2252_v58, -inf  ;;  %v2208_v52 = vsel %vm1431_vm11, %v8562_v11, -1e+30  ;;  %v8929_v22 = vsel %vm2268_vm12, %v2151_v20, -inf  ;;  %v8932_v16 = vsel %vm2268_vm12, %v2143_v54, -inf }
 0x1a3   :  { %11130 = vst [vmem:[#allocation109_spill] sm:$0xff] %v8917_v9  ;;  %v2181_v23 = vsel %vm1404_vm14, %v8271_v0, -1e+30  ;;  %vm1454_vm2 = vcmp.gt.f32.partialorder %v8414_v44, 0.5  ;;  %v8939_v5 = vsel %vm2268_vm12, %v2253_v41, -inf  ;;  %v2335_v62 = vsel %vm2268_vm12, %v2166_v13, -inf }
 0x1a4   :  { %v2180_v36 = vsel %vm1403_vm1, %v8264_v35, -1e+30  ;;  %vm1439_vm3 = vcmp.gt.f32.partialorder %v8429_v56, 0.5  ;;  %v2444_v54 = vsel %vm2268_vm12, %v2208_v52, -inf  ;;  %vm1469_vm6 = vcmp.gt.f32.partialorder %v8458_v2, 0.5 }
 0x1a5   :  { %v8957_v56 = vsel %vm2268_vm12, %v2181_v23, -inf  ;;  %v2231_v58 = vsel %vm1454_vm2, %v8532_v30, -1e+30  ;;  %v8961_v61 = vsel %vm2268_vm12, %v2180_v36, -inf  ;;  %v8963_v20 = vmax.f32 %v2334_v51, %v2335_v62  ;;  %v11134_v23 = vld [vmem:[#allocation166_spill] sm:$0xff]  ;;  %v11135_v62 = vld [vmem:[#allocation92_spill] sm:$0xff] }
 0x1a6   :  { %v8936_v33 = vpop.permute.xlu1 %995  ;;  %v8950_v44 = vpop.permute.xlu0 %1147  ;;  %v2216_v2 = vsel %vm1439_vm3, %v8562_v11, -1e+30  ;;  %vm1483_vm8 = vcmp.gt.f32.partialorder %v8443_v40, 0.5  ;;  %v8969_v41 = vmax.f32 %v2443_v18, %v2444_v54  ;;  %v2246_v13 = vsel %vm1469_vm6, %v8407_v14, -1e+30 }
 0x1a7   :  { %11131 = vst [vmem:[#allocation108_spill] sm:$0xff] %v8936_v33  ;;  %11132 = vst [vmem:[#allocation110_spill] sm:$0xff] %v8950_v44  ;;  %vm1382_vm10 = vcmp.gt.f32.partialorder %v8482_v25, 0.5  ;;  %vm1484_vm11 = vcmp.gt.f32.partialorder %v11134_v23, 0.5  ;;  %v8977_v51 = vsel %vm2268_vm12, %v2231_v58, -inf  ;;  %vm1397_vm14 = vcmp.gt.f32.partialorder %v11135_v62, 0.5 }
 0x1a8   :  { %vm1447_vm1 = vcmp.gt.f32.partialorder %v11136_v6, 0.5  ;;  %v2465_v18 = vsel %vm2268_vm12, %v2216_v2, -inf  ;;  %v2260_v54 = vsel %vm1483_vm8, %v8264_v35, -1e+30  ;;  %vm1412_vm2 = vcmp.gt.f32.partialorder %v11138_v38, 0.5  ;;  %v11139_v25 = vld [vmem:[#allocation95_spill] sm:$0xff] }
 0x1a9   :  { %vm1477_vm3 = vcmp.gt.f32.partialorder %v11139_v25, 0.5  ;;  %v2545_v23 = vsel %vm2268_vm12, %v2246_v13, -inf  ;;  %v2159_v36 = vsel %vm1382_vm10, %v8532_v30, -1e+30  ;;  %v2261_v58 = vsel %vm1484_vm11, %v8271_v0, -1e+30 }
 0x1aa   :  { %v8967_v52 = vpop.permute.xlu1 %1112  ;;  %v8981_v40 = vpop.permute.xlu0 %1279  ;;  %v11142_v2 = vld [vmem:[#allocation91_spill] sm:$0xff]  ;;  %v2224_v38 = vsel %vm1447_vm1, %v8562_v11, -1e+30  ;;  %v11143_v13 = vmax.f32 %v8797_v31, %v8844_v34  ;;  %v9004_v44 = vsel %vm2268_vm12, %v2260_v54, -inf  ;;  %v9016_v9 = vsel %vm2268_vm12, %v2159_v36, -inf }
 0x1ab   :  { %11133 = vst [vmem:[#allocation111_spill] sm:$0xff] %v8967_v52  ;;  %11137 = vst [vmem:[#allocation112_spill] sm:$0xff] %v8981_v40  ;;  %v11140_v52 = vld [vmem:[#allocation100_spill] sm:$0xff]  ;;  %vm1411_vm13 = vcmp.gt.f32.partialorder %v11142_v2, 0.5  ;;  %v2174_v40 = vsel %vm1397_vm14, %v8407_v14, -1e+30  ;;  %v11145_v2 = vmax.f32 %v8873_v10, %v8876_v26 }
 0x1ac   :  { %vm1462_vm6 = vcmp.gt.f32.partialorder %v11140_v52, 0.5  ;;  %v9001_v25 = vmax.f32 %v11143_v13, %v2465_v18  ;;  %v2189_v52 = vsel %vm1412_vm2, %v8271_v0, -1e+30  ;;  %v9019_v31 = vsel %vm2268_vm12, %v2261_v58, -inf  ;;  %v6749_v36 = vld [vmem:[%s10693_s4] sm:$0xff] }
 0x1ad   :  { %v9013_v6 = vmax.f32 %v11145_v2, %v2545_v23  ;;  %v2239_v34 = vsel %vm1462_vm6, %v8532_v30, -1e+30  ;;  %v2188_v18 = vsel %vm1411_vm13, %v8264_v35, -1e+30  ;;  %v2356_v54 = vsel %vm2268_vm12, %v2174_v40, -inf }
 0x1ae   :  { %v8991_v62 = vpop.permute.xlu1 %1213  ;;  %v9008_v33 = vpop.permute.xlu0 %898  ;;  %v2486_v13 = vsel %vm2268_vm12, %v2224_v38, -inf  ;;  %vm1375_vm8 = vcmp.gt.f32.partialorder %v8628_v7, 0.5  ;;  %v9029_v10 = vsel %vm2268_vm12, %v2189_v52, -inf  ;;  %vm1367_vm10 = vcmp.gt.f32.partialorder %v8651_v46, 0.5 }
 0x1af   :  { %11141 = vst [vmem:[#allocation113_spill] sm:$0xff] %v8991_v62  ;;  %v2254_v62 = vsel %vm1477_vm3, %v8407_v14, -1e+30  ;;  %11144 = vst [vmem:[#allocation114_spill] sm:$0xff] %v9008_v33  ;;  %vm1405_vm11 = vcmp.gt.f32.partialorder %v8670_v53, 0.5  ;;  %v2317_v40 = vmax.f32 %v8886_v63, %v9016_v9  ;;  %v2586_v23 = vmax.f32 %v9004_v44, %v9019_v31  ;;  %v11153_v9 = vld [vmem:[#allocation109_spill] sm:$0xff] }
 0x1b0   :  { %v2566_v26 = vsel %vm2268_vm12, %v2254_v62, -inf  ;;  %v9042_v58 = vsel %vm2268_vm12, %v2239_v34, -inf  ;;  %vm1390_vm13 = vcmp.gt.f32.partialorder %v8685_v17, 0.5  ;;  %v9048_v46 = vsel %vm2268_vm12, %v2188_v18, -inf }
 0x1b1   :  { %2605 = vxpose.xlu0.b32.start [1/2] (short) (narrow) %v6749_v36, 64  ;;  %v11146_v53 = vmax.f32 %v8896_v37, %v8907_v50  ;;  %v11147_v52 = vmax.f32 %v8809_v4, %v8922_v39  ;;  %v2152_v34 = vsel %vm1375_vm8, %v8562_v11, -1e+30  ;;  %v2397_v17 = vmax.f32 %v9048_v46, %v9029_v10  ;;  %v6750_v39 = vld [vmem:[%s10693_s4 + $0x8] sm:$0xff] }
 0x1b2   :  { %v9026_v33 = vpop.permute.xlu1 %1345  ;;  %v9045_v62 = vpop.permute.xlu0 %1030  ;;  %v11148_v18 = vmax.f32 %v8925_v29, %v8939_v5  ;;  %v2144_v37 = vsel %vm1367_vm10, %v8562_v11, -1e+30  ;;  %v2182_v50 = vsel %vm1405_vm11, %v8407_v14, -1e+30  ;;  %v2527_v4 = vmax.f32 %v8919_v1, %v9042_v58 }
 0x1b3   :  { %v9053_v38 = vmax.f32 %v11146_v53, %v2356_v54  ;;  %v9058_v2 = vmax.f32 %v11147_v52, %v2486_v13  ;;  %v2167_v7 = vsel %vm1390_vm13, %v8532_v30, -1e+30  ;;  %vm1420_vm14 = vcmp.gt.f32.partialorder %v8698_v43, 0.5 }
 0x1b4   :  { %v9068_v36 = vmax.f32 %v11148_v18, %v2566_v26  ;;  %vm1419_vm1 = vcmp.gt.f32.partialorder %v8712_v60, 0.5  ;;  %v2297_v29 = vsel %vm2268_vm12, %v2152_v34, -inf  ;;  %vm1440_vm2 = vcmp.gt.f32.partialorder %v8723_v21, 0.5 }
 0x1b5   :  { %2606 = vxpose.xlu0.b32.end [2/2] (short) (narrow) %v6750_v39, 64  ;;  %vm1432_vm3 = vcmp.gt.f32.partialorder %v8735_v59, 0.5  ;;  %vm1470_vm6 = vcmp.gt.f32.partialorder %v8745_v45, 0.5  ;;  %v2276_v13 = vsel %vm2268_vm12, %v2144_v37, -inf  ;;  %v2377_v43 = vsel %vm2268_vm12, %v2182_v50, -inf }
 0x1b6   :  { %v9072_v54 = vpop.permute.xlu1 %964  ;;  %v9086_v5 = vpop.permute.xlu0 %1248  ;;  %vm1455_vm8 = vcmp.gt.f32.partialorder %v8760_v32, 0.5  ;;  %vm1383_vm10 = vcmp.gt.f32.partialorder %v8777_v19, 0.5  ;;  %v9093_v60 = vsel %vm2268_vm12, %v2167_v7, -inf  ;;  %v2197_v26 = vsel %vm1420_vm14, %v8271_v0, -1e+30 }
 0x1b7   :  { %v2196_v21 = vsel %vm1419_vm1, %v8264_v35, -1e+30  ;;  %vm1485_vm11 = vcmp.gt.f32.partialorder %v8794_v15, 0.5  ;;  %v11149_v45 = vmax.f32 %v8838_v27, %v8929_v22  ;;  %v2217_v32 = vsel %vm1440_vm2, %v8689_v42, -1e+30 }
 0x1b8   :  { %v2209_v19 = vsel %vm1432_vm3, %v8689_v42, -1e+30  ;;  %v2247_v52 = vsel %vm1470_vm6, %v8532_v30, -1e+30  ;;  %v11150_v0 = vmax.f32 %v8855_v28, %v8932_v16  ;;  %v11151_v35 = vmax.f32 %v8961_v61, %v8957_v56 }
 0x1b9   :  { %v9103_v53 = vmax.f32 %v11149_v45, %v2297_v29  ;;  %v2232_v27 = vsel %vm1455_vm8, %v8562_v11, -1e+30  ;;  %v2160_v22 = vsel %vm1383_vm10, %v8562_v11, -1e+30  ;;  %v2338_v37 = vmax.f32 %v8963_v20, %v9093_v60 }
 0x1ba   :  { %v9098_v59 = vpop.permute.xlu1 %1182  ;;  %v9111_v34 = vmax.f32 %v11150_v0, %v2276_v13  ;;  %v9116_v15 = vmax.f32 %v11151_v35, %v2377_v43  ;;  %v9120_v18 = vpop.permute.xlu0 %832  ;;  %v9125_v50 = vsel %vm2268_vm12, %v2197_v26, -inf  ;;  %v9128_v28 = vsel %vm2268_vm12, %v2196_v21, -inf  ;;  %v11155_v0 = vld [vmem:[#allocation110_spill] sm:$0xff]  ;;  %v11156_v35 = vld [vmem:[#allocation111_spill] sm:$0xff] }
 0x1bb   :  { %v2262_v16 = vsel %vm1485_vm11, %v8407_v14, -1e+30  ;;  %v9132_v61 = vsel %vm2268_vm12, %v2217_v32, -inf  ;;  %v9135_v56 = vsel %vm2268_vm12, %v2209_v19, -inf  ;;  %v9138_v7 = vsel %vm2268_vm12, %v2247_v52, -inf }
 0x1bc   :  { %vm1413_vm13 = vcmp.gt.f32.partialorder %v8807_v47, 0.5  ;;  %v2507_v29 = vsel %vm2268_vm12, %v2232_v27, -inf  ;;  %v2318_v13 = vsel %vm2268_vm12, %v2160_v22, -inf  ;;  %vm1398_vm14 = vcmp.gt.f32.partialorder %v8821_v3, 0.5 }
 0x1bd   :  { %vm1463_vm1 = vcmp.gt.f32.partialorder %v8832_v24, 0.5  ;;  %v2418_v43 = vmax.f32 %v9128_v28, %v9125_v50  ;;  %v2587_v26 = vsel %vm2268_vm12, %v2262_v16, -inf  ;;  %vm1448_vm2 = vcmp.gt.f32.partialorder %v8847_v8, 0.5 }
 0x1be   :  { %v9141_v39 = vpop.permute.xlu1 %1314  ;;  %vm1368_vm3 = vcmp.gt.f32.partialorder %v8862_v55, 0.5  ;;  %v9152_v47 = vpop.permute.xlu0 %933  ;;  %v2468_v21 = vmax.f32 %v9001_v25, %v9132_v61  ;;  %v2447_v45 = vmax.f32 %v8969_v41, %v9135_v56  ;;  %v2548_v3 = vmax.f32 %v9013_v6, %v9138_v7 }
 0x1bf   :  { %v2190_v24 = vsel %vm1413_vm13, %v8407_v14, -1e+30  ;;  %v11152_v32 = vmax.f32 %v8881_v48, %v8977_v51  ;;  %v9169_v8 = vmax.f32 %v2317_v40, %v2318_v13  ;;  %v2175_v55 = vsel %vm1398_vm14, %v8532_v30, -1e+30  ;;  %v11157_v13 = vld [vmem:[#allocation106_spill] sm:$0xff] }
 0x1c0   :  { %v2240_v25 = vsel %vm1463_vm1, %v8562_v11, -1e+30  ;;  %v9178_v52 = vmax.f32 %v2586_v23, %v2587_v26  ;;  %v2225_v48 = vsel %vm1448_vm2, %v8689_v42, -1e+30  ;;  %v2145_v51 = vsel %vm1368_vm3, %v8689_v42, -1e+30 }
 0x1c1   :  { %v9164_v19 = vmax.f32 %v11152_v32, %v2507_v29  ;;  %vm1478_vm6 = vcmp.gt.f32.partialorder %v8879_v49, 0.5  ;;  %v2398_v63 = vsel %vm2268_vm12, %v2190_v24, -inf  ;;  %vm1391_vm8 = vcmp.gt.f32.partialorder %v8891_v12, 0.5  ;;  %v11154_v23 = vld [vmem:[#allocation108_spill] sm:$0xff] }
 0x1c2   :  { %v9173_v41 = vpop.permute.xlu1 %867  ;;  %vm1376_vm10 = vcmp.gt.f32.partialorder %v8904_v57, 0.5  ;;  %vm1421_vm11 = vcmp.gt.f32.partialorder %v11153_v9, 0.5  ;;  %v9187_v40 = vpop.permute.xlu0 %1065  ;;  %v9190_v44 = vsel %vm2268_vm12, %v2175_v55, -inf  ;;  %v2528_v31 = vsel %vm2268_vm12, %v2240_v25, -inf }
 0x1c3   :  { %vm1406_vm13 = vcmp.gt.f32.partialorder %v11154_v23, 0.5  ;;  %vm1441_vm14 = vcmp.gt.f32.partialorder %v11155_v0, 0.5  ;;  %v9196_v49 = vsel %vm2268_vm12, %v2225_v48, -inf  ;;  %v9199_v12 = vsel %vm2268_vm12, %v2145_v51, -inf  ;;  %v11158_v48 = vld [vmem:[#allocation107_spill] sm:$0xff]  ;;  %v11160_v23 = vld [vmem:[#allocation113_spill] sm:$0xff] }
 0x1c4   :  { %v2255_v57 = vsel %vm1478_vm6, %v8532_v30, -1e+30  ;;  %vm1433_vm1 = vcmp.gt.f32.partialorder %v11156_v35, 0.5  ;;  %v9208_v22 = vmax.f32 %v2397_v17, %v2398_v63  ;;  %v2168_v50 = vsel %vm1391_vm8, %v8562_v11, -1e+30 }
 0x1c5   :  { %v2153_v28 = vsel %vm1376_vm10, %v8689_v42, -1e+30  ;;  %v2198_v16 = vsel %vm1421_vm11, %v8407_v14, -1e+30  ;;  %v2359_v61 = vmax.f32 %v9053_v38, %v9190_v44  ;;  %v9218_v56 = vmax.f32 %v2527_v4, %v2528_v31  ;;  %v11159_v31 = vld [vmem:[#allocation112_spill] sm:$0xff] }
 0x1c6   :  { %v9203_v27 = vpop.permute.xlu1 %999  ;;  %v2183_v29 = vsel %vm1406_vm13, %v8532_v30, -1e+30  ;;  %v2218_v10 = vsel %vm1441_vm14, %v11157_v13, -1e+30  ;;  %v1152_v46 = vpop.permute.xlu0 %1151  ;;  %v2489_v17 = vmax.f32 %v9058_v2, %v9196_v49  ;;  %v9225_v26 = vsel %vm2268_vm12, %v2255_v57, -inf }
 0x1c7   :  { %v2210_v14 = vsel %vm1433_vm1, %v11157_v13, -1e+30  ;;  %vm1442_vm2 = vcmp.gt.f32.partialorder %v1152_v46, 0.5  ;;  %v2279_v24 = vmax.f32 %v9111_v34, %v9199_v12  ;;  %v2339_v1 = vsel %vm2268_vm12, %v2168_v50, -inf }
 0x1c8   :  { %v9232_v58 = vsel %vm2268_vm12, %v2153_v28, -inf  ;;  %v2419_v4 = vsel %vm2268_vm12, %v2198_v16, -inf  ;;  %v9236_v55 = vsel %vm2268_vm12, %v2183_v29, -inf  ;;  %v2469_v25 = vsel %vm2268_vm12, %v2218_v10, -inf  ;;  %v11161_v28 = vld [vmem:[#allocation114_spill] sm:$0xff] }
 0x1c9   :  { %v2219_v51 = vsel %vm1442_vm2, %v11158_v48, -1e+30  ;;  %v2569_v63 = vmax.f32 %v9068_v36, %v9225_v26  ;;  %v2448_v9 = vsel %vm2268_vm12, %v2210_v14, -inf  ;;  %vm1471_vm6 = vcmp.gt.f32.partialorder %v11159_v31, 0.5 }
 0x1ca   :  { %v1117_v32 = vpop.permute.xlu1 %1116  ;;  %vm1456_vm8 = vcmp.gt.f32.partialorder %v11160_v23, 0.5  ;;  %v9245_v0 = vpop.permute.xlu0 %1283  ;;  %v9250_v57 = vmax.f32 %v2338_v37, %v2339_v1  ;;  %v2300_v35 = vmax.f32 %v9103_v53, %v9232_v58  ;;  %v9254_v50 = vmax.f32 %v2418_v43, %v2419_v4 }
 0x1cb   :  { %vm1434_vm3 = vcmp.gt.f32.partialorder %v1117_v32, 0.5  ;;  %vm1384_vm10 = vcmp.gt.f32.partialorder %v11161_v28, 0.5  ;;  %v2380_v16 = vmax.f32 %v9116_v15, %v9236_v55  ;;  %v2470_v29 = vmax.f32 %v2468_v21, %v2469_v25 }
 0x1cc   :  { %v2471_v10 = vsel %vm2268_vm12, %v2219_v51, -inf  ;;  %v2211_v46 = vsel %vm1434_vm3, %v11158_v48, -1e+30  ;;  %v2449_v20 = vmax.f32 %v2447_v45, %v2448_v9  ;;  %v2248_v60 = vsel %vm1471_vm6, %v8562_v11, -1e+30 }
 0x1cd   :  { %v2233_v37 = vsel %vm1456_vm8, %v8689_v42, -1e+30  ;;  %vm1486_vm11 = vcmp.gt.f32.partialorder %v9026_v33, 0.5  ;;  %v2161_v43 = vsel %vm1384_vm10, %v8689_v42, -1e+30  ;;  %vm1414_vm13 = vcmp.gt.f32.partialorder %v9045_v62, 0.5 }
 0x1ce   :  { %v9261_v14 = vpop.permute.xlu1 %1217  ;;  %vm1399_vm14 = vcmp.gt.f32.partialorder %v9072_v54, 0.5  ;;  %vm1464_vm1 = vcmp.gt.f32.partialorder %v9086_v5, 0.5  ;;  %v9270_v21 = vpop.permute.xlu0 %902  ;;  %vm1449_vm2 = vcmp.gt.f32.partialorder %v9098_v59, 0.5  ;;  %vm1369_vm3 = vcmp.gt.f32.partialorder %v9120_v18, 0.5 }
 0x1cf   :  { %v2472_v45 = vmax.f32 %v2470_v29, %v2471_v10  ;;  %v2450_v1 = vsel %vm2268_vm12, %v2211_v46, -inf  ;;  %v2549_v4 = vsel %vm2268_vm12, %v2248_v60, -inf  ;;  %v9277_v33 = vsel %vm2268_vm12, %v2233_v37, -inf }
 0x1d0   :  { %v2263_v62 = vsel %vm1486_vm11, %v8532_v30, -1e+30  ;;  %vm1479_vm6 = vcmp.gt.f32.partialorder %v9141_v39, 0.5  ;;  %v9284_v5 = vsel %vm2268_vm12, %v2161_v43, -inf  ;;  %v2191_v59 = vsel %vm1414_vm13, %v8532_v30, -1e+30 }
 0x1d1   :  { %v2176_v18 = vsel %vm1399_vm14, %v8562_v11, -1e+30  ;;  %vm1392_vm8 = vcmp.gt.f32.partialorder %v9152_v47, 0.5  ;;  %v2241_v32 = vsel %vm1464_vm1, %v8689_v42, -1e+30  ;;  %v2451_v9 = vmax.f32 %v2449_v20, %v2450_v1 }
 0x1d2   :  { %v9281_v54 = vpop.permute.xlu1 %1349  ;;  %v2226_v25 = vsel %vm1449_vm2, %v11157_v13, -1e+30  ;;  %v2146_v51 = vsel %vm1369_vm3, %v11157_v13, -1e+30  ;;  %v9292_v31 = vpop.permute.xlu0 %1034  ;;  %v9297_v39 = vmax.f32 %v2548_v3, %v2549_v4  ;;  %v2510_v23 = vmax.f32 %v9164_v19, %v9277_v33 }
 0x1d3   :  { %v2256_v28 = vsel %vm1479_vm6, %v8562_v11, -1e+30  ;;  %v2473_v47 = vrot.slane %v2472_v45, 4  ;;  %v2321_v29 = vmax.f32 %v9169_v8, %v9284_v5  ;;  %v9305_v10 = vsel %vm2268_vm12, %v2263_v62, -inf }
 0x1d4   :  { %v9308_v46 = vsel %vm2268_vm12, %v2191_v59, -inf  ;;  %v2169_v20 = vsel %vm1392_vm8, %v8689_v42, -1e+30  ;;  %v2360_v7 = vsel %vm2268_vm12, %v2176_v18, -inf  ;;  %v9315_v3 = vsel %vm2268_vm12, %v2241_v32, -inf }
 0x1d5   :  { %v2490_v60 = vsel %vm2268_vm12, %v2226_v25, -inf  ;;  %v2280_v37 = vsel %vm2268_vm12, %v2146_v51, -inf  ;;  %v2570_v43 = vsel %vm2268_vm12, %v2256_v28, -inf  ;;  %vm1377_vm10 = vcmp.gt.f32.partialorder %v9173_v41, 0.5 }
 0x1d6   :  { %v9311_v6 = vpop.permute.xlu1 %968  ;;  %vm1422_vm11 = vcmp.gt.f32.partialorder %v9187_v40, 0.5  ;;  %v2452_v1 = vrot.slane %v2451_v9, 4  ;;  %v9322_v4 = vpop.permute.xlu0 %1252  ;;  %v2590_v62 = vmax.f32 %v9178_v52, %v9305_v10  ;;  %v2401_v59 = vmax.f32 %v9208_v22, %v9308_v46 }
 0x1d7   :  { %v9329_v18 = vsel %vm2268_vm12, %v2169_v20, -inf  ;;  %v2474_v32 = vmax.f32 %v2472_v45, %v2473_v47  ;;  %v9334_v25 = vmax.f32 %v2359_v61, %v2360_v7  ;;  %v2531_v41 = vmax.f32 %v9218_v56, %v9315_v3 }
 0x1d8   :  { %v2491_v40 = vmax.f32 %v2489_v17, %v2490_v60  ;;  %v2281_v51 = vmax.f32 %v2279_v24, %v2280_v37  ;;  %v9347_v45 = vmax.f32 %v2569_v63, %v2570_v43  ;;  %v2154_v38 = vsel %vm1377_vm10, %v11157_v13, -1e+30 }
 0x1d9   :  { %v2199_v44 = vsel %vm1422_vm11, %v8532_v30, -1e+30  ;;  %v2342_v61 = vmax.f32 %v9250_v57, %v9329_v18  ;;  %vm1407_vm14 = vcmp.gt.f32.partialorder %v9203_v27, 0.5  ;;  %v2453_v2 = vmax.f32 %v2451_v9, %v2452_v1 }
 0x1da   :  { %v1187_v28 = vpop.permute.xlu1 %1186  ;;  %v837_v49 = vpop.permute.xlu0 %836  ;;  %v2475_v12 = vrot.slane %v2474_v32, 2  ;;  %vm1472_vm1 = vcmp.gt.f32.partialorder %v9245_v0, 0.5  ;;  %v2301_v17 = vsel %vm2268_vm12, %v2154_v38, -inf  ;;  %v9359_v30 = vsel %vm2268_vm12, %v2199_v44, -inf }
 0x1db   :  { %vm1450_vm13 = vcmp.gt.f32.partialorder %v1187_v28, 0.5  ;;  %vm1370_vm2 = vcmp.gt.f32.partialorder %v837_v49, 0.5  ;;  %v2184_v27 = vsel %vm1407_vm14, %v8562_v11, -1e+30  ;;  %vm1457_vm3 = vcmp.gt.f32.partialorder %v9261_v14, 0.5 }
 0x1dc   :  { %v2227_v34 = vsel %vm1450_vm13, %v11158_v48, -1e+30  ;;  %v2147_v24 = vsel %vm1370_vm2, %v11158_v48, -1e+30  ;;  %vm1385_vm6 = vcmp.gt.f32.partialorder %v9270_v21, 0.5  ;;  %v2454_v9 = vrot.slane %v2453_v2, 2 }
 0x1dd   :  { %v2492_v36 = vsel %vm2268_vm12, %v2227_v34, -inf  ;;  %v2282_v0 = vsel %vm2268_vm12, %v2147_v24, -inf  ;;  %v2249_v47 = vsel %vm1472_vm1, %v8689_v42, -1e+30  ;;  %vm1487_vm8 = vcmp.gt.f32.partialorder %v9281_v54, 0.5 }
 0x1de   :  { %v2493_v26 = vmax.f32 %v2491_v40, %v2492_v36  ;;  %v1319_v63 = vpop.permute.xlu1 %1318  ;;  %v2283_v20 = vmax.f32 %v2281_v51, %v2282_v0  ;;  %v938_v7 = vpop.permute.xlu0 %937  ;;  %v2302_v60 = vmax.f32 %v2300_v35, %v2301_v17  ;;  %v2422_v37 = vmax.f32 %v9254_v50, %v9359_v30 }
 0x1df   :  { %v2476_v43 = vmax.f32 %v2474_v32, %v2475_v12  ;;  %vm1415_vm10 = vcmp.gt.f32.partialorder %v9292_v31, 0.5  ;;  %v2381_v14 = vsel %vm2268_vm12, %v2184_v27, -inf  ;;  %v2234_v21 = vsel %vm1457_vm3, %v11157_v13, -1e+30 }
 0x1e0   :  { %v2162_v1 = vsel %vm1385_vm6, %v11157_v13, -1e+30  ;;  %v2494_v40 = vrot.slane %v2493_v26, 4  ;;  %v9378_v51 = vsel %vm2268_vm12, %v2249_v47, -inf  ;;  %v2264_v53 = vsel %vm1487_vm8, %v8562_v11, -1e+30 }
 0x1e1   :  { %v2284_v58 = vrot.slane %v2283_v20, 4  ;;  %v2455_v35 = vmax.f32 %v2453_v2, %v2454_v9  ;;  %v2192_v32 = vsel %vm1415_vm10, %v8562_v11, -1e+30  ;;  %vm1400_vm13 = vcmp.gt.f32.partialorder %v9311_v6, 0.5 }
 0x1e2   :  { %v872_v54 = vpop.permute.xlu1 %871  ;;  %v1070_v28 = vpop.permute.xlu0 %1069  ;;  %v2477_v38 = vrot.slane %v2476_v43, 1  ;;  %v2511_v44 = vsel %vm2268_vm12, %v2234_v21, -inf  ;;  %v2322_v34 = vsel %vm2268_vm12, %v2162_v1, -inf  ;;  %v9390_v12 = vmax.f32 %v2380_v16, %v2381_v14 }
 0x1e3   :  { %vm1378_vm11 = vcmp.gt.f32.partialorder %v872_v54, 0.5  ;;  %v2591_v2 = vsel %vm2268_vm12, %v2264_v53, -inf  ;;  %v2495_v36 = vmax.f32 %v2493_v26, %v2494_v40  ;;  %v2552_v24 = vmax.f32 %v9297_v39, %v9378_v51 }
 0x1e4   :  { %v2155_v31 = vsel %vm1378_vm11, %v11158_v48, -1e+30  ;;  %v2402_v27 = vsel %vm2268_vm12, %v2192_v32, -inf  ;;  %v2177_v0 = vsel %vm1400_vm13, %v8689_v42, -1e+30  ;;  %v2285_v9 = vmax.f32 %v2283_v20, %v2284_v58 }
 0x1e5   :  { %v2303_v49 = vsel %vm2268_vm12, %v2155_v31, -inf  ;;  %v2456_v47 = vrot.slane %v2455_v35, 1  ;;  %v2512_v15 = vmax.f32 %v2510_v23, %v2511_v44  ;;  %v2323_v55 = vmax.f32 %v2321_v29, %v2322_v34 }
 0x1e6   :  { %v2304_v17 = vmax.f32 %v2302_v60, %v2303_v49  ;;  %v1004_v6 = vpop.permute.xlu1 %1003  ;;  %v1288_v26 = vpop.permute.xlu0 %1287  ;;  %v2478_v60 = vmax.f32 %v2476_v43, %v2477_v38  ;;  %v9406_v14 = vmax.f32 %v2590_v62, %v2591_v2  ;;  %vm1465_vm14 = vcmp.gt.f32.partialorder %v9322_v4, 0.5 }
 0x1e7   :  { %vm1480_vm1 = vcmp.gt.f32.partialorder %v1319_v63, 0.5  ;;  %v9412_v19 = vmax.f32 %v2401_v59, %v2402_v27  ;;  %v9415_v33 = vsel %vm2268_vm12, %v2177_v0, -inf  ;;  %v2496_v8 = vrot.slane %v2495_v36, 2 }
 0x1e8   :  { %v2305_v16 = vrot.slane %v2304_v17, 4  ;;  %vm1393_vm2 = vcmp.gt.f32.partialorder %v938_v7, 0.5  ;;  %v2286_v23 = vrot.slane %v2285_v9, 2  ;;  %vm1423_vm3 = vcmp.gt.f32.partialorder %v1070_v28, 0.5 }
 0x1e9   :  { %v2457_v52 = vmax.f32 %v2455_v35, %v2456_v47  ;;  %v2242_v10 = vsel %vm1465_vm14, %v11157_v13, -1e+30  ;;  %v2257_v4 = vsel %vm1480_vm1, %v8689_v42, -1e+30  ;;  %v2170_v46 = vsel %vm1393_vm2, %v11157_v13, -1e+30 }
 0x1ea   :  { %v1222_v5 = vpop.permute.xlu1 %1221  ;;  %v2306_v29 = vmax.f32 %v2304_v17, %v2305_v16  ;;  %v907_v22 = vpop.permute.xlu0 %906  ;;  %vm1408_vm8 = vcmp.gt.f32.partialorder %v1004_v6, 0.5  ;;  %v2497_v63 = vmax.f32 %v2495_v36, %v2496_v8  ;;  %v2200_v20 = vsel %vm1423_vm3, %v8562_v11, -1e+30 }
 0x1eb   :  { %vm1458_vm6 = vcmp.gt.f32.partialorder %v1222_v5, 0.5  ;;  %vm1386_vm10 = vcmp.gt.f32.partialorder %v907_v22, 0.5  ;;  %v2363_v1 = vmax.f32 %v9334_v25, %v9415_v33  ;;  %v2287_v40 = vmax.f32 %v2285_v9, %v2286_v23 }
 0x1ec   :  { %v2235_v62 = vsel %vm1458_vm6, %v11158_v48, -1e+30  ;;  %v2163_v43 = vsel %vm1386_vm10, %v11158_v48, -1e+30  ;;  %v2307_v54 = vrot.slane %v2306_v29, 2  ;;  %v2532_v58 = vsel %vm2268_vm12, %v2242_v10, -inf }
 0x1ed   :  { %v2513_v59 = vsel %vm2268_vm12, %v2235_v62, -inf  ;;  %v2324_v53 = vsel %vm2268_vm12, %v2163_v43, -inf  ;;  %v2185_v35 = vsel %vm1408_vm8, %v8689_v42, -1e+30  ;;  %v9430_v11 = vsel %vm2268_vm12, %v2257_v4, -inf }
 0x1ee   :  { %v2514_v7 = vmax.f32 %v2512_v15, %v2513_v59  ;;  %v1354_v21 = vpop.permute.xlu1 %1353  ;;  %v2325_v31 = vmax.f32 %v2323_v55, %v2324_v53  ;;  %v1039_v28 = vpop.permute.xlu0 %1038  ;;  %v2343_v38 = vsel %vm2268_vm12, %v2170_v46, -inf  ;;  %v2423_v44 = vsel %vm2268_vm12, %v2200_v20, -inf }
 0x1ef   :  { %vm1473_vm11 = vcmp.gt.f32.partialorder %v1288_v26, 0.5  ;;  %v2498_v34 = vrot.slane %v2497_v63, 1  ;;  %vm1488_vm13 = vcmp.gt.f32.partialorder %v1354_v21, 0.5  ;;  %v2533_v17 = vmax.f32 %v2531_v41, %v2532_v58 }
 0x1f0   :  { %v2515_v32 = vrot.slane %v2514_v7, 4  ;;  %v2326_v2 = vrot.slane %v2325_v31, 4  ;;  %v2288_v6 = vrot.slane %v2287_v40, 1  ;;  %v2308_v27 = vmax.f32 %v2306_v29, %v2307_v54 }
 0x1f1   :  { %v9438_v0 = vsel %vm2268_vm12, %v2185_v35, -inf  ;;  %v2573_v9 = vmax.f32 %v9347_v45, %v9430_v11  ;;  %v2250_v47 = vsel %vm1473_vm11, %v11157_v13, -1e+30  ;;  %v2660_v16 = vsel %vm2069_vm5, %v2478_v60, %v2457_v52 }
 0x1f2   :  { %v2516_v49 = vmax.f32 %v2514_v7, %v2515_v32  ;;  %v973_v36 = vpop.permute.xlu1 %972  ;;  %v1323_v55 = vpop.permute.xlu0 %1322  ;;  %v2344_v26 = vmax.f32 %v2342_v61, %v2343_v38  ;;  %v9450_v56 = vmax.f32 %v2422_v37, %v2423_v44  ;;  %v2327_v3 = vmax.f32 %v2325_v31, %v2326_v2 }
 0x1f3   :  { %v2265_v41 = vsel %vm1488_vm13, %v8689_v42, -1e+30  ;;  %v2499_v8 = vmax.f32 %v2497_v63, %v2498_v34  ;;  %v2384_v5 = vmax.f32 %v9390_v12, %v9438_v0  ;;  %vm1416_vm14 = vcmp.gt.f32.partialorder %v1039_v28, 0.5 }
 0x1f4   :  { %v2517_v15 = vrot.slane %v2516_v49, 2  ;;  %v2289_v60 = vmax.f32 %v2287_v40, %v2288_v6  ;;  %v2309_v52 = vrot.slane %v2308_v27, 1  ;;  %v2553_v57 = vsel %vm2268_vm12, %v2250_v47, -inf }
 0x1f5   :  { %v9457_v50 = vsel %vm2268_vm12, %v2265_v41, -inf  ;;  %vm1401_vm2 = vcmp.gt.f32.partialorder %v973_v36, 0.5  ;;  %v2328_v37 = vrot.slane %v2327_v3, 2  ;;  %v2193_v10 = vsel %vm1416_vm14, %v8689_v42, -1e+30 }
 0x1f6   :  { %v2518_v23 = vmax.f32 %v2516_v49, %v2517_v15  ;;  %v1257_v29 = vpop.permute.xlu1 %1256  ;;  %v1008_v30 = vpop.permute.xlu0 %1007  ;;  %vm1481_vm3 = vcmp.gt.f32.partialorder %v1323_v55, 0.5  ;;  %v2554_v62 = vmax.f32 %v2552_v24, %v2553_v57  ;;  %v2661_v63 = vsel %vm2071_vm7, %v2499_v8, %v2660_v16 }
 0x1f7   :  { %vm1466_vm1 = vcmp.gt.f32.partialorder %v1257_v29, 0.5  ;;  %v2310_v20 = vmax.f32 %v2308_v27, %v2309_v52  ;;  %v2594_v7 = vmax.f32 %v9406_v14, %v9457_v50  ;;  %v2178_v43 = vsel %vm1401_vm2, %v11157_v13, -1e+30 }
 0x1f8   :  { %v2519_v18 = vrot.slane %v2518_v23, 1  ;;  %v2243_v61 = vsel %vm1466_vm1, %v11158_v48, -1e+30  ;;  %v9470_v21 = vsel %vm2268_vm12, %v2193_v10, -inf  ;;  %v2258_v40 = vsel %vm1481_vm3, %v11157_v13, -1e+30 }
 0x1f9   :  { %v2534_v4 = vsel %vm2268_vm12, %v2243_v61, -inf  ;;  %v2329_v24 = vmax.f32 %v2327_v3, %v2328_v37  ;;  %v2364_v35 = vsel %vm2268_vm12, %v2178_v43, -inf  ;;  %v2405_v44 = vmax.f32 %v9412_v19, %v9470_v21 }
 0x1fa   :  { %v2520_v22 = vmax.f32 %v2518_v23, %v2519_v18  ;;  %v2535_v46 = vmax.f32 %v2533_v17, %v2534_v4  ;;  %v942_v59 = vpop.permute.xlu1 %941  ;;  %v1292_v51 = vpop.permute.xlu0 %1291  ;;  %v2574_v34 = vsel %vm2268_vm12, %v2258_v40, -inf  ;;  %vm1409_vm10 = vcmp.gt.f32.partialorder %v1008_v30, 0.5 }
 0x1fb   :  { %vm1394_vm6 = vcmp.gt.f32.partialorder %v942_v59, 0.5  ;;  %vm1474_vm8 = vcmp.gt.f32.partialorder %v1292_v51, 0.5  ;;  %v2330_v27 = vrot.slane %v2329_v24, 1  ;;  %v2365_v47 = vmax.f32 %v2363_v1, %v2364_v35 }
 0x1fc   :  { %v2536_v54 = vrot.slane %v2535_v46, 4  ;;  %v2171_v39 = vsel %vm1394_vm6, %v11158_v48, -1e+30  ;;  %v9476_v58 = vsel %vm2073_vm9, %v2520_v22, %v2661_v63  ;;  %v2251_v28 = vsel %vm1474_vm8, %v11158_v48, -1e+30 }
 0x1fd   :  { %v2345_v53 = vsel %vm2268_vm12, %v2171_v39, -inf  ;;  %v2555_v49 = vsel %vm2268_vm12, %v2251_v28, -inf  ;;  %v2653_v15 = vsel %vm2069_vm5, %v2310_v20, %v2289_v60  ;;  %v2186_v16 = vsel %vm1409_vm10, %v11157_v13, -1e+30 }
 0x1fe   :  { %v2537_v32 = vmax.f32 %v2535_v46, %v2536_v54  ;;  %v2346_v31 = vmax.f32 %v2344_v26, %v2345_v53  ;;  %v1074_v38 = vpop.permute.xlu1 %1073  ;;  %v2556_v17 = vmax.f32 %v2554_v62, %v2555_v49  ;;  %v977_v6 = vpop.permute.xlu0 %976  ;;  %v2575_v8 = vmax.f32 %v2573_v9, %v2574_v34 }
 0x1ff   :  { %vm1424_vm11 = vcmp.gt.f32.partialorder %v1074_v38, 0.5  ;;  %vm1402_vm13 = vcmp.gt.f32.partialorder %v977_v6, 0.5  ;;  %v2385_v57 = vsel %vm2268_vm12, %v2186_v16, -inf  ;;  %v2331_v30 = vmax.f32 %v2329_v24, %v2330_v27 }
 0x200   :  { %v2538_v2 = vrot.slane %v2537_v32, 2  ;;  %v2347_v36 = vrot.slane %v2346_v31, 4  ;;  %v2557_v3 = vrot.slane %v2556_v17, 4  ;;  %v2201_v23 = vsel %vm1424_vm11, %v8689_v42, -1e+30 }
 0x201   :  { %v2179_v29 = vsel %vm1402_vm13, %v11158_v48, -1e+30  ;;  %v2425_v42 = vsel %vm2268_vm12, %v2201_v23, -inf  ;;  %v2386_v20 = vmax.f32 %v2384_v5, %v2385_v57  ;;  %v2654_v53 = vsel %vm2071_vm7, %v2331_v30, %v2653_v15 }
 0x202   :  { %v2539_v55 = vmax.f32 %v2537_v32, %v2538_v2  ;;  %v2348_v26 = vmax.f32 %v2346_v31, %v2347_v36  ;;  %v1358_v41 = vpop.permute.xlu1 %1357  ;;  %v2558_v1 = vmax.f32 %v2556_v17, %v2557_v3  ;;  %v2366_v60 = vsel %vm2268_vm12, %v2179_v29, -inf  ;;  %v1327_v52 = vpop.permute.xlu0 %1326 }
 0x203   :  { %vm1489_vm14 = vcmp.gt.f32.partialorder %v1358_v41, 0.5  ;;  %v2367_v18 = vmax.f32 %v2365_v47, %v2366_v60  ;;  %vm1482_vm1 = vcmp.gt.f32.partialorder %v1327_v52, 0.5  ;;  %v2426_v39 = vmax.f32 %v9450_v56, %v2425_v42 }
 0x204   :  { %v2540_v25 = vrot.slane %v2539_v55, 1  ;;  %v2349_v33 = vrot.slane %v2348_v26, 2  ;;  %v2266_v61 = vsel %vm1489_vm14, %v11157_v13, -1e+30  ;;  %v2559_v11 = vrot.slane %v2558_v1, 2 }
 0x205   :  { %v2368_v37 = vrot.slane %v2367_v18, 4  ;;  %v2595_v10 = vsel %vm2268_vm12, %v2266_v61, -inf  ;;  %v2259_v4 = vsel %vm1482_vm1, %v11158_v48, -1e+30  ;;  %vm2669_vm14 = vcmask 130048  }
 0x206   :  { %v2350_v45 = vmax.f32 %v2348_v26, %v2349_v33  ;;  %v1043_v9 = vpop.permute.xlu1 %1042  ;;  %v2541_v62 = vmax.f32 %v2539_v55, %v2540_v25  ;;  %v2560_v22 = vmax.f32 %v2558_v1, %v2559_v11  ;;  %v2576_v46 = vsel %vm2268_vm12, %v2259_v4, -inf  ;;  %v1078_v63 = vpop.permute.xlu0 %1077 }
 0x207   :  { %vm1417_vm2 = vcmp.gt.f32.partialorder %v1043_v9, 0.5  ;;  %v2369_v43 = vmax.f32 %v2367_v18, %v2368_v37  ;;  %v2577_v40 = vmax.f32 %v2575_v8, %v2576_v46  ;;  %vm1425_vm3 = vcmp.gt.f32.partialorder %v1078_v63, 0.5 }
 0x208   :  { %v2194_v59 = vsel %vm1417_vm2, %v11157_v13, -1e+30  ;;  %v2351_v54 = vrot.slane %v2350_v45, 1  ;;  %v2596_v51 = vmax.f32 %v2594_v7, %v2595_v10  ;;  %v2561_v12 = vrot.slane %v2560_v22, 1 }
 0x209   :  { %v2370_v35 = vrot.slane %v2369_v43, 2  ;;  %v2578_v32 = vrot.slane %v2577_v40, 4  ;;  %v2406_v31 = vsel %vm2268_vm12, %v2194_v59, -inf  ;;  %v2202_v0 = vsel %vm1425_vm3, %v11157_v13, -1e+30 }
 0x20a   :  { %v1012_v24 = vpop.permute.xlu1 %1011  ;;  %v1047_v28 = vpop.permute.xlu0 %1046  ;;  %v2663_v56 = vsel %vm2075_vm15, %v2541_v62, %v9476_v58  ;;  %v2352_v7 = vmax.f32 %v2350_v45, %v2351_v54  ;;  %v2407_v34 = vmax.f32 %v2405_v44, %v2406_v31  ;;  %v2427_v58 = vsel %vm2268_vm12, %v2202_v0, -inf }
 0x20b   :  { %vm1410_vm6 = vcmp.gt.f32.partialorder %v1012_v24, 0.5  ;;  %v2371_v38 = vmax.f32 %v2369_v43, %v2370_v35  ;;  %v2579_v14 = vmax.f32 %v2577_v40, %v2578_v32  ;;  %vm1418_vm8 = vcmp.gt.f32.partialorder %v1047_v28, 0.5 }
 0x20c   :  { %v2187_v5 = vsel %vm1410_vm6, %v11158_v48, -1e+30  ;;  %v2195_v2 = vsel %vm1418_vm8, %v11158_v48, -1e+30  ;;  %v2562_v21 = vmax.f32 %v2560_v22, %v2561_v12  ;;  %v2655_v8 = vsel %vm2073_vm9, %v2352_v7, %v2654_v53 }
 0x20d   :  { %v2387_v50 = vsel %vm2268_vm12, %v2187_v5, -inf  ;;  %v2372_v36 = vrot.slane %v2371_v38, 1  ;;  %v2580_v17 = vrot.slane %v2579_v14, 2  ;;  %v2408_v6 = vsel %vm2268_vm12, %v2195_v2, -inf }
 0x20e   :  { %v2388_v49 = vmax.f32 %v2386_v20, %v2387_v50  ;;  %v1362_v13 = vpop.permute.xlu1 %1361  ;;  %v2409_v47 = vmax.f32 %v2407_v34, %v2408_v6  ;;  %v2428_v23 = vmax.f32 %v2426_v39, %v2427_v58  ;;  %v2664_v61 = vsel %vm2077_vm0, %v2562_v21, %v2663_v56  ;;  %v11167_v21 = vld [vmem:[#allocation73_spill] sm:$0xff] }
 0x20f   :  { %vm1490_vm10 = vcmp.gt.f32.partialorder %v1362_v13, 0.5  ;;  %v2373_v55 = vmax.f32 %v2371_v38, %v2372_v36  ;;  %v2581_v16 = vmax.f32 %v2579_v14, %v2580_v17  ;;  %v11164_v17 = vld [vmem:[#allocation70_spill] sm:$0xff]  ;;  %vm4087_vm1 = vcmask 523264  }
 0x210   :  { %v2389_v27 = vrot.slane %v2388_v49, 4  ;;  %v2267_v15 = vsel %vm1490_vm10, %v11158_v48, -1e+30  ;;  %v2410_v26 = vrot.slane %v2409_v47, 4 }
 0x211   :  { %v2597_v19 = vsel %vm2268_vm12, %v2267_v15, -inf  ;;  %v2582_v29 = vrot.slane %v2581_v16, 1  ;;  %v2656_v25 = vsel %vm2075_vm15, %v2373_v55, %v2655_v8 }
 0x212   :  { %v2390_v44 = vmax.f32 %v2388_v49, %v2389_v27  ;;  %v2598_v3 = vmax.f32 %v2596_v51, %v2597_v19  ;;  %v1082_v41 = vpop.permute.xlu1 %1081  ;;  %v2411_v1 = vmax.f32 %v2409_v47, %v2410_v26  ;;  %v11165_v47 = vld [vmem:[#allocation71_spill] sm:$0xff] }
 0x213   :  { %vm1426_vm11 = vcmp.gt.f32.partialorder %v1082_v41, 0.5  ;;  %v2583_v18 = vmax.f32 %v2581_v16, %v2582_v29  ;;  %v11166_v16 = vld [vmem:[#allocation72_spill] sm:$0xff]  ;;  %v11168_v41 = vld [vmem:[#allocation75_spill] sm:$0xff] }
 0x214   :  { %v2391_v33 = vrot.slane %v2390_v44, 2  ;;  %v2599_v60 = vrot.slane %v2598_v3, 4  ;;  %v2203_v52 = vsel %vm1426_vm11, %v11158_v48, -1e+30  ;;  %v2412_v45 = vrot.slane %v2411_v1, 2 }
 0x215   :  { %v2429_v57 = vsel %vm2268_vm12, %v2203_v52, -inf  ;;  %v2665_v9 = vsel %vm2079_vm4, %v2583_v18, %v2664_v61  ;;  %vm11162_vm12 = vcmask 1047559   ;;  %v11171_v52 = vld [vmem:[#allocation76_spill] sm:$0xff] }
 0x216   :  { %v2392_v30 = vmax.f32 %v2390_v44, %v2391_v33  ;;  %v2600_v11 = vmax.f32 %v2598_v3, %v2599_v60  ;;  %v2430_v42 = vmax.f32 %v2428_v23, %v2429_v57  ;;  %v2413_v10 = vmax.f32 %v2411_v1, %v2412_v45  ;;  %vm11163_vm13 = vmmov %vm11162_vm12  ;;  %v11169_v23 = vld [vmem:[#allocation74_spill] sm:$0xff] }
 0x217   :  { %v6775_v3 = vmov 0   ;;  %vm11268_vm2 = vmmov %vm11162_vm12 }
 0x218   :  { %v2393_v37 = vrot.slane %v2392_v30, 1  ;;  %v2601_v4 = vrot.slane %v2600_v11, 2  ;;  %v2431_v62 = vrot.slane %v2430_v42, 4  ;;  %v2414_v63 = vrot.slane %v2413_v10, 1  ;;  %6607 = vset.pattern.permute.xlu1 %v6775_v3  ;;  %6608 = vset.pattern.permute.xlu0 %v6775_v3  ;;  %vm11272_vm3 = vmmov %vm11268_vm2 }
 0x219   :  { %vm11277_vm6 = vmmov %vm11268_vm2 }
 0x21a   :  { %v2432_v22 = vmax.f32 %v2430_v42, %v2431_v62  ;;  %v2602_v46 = vmax.f32 %v2600_v11, %v2601_v4  ;;  %v2394_v59 = vmax.f32 %v2392_v30, %v2393_v37  ;;  %v2415_v39 = vmax.f32 %v2413_v10, %v2414_v63  ;;  %vm11285_vm8 = vmmov %vm11268_vm2 }
 0x21b   :  { %vm11291_vm10 = vmmov %vm11268_vm2 }
 0x21c   :  { %v2433_v48 = vrot.slane %v2432_v22, 2  ;;  %v2603_v20 = vrot.slane %v2602_v46, 1  ;;  %v2657_v43 = vsel %vm2077_vm0, %v2394_v59, %v2656_v25  ;;  %v11170_v25 = vld [vmem:[#allocation84_spill] sm:$0xff]  ;;  %vm11296_vm11 = vmmov %vm11268_vm2 }
 0x21d   :  { %v2658_v35 = vsel %vm2079_vm4, %v2415_v39, %v2657_v43 }
 0x21e   :  { %v2604_v40 = vmax.f32 %v2602_v46, %v2603_v20  ;;  %v2434_v54 = vmax.f32 %v2432_v22, %v2433_v48 }
 0x220   :  { %v2666_v51 = vsel %vm11162_vm12, %v2604_v40, %v2665_v9  ;;  %v2435_v24 = vrot.slane %v2434_v54, 1  ;;  %vm11301_vm12 = vmmov %vm11268_vm2 }
 0x221   :  { %6542 = vmatprep.subr.mxu0 %v2666_v51 }
 0x222   :  { %6543 = vmatpush3.msra.mxu0 %v2666_v51  ;;  %v2436_v53 = vmax.f32 %v2434_v54, %v2435_v24 }
 0x224   :  { %v2659_v32 = vsel %vm11163_vm13, %v2436_v53, %v2658_v35 }
 0x225   :  { %6544 = vmatprep.subr.mxu0 %v2659_v32 }
 0x226   :  { %6545 = vmatpush3.msra.mxu0 %v2659_v32 }
 0x22d   :  { %v2621_v31 = vpop.trf.xlu0 }
 0x22e   :  { %6546 = vmatprep.mubr.msk.f32.mxu0 %vm2669_vm14, %v2621_v31 }
 0x231   :  { %v2622_v12 = vpop.trf.xlu0 }
 0x232   :  { %6547 = vmatmul.mubr.msk.f32.vlgmr.msra.gmra.mxu0 %vm2669_vm14, %v2622_v12 }
 0x235   :  { %v2623_v0 = vpop.trf.xlu0 }
 0x236   :  { %6549 = vmatprep.mubr.msk.f32.mxu0 %vm2669_vm14, %v2623_v0 }
 0x239   :  { %v2624_v5 = vpop.trf.xlu0 }
 0x23a   :  { %6550 = vmatmul.mubr.msk.f32.gmra.mxu0 %vm2669_vm14, %v2624_v5 }
 0x23d   :  { %v2625_v28 = vpop.trf.xlu0 }
 0x23e   :  { %6552 = vmatprep.mubr.msk.f32.mxu0 %vm2669_vm14, %v2625_v28 }
 0x241   :  { %v2626_v56 = vpop.trf.xlu0 }
 0x242   :  { %6553 = vmatmul.mubr.msk.f32.gmra.mxu0 %vm2669_vm14, %v2626_v56 }
 0x245   :  { %v2627_v38 = vpop.trf.xlu0 }
 0x246   :  { %6555 = vmatprep.mubr.msk.f32.mxu0 %vm2669_vm14, %v2627_v38 }
 0x249   :  { %v2628_v14 = vpop.trf.xlu0 }
 0x24a   :  { %6556 = vmatmul.mubr.msk.f32.gmra.mxu0 %vm2669_vm14, %v2628_v14 }
 0x2f2   :  { %v9542_v50 = vpop.f32.mrf.mxu0 }
 0x2f3   :  { %v2873_v63 = vrot.slane %v9542_v50, %v11165_v47  ;;  %v2887_v20 = vrot.slane %v9542_v50, %v11167_v21  ;;  %v2901_v40 = vrot.slane %v9542_v50, %v11168_v41  ;;  %v2915_v39 = vrot.slane %v9542_v50, %v11170_v25 }
 0x2f4   :  { %v9544_v7 = vpop.f32.mrf.mxu0 }
 0x2f5   :  { %v2817_v24 = vrot.slane %v9544_v7, %v11165_v47  ;;  %v2831_v35 = vrot.slane %v9544_v7, %v11167_v21  ;;  %v2845_v31 = vrot.slane %v9544_v7, %v11168_v41  ;;  %v2859_v0 = vrot.slane %v9544_v7, %v11170_v25 }
 0x2fa   :  { %v9546_v34 = vpop.f32.mrf.mxu0 }
 0x2fb   :  { %v2985_v60 = vrot.slane %v9546_v34, %v11165_v47  ;;  %v2999_v18 = vrot.slane %v9546_v34, %v11167_v21  ;;  %v3013_v30 = vrot.slane %v9546_v34, %v11168_v41  ;;  %v3027_v11 = vrot.slane %v9546_v34, %v11170_v25 }
 0x2fc   :  { %v9548_v49 = vpop.f32.mrf.mxu0 }
 0x2fd   :  { %v2929_v9 = vrot.slane %v9548_v49, %v11165_v47  ;;  %v2943_v10 = vrot.slane %v9548_v49, %v11167_v21  ;;  %v2957_v62 = vrot.slane %v9548_v49, %v11168_v41  ;;  %v2971_v46 = vrot.slane %v9548_v49, %v11170_v25 }
 0x2fe   :  { %v2922_v3 = vrot.slane %v9548_v49, %v11164_v17 }
 0x302   :  { %v9550_v2 = vpop.f32.mrf.mxu0 }
 0x303   :  { %v3090_v43 = vrot.slane %v9550_v2, %v11164_v17  ;;  %v3097_v54 = vrot.slane %v9550_v2, %v11165_v47  ;;  %v3104_v51 = vrot.slane %v9550_v2, %v11166_v16  ;;  %v3111_v53 = vrot.slane %v9550_v2, %v11167_v21 }
 0x304   :  { %v9552_v13 = vpop.f32.mrf.mxu0  ;;  %v3118_v32 = vrot.slane %v9550_v2, %v11169_v23  ;;  %v3125_v12 = vrot.slane %v9550_v2, %v11168_v41  ;;  %v3132_v5 = vrot.slane %v9550_v2, %v11171_v52  ;;  %v3139_v28 = vrot.slane %v9550_v2, %v11170_v25 }
 0x305   :  { %v3041_v55 = vrot.slane %v9552_v13, %v11165_v47  ;;  %v3055_v44 = vrot.slane %v9552_v13, %v11167_v21  ;;  %v3069_v8 = vrot.slane %v9552_v13, %v11168_v41  ;;  %v3083_v33 = vrot.slane %v9552_v13, %v11170_v25 }
 0x306   :  { %v3034_v56 = vrot.slane %v9552_v13, %v11164_v17  ;;  %v3048_v38 = vrot.slane %v9552_v13, %v11166_v16  ;;  %v3062_v14 = vrot.slane %v9552_v13, %v11169_v23  ;;  %v2978_v2 = vrot.slane %v9546_v34, %v11164_v17 }
 0x30a   :  { %v6557_v36 = vpop.f32.mrf.mxu0 }
 0x30b   :  { %v3202_v6 = vrot.slane %v6557_v36, %v11164_v17  ;;  %v3209_v15 = vrot.slane %v6557_v36, %v11165_v47  ;;  %v3216_v19 = vrot.slane %v6557_v36, %v11166_v16  ;;  %v3223_v26 = vrot.slane %v6557_v36, %v11167_v21 }
 0x30c   :  { %v2790_v58 = vpop.f32.mrf.mxu0  ;;  %v3230_v29 = vrot.slane %v6557_v36, %v11169_v23  ;;  %v3237_v1 = vrot.slane %v6557_v36, %v11168_v41  ;;  %v3244_v57 = vrot.slane %v6557_v36, %v11171_v52  ;;  %v3251_v61 = vrot.slane %v6557_v36, %v11170_v25 }
 0x30d   :  { %3204 = vbcast.lane.b32.xlu1 %v3202_v6, 256  ;;  %v3146_v27 = vrot.slane %v2790_v58, %v11164_v17  ;;  %v3153_v45 = vrot.slane %v2790_v58, %v11165_v47  ;;  %v3160_v42 = vrot.slane %v2790_v58, %v11166_v16  ;;  %v3167_v37 = vrot.slane %v2790_v58, %v11167_v21 }
 0x30e   :  { %v3174_v4 = vrot.slane %v2790_v58, %v11169_v23  ;;  %v3181_v22 = vrot.slane %v2790_v58, %v11168_v41  ;;  %v3188_v59 = vrot.slane %v2790_v58, %v11171_v52  ;;  %v3195_v48 = vrot.slane %v2790_v58, %v11170_v25 }
 0x30f   :  { %3148 = vbcast.lane.b32.xlu0 %v3146_v27, 256  ;;  %v3076_v36 = vrot.slane %v9552_v13, %v11171_v52  ;;  %v2992_v6 = vrot.slane %v9546_v34, %v11166_v16  ;;  %v3006_v27 = vrot.slane %v9546_v34, %v11169_v23 }
 0x311   :  { %3211 = vbcast.lane.b32.xlu1 %v3209_v15, 256 }
 0x313   :  { %3043 = vbcast.lane.b32.xlu0 %v3041_v55, 256  ;;  %v3020_v55 = vrot.slane %v9546_v34, %v11171_v52  ;;  %v11173_v34 = vld [vmem:[#allocation104_spill] sm:$0xff] }
 0x315   :  { %3218 = vbcast.lane.b32.xlu1 %v3216_v19, 256  ;;  %v11172_v19 = vld [vmem:[#allocation93_spill] sm:$0xff] }
 0x317   :  { %3057 = vbcast.lane.b32.xlu0 %v3055_v44, 256 }
 0x319   :  { %3225 = vbcast.lane.b32.xlu1 %v3223_v26, 256 }
 0x31b   :  { %3071 = vbcast.lane.b32.xlu0 %v3069_v8, 256 }
 0x31d   :  { %3232 = vbcast.lane.b32.xlu1 %v3230_v29, 256  ;;  %v2936_v29 = vrot.slane %v9548_v49, %v11166_v16 }
 0x31f   :  { %3085 = vbcast.lane.b32.xlu0 %v3083_v33, 256 }
 0x321   :  { %3239 = vbcast.lane.b32.xlu1 %v3237_v1, 256  ;;  %v2950_v1 = vrot.slane %v9548_v49, %v11169_v23 }
 0x323   :  { %2987 = vbcast.lane.b32.xlu0 %v2985_v60, 256 }
 0x325   :  { %3246 = vbcast.lane.b32.xlu1 %v3244_v57, 256 }
 0x327   :  { %3001 = vbcast.lane.b32.xlu0 %v2999_v18, 256 }
 0x329   :  { %3253 = vbcast.lane.b32.xlu1 %v3251_v61, 256  ;;  %v2964_v61 = vrot.slane %v9548_v49, %v11171_v52 }
 0x32b   :  { %3015 = vbcast.lane.b32.xlu0 %v3013_v30, 256 }
 0x32d   :  { %3155 = vbcast.lane.b32.xlu1 %v3153_v45, 256 }
 0x32f   :  { %3029 = vbcast.lane.b32.xlu0 %v3027_v11, 256 }
 0x331   :  { %3162 = vbcast.lane.b32.xlu1 %v3160_v42, 256  ;;  %v2866_v42 = vrot.slane %v9542_v50, %v11164_v17 }
 0x333   :  { %2931 = vbcast.lane.b32.xlu0 %v2929_v9, 256  ;;  %v11174_v9 = vld [vmem:[#allocation83_spill] sm:$0xff] }
 0x335   :  { %3169 = vbcast.lane.b32.xlu1 %v3167_v37, 256 }
 0x337   :  { %2945 = vbcast.lane.b32.xlu0 %v2943_v10, 256  ;;  %v11175_v10 = vld [vmem:[#allocation103_spill] sm:$0xff] }
 0x339   :  { %3176 = vbcast.lane.b32.xlu1 %v3174_v4, 256 }
 0x33b   :  { %2959 = vbcast.lane.b32.xlu0 %v2957_v62, 256 }
 0x33d   :  { %3183 = vbcast.lane.b32.xlu1 %v3181_v22, 256 }
 0x33f   :  { %2973 = vbcast.lane.b32.xlu0 %v2971_v46, 256  ;;  %v2880_v46 = vrot.slane %v9542_v50, %v11166_v16 }
 0x341   :  { %3190 = vbcast.lane.b32.xlu1 %v3188_v59, 256 }
 0x343   :  { %2875 = vbcast.lane.b32.xlu0 %v2873_v63, 256  ;;  %v2894_v63 = vrot.slane %v9542_v50, %v11169_v23 }
 0x345   :  { %3197 = vbcast.lane.b32.xlu1 %v3195_v48, 256 }
 0x347   :  { %2889 = vbcast.lane.b32.xlu0 %v2887_v20, 256  ;;  %v11176_v20 = vld [vmem:[#allocation167_spill] sm:$0xff] }
 0x349   :  { %3092 = vbcast.lane.b32.xlu1 %v3090_v43, 256 }
 0x34b   :  { %2903 = vbcast.lane.b32.xlu0 %v2901_v40, 256 }
 0x34d   :  { %3099 = vbcast.lane.b32.xlu1 %v3097_v54, 256  ;;  %v2908_v54 = vrot.slane %v9542_v50, %v11171_v52 }
 0x34f   :  { %2917 = vbcast.lane.b32.xlu0 %v2915_v39, 256  ;;  %v11177_v39 = vld [vmem:[#allocation87_spill] sm:$0xff] }
 0x351   :  { %3106 = vbcast.lane.b32.xlu1 %v3104_v51, 256 }
 0x353   :  { %2819 = vbcast.lane.b32.xlu0 %v2817_v24, 256 }
 0x355   :  { %3113 = vbcast.lane.b32.xlu1 %v3111_v53, 256 }
 0x357   :  { %2833 = vbcast.lane.b32.xlu0 %v2831_v35, 256  ;;  %v11178_v35 = vld [vmem:[#allocation98_spill] sm:$0xff] }
 0x359   :  { %3120 = vbcast.lane.b32.xlu1 %v3118_v32, 256 }
 0x35b   :  { %2847 = vbcast.lane.b32.xlu0 %v2845_v31, 256 }
 0x35d   :  { %3127 = vbcast.lane.b32.xlu1 %v3125_v12, 256  ;;  %v2810_v12 = vrot.slane %v9544_v7, %v11164_v17 }
 0x35f   :  { %2861 = vbcast.lane.b32.xlu0 %v2859_v0, 256 }
 0x361   :  { %3134 = vbcast.lane.b32.xlu1 %v3132_v5, 256 }
 0x365   :  { %3141 = vbcast.lane.b32.xlu1 %v3139_v28, 256  ;;  %v11179_v28 = vld [vmem:[#allocation99_spill] sm:$0xff] }
 0x369   :  { %3036 = vbcast.lane.b32.xlu1 %v3034_v56, 256 }
 0x36d   :  { %3050 = vbcast.lane.b32.xlu1 %v3048_v38, 256  ;;  %v2824_v38 = vrot.slane %v9544_v7, %v11166_v16 }
 0x371   :  { %3064 = vbcast.lane.b32.xlu1 %v3062_v14, 256  ;;  %v11180_v14 = vld [vmem:[#allocation94_spill] sm:$0xff] }
 0x375   :  { %3078 = vbcast.lane.b32.xlu1 %v3076_v36, 256 }
 0x379   :  { %2980 = vbcast.lane.b32.xlu1 %v2978_v2, 256 }
 0x37d   :  { %2994 = vbcast.lane.b32.xlu1 %v2992_v6, 256 }
 0x37f   :  { %v3205_v58 = vpop.permute.xlu1 %3204 }
 0x380   :  { %v3375_v43 = vsub.f32 %v11176_v20, %v3205_v58 }
 0x381   :  { %3008 = vbcast.lane.b32.xlu1 %v3006_v27, 256  ;;  %v3149_v45 = vpop.permute.xlu0 %3148 }
 0x382   :  { %v3367_v37 = vsub.f32 %v11174_v9, %v3149_v45  ;;  %v3495_v53 = vmul.f32 1.442695, %v3375_v43  ;;  %v11185_v9 = vld [vmem:[#allocation89_spill] sm:$0xff] }
 0x383   :  { %v3212_v15 = vpop.permute.xlu1 %3211 }
 0x384   :  { %v3376_v13 = vsub.f32 %v11172_v19, %v3212_v15  ;;  %v3479_v49 = vmul.f32 1.442695, %v3367_v37  ;;  %v11181_v15 = vld [vmem:[#allocation170_spill] sm:$0xff] }
 0x385   :  { %3022 = vbcast.lane.b32.xlu1 %v3020_v55, 256  ;;  %v9671_v6 = vpop.permute.xlu0 %3043 }
 0x386   :  { %v3497_v44 = vmul.f32 1.442695, %v3376_v13  ;;  %v2838_v13 = vrot.slane %v9544_v7, %v11169_v23 }
 0x387   :  { %v3219_v26 = vpop.permute.xlu1 %3218 }
 0x388   :  { %6617 = vpow2.f32 %v3497_v44  ;;  %v3377_v32 = vsub.f32 %v11178_v35, %v3219_v26  ;;  %v11182_v26 = vld [vmem:[#allocation105_spill] sm:$0xff]  ;;  %v11189_v35 = vld [vmem:[#allocation79_spill] sm:$0xff] }
 0x389   :  { %2924 = vbcast.lane.b32.xlu1 %v2922_v3, 256 }
 0x38a   :  { %v3499_v5 = vmul.f32 1.442695, %v3377_v32 }
 0x38b   :  { %v3226_v8 = vpop.permute.xlu1 %3225 }
 0x38c   :  { %v3378_v56 = vsub.f32 %v11179_v28, %v3226_v8  ;;  %v11190_v28 = vld [vmem:[#allocation162_spill] sm:$0xff] }
 0x38d   :  { %2938 = vbcast.lane.b32.xlu1 %v2936_v29, 256  ;;  %v2852_v29 = vrot.slane %v9544_v7, %v11171_v52 }
 0x38e   :  { %v3501_v27 = vmul.f32 1.442695, %v3378_v56 }
 0x38f   :  { %v3233_v33 = vpop.permute.xlu1 %3232 }
 0x390   :  { %v3379_v60 = vsub.f32 %v11173_v34, %v3233_v33  ;;  %v9679_v33 = vpop.permute.xlu0 %3057 }
 0x391   :  { %2952 = vbcast.lane.b32.xlu1 %v2950_v1, 256  ;;  %v11183_v1 = vld [vmem:[#allocation169_spill] sm:$0xff] }
 0x392   :  { %v3503_v57 = vmul.f32 1.442695, %v3379_v60 }
 0x393   :  { %v3240_v18 = vpop.permute.xlu1 %3239 }
 0x394   :  { %6619 = vpow2.f32 %v3503_v57  ;;  %v3380_v55 = vsub.f32 %v11181_v15, %v3240_v18 }
 0x395   :  { %v6618_v30 = vpop.eup %6617  ;;  %2966 = vbcast.lane.b32.xlu1 %v2964_v61, 256  ;;  %v11184_v61 = vld [vmem:[#allocation82_spill] sm:$0xff] }
 0x396   :  { %3747 = vperm.xlu0 %6608, %v6618_v30   ;;  %v3505_v44 = vmul.f32 1.442695, %v3380_v55  ;;  %v11192_v55 = vld [vmem:[#allocation85_spill] sm:$0xff] }
 0x397   :  { %v3247_v11 = vpop.permute.xlu1 %3246 }
 0x398   :  { %v3381_v4 = vsub.f32 %v11175_v10, %v3247_v11 }
 0x399   :  { %2868 = vbcast.lane.b32.xlu1 %v2866_v42, 256  ;;  %v9683_v42 = vpop.permute.xlu0 %3071 }
 0x39a   :  { %v3507_v62 = vmul.f32 1.442695, %v3381_v4 }
 0x39b   :  { %v3254_v22 = vpop.permute.xlu1 %3253 }
 0x39c   :  { %6621 = vpow2.f32 %v3507_v62  ;;  %v3382_v3 = vsub.f32 %v11182_v26, %v3254_v22  ;;  %v11186_v62 = vld [vmem:[#allocation163_spill] sm:$0xff] }
 0x39d   :  { %2882 = vbcast.lane.b32.xlu1 %v2880_v46, 256  ;;  %6623 = vpow2.f32 %v3479_v49 }
 0x39e   :  { %v3509_v18 = vmul.f32 1.442695, %v3382_v3 }
 0x39f   :  { %v3156_v59 = vpop.permute.xlu1 %3155 }
 0x3a0   :  { %v3368_v30 = vsub.f32 %v11184_v61, %v3156_v59  ;;  %v11194_v61 = vld [vmem:[#allocation97_spill] sm:$0xff] }
 0x3a1   :  { %v6620_v48 = vpop.eup %6619  ;;  %2896 = vbcast.lane.b32.xlu1 %v2894_v63, 256  ;;  %v11187_v63 = vld [vmem:[#allocation102_spill] sm:$0xff] }
 0x3a2   :  { %3756 = vperm.xlu0 %6608, %v6620_v48   ;;  %v3481_v7 = vmul.f32 1.442695, %v3368_v30 }
 0x3a3   :  { %v3163_v40 = vpop.permute.xlu1 %3162 }
 0x3a4   :  { %v3369_v51 = vsub.f32 %v11177_v39, %v3163_v40  ;;  %v9688_v40 = vpop.permute.xlu0 %3085  ;;  %v11188_v39 = vld [vmem:[#allocation171_spill] sm:$0xff] }
 0x3a5   :  { %2910 = vbcast.lane.b32.xlu1 %v2908_v54, 256 }
 0x3a6   :  { %v3483_v24 = vmul.f32 1.442695, %v3369_v51 }
 0x3a7   :  { %v3170_v31 = vpop.permute.xlu1 %3169 }
 0x3a8   :  { %6625 = vpow2.f32 %v3483_v24  ;;  %v3370_v37 = vsub.f32 %v11185_v9, %v3170_v31 }
 0x3a9   :  { %v6622_v0 = vpop.eup %6621  ;;  %2812 = vbcast.lane.b32.xlu1 %v2810_v12, 256  ;;  %6627 = vpow2.f32 %v3495_v53  ;;  %v9692_v12 = vpop.permute.xlu0 %2987 }
 0x3aa   :  { %3762 = vperm.xlu0 %6608, %v6622_v0   ;;  %v6624_v2 = vpop.eup %6623  ;;  %6629 = vpow2.f32 %v3499_v5  ;;  %v3485_v59 = vmul.f32 1.442695, %v3370_v37 }
 0x3ab   :  { %v3177_v50 = vpop.permute.xlu1 %3176 }
 0x3ac   :  { %v3371_v36 = vsub.f32 %v11180_v14, %v3177_v50 }
 0x3ad   :  { %2826 = vbcast.lane.b32.xlu1 %v2824_v38, 256  ;;  %v9696_v15 = vpop.permute.xlu0 %3001 }
 0x3ae   :  { %v3487_v58 = vmul.f32 1.442695, %v3371_v36  ;;  %3720 = vperm.xlu0 %6608, %v6624_v2   ;;  %v11191_v36 = vld [vmem:[#allocation80_spill] sm:$0xff] }
 0x3af   :  { %v3184_v19 = vpop.permute.xlu1 %3183 }
 0x3b0   :  { %6631 = vpow2.f32 %v3487_v58  ;;  %v3372_v48 = vsub.f32 %v11187_v63, %v3184_v19 }
 0x3b1   :  { %2840 = vbcast.lane.b32.xlu1 %v2838_v13, 256  ;;  %6633 = vpow2.f32 %v3501_v27 }
 0x3b2   :  { %6635 = vpow2.f32 %v3505_v44  ;;  %v3489_v54 = vmul.f32 1.442695, %v3372_v48 }
 0x3b3   :  { %v3191_v8 = vpop.permute.xlu1 %3190 }
 0x3b4   :  { %v3373_v34 = vsub.f32 %v11183_v1, %v3191_v8 }
 0x3b5   :  { %v6626_v60 = vpop.eup %6625  ;;  %2854 = vbcast.lane.b32.xlu1 %v2852_v29, 256  ;;  %v11193_v29 = vld [vmem:[#allocation90_spill] sm:$0xff] }
 0x3b6   :  { %v3491_v57 = vmul.f32 1.442695, %v3373_v34  ;;  %3726 = vperm.xlu0 %6608, %v6626_v60   ;;  %v6628_v11 = vpop.eup %6627  ;;  %v9700_v34 = vpop.permute.xlu0 %3015 }
 0x3b7   :  { %v3198_v45 = vpop.permute.xlu1 %3197  ;;  %v6630_v4 = vpop.eup %6629 }
 0x3b8   :  { %6637 = vpow2.f32 %v3491_v57  ;;  %v3374_v51 = vsub.f32 %v11188_v39, %v3198_v45 }
 0x3b9   :  { %3744 = vperm.xlu1 %6607, %v6628_v11   ;;  %6639 = vpow2.f32 %v3509_v18 }
 0x3ba   :  { %6641 = vpow2.f32 %v3481_v7  ;;  %v3493_v5 = vmul.f32 1.442695, %v3374_v51  ;;  %v11195_v7 = vld [vmem:[#allocation155_spill] sm:$0xff] }
 0x3bb   :  { %v3093_v10 = vpop.permute.xlu1 %3092  ;;  %v3352_v9 = vsub.f32 %v11195_v7, %v9671_v6 }
 0x3bc   :  { %v3359_v22 = vsub.f32 %v11186_v62, %v3093_v10  ;;  %v11196_v62 = vld [vmem:[#allocation101_spill] sm:$0xff] }
 0x3bd   :  { %v6632_v46 = vpop.eup %6631  ;;  %3750 = vperm.xlu1 %6607, %v6630_v4   ;;  %v9705_v4 = vpop.permute.xlu0 %3029 }
 0x3be   :  { %v3463_v49 = vmul.f32 1.442695, %v3359_v22  ;;  %3732 = vperm.xlu0 %6608, %v6632_v46   ;;  %v6634_v43 = vpop.eup %6633 }
 0x3bf   :  { %v3100_v20 = vpop.permute.xlu1 %3099  ;;  %v6636_v53 = vpop.eup %6635 }
 0x3c0   :  { %6643 = vpow2.f32 %v3463_v49  ;;  %v3360_v56 = vsub.f32 %v11190_v28, %v3100_v20  ;;  %v3449_v49 = vmul.f32 1.442695, %v3352_v9  ;;  %v11207_v9 = vld [vmem:[#allocation161_spill] sm:$0xff] }
 0x3c1   :  { %3753 = vperm.xlu1 %6607, %v6634_v43   ;;  %6645 = vpow2.f32 %v3485_v59  ;;  %v11197_v59 = vld [vmem:[#allocation160_spill] sm:$0xff]  ;;  %v9711_v39 = vpop.permute.xlu0 %2931 }
 0x3c2   :  { %6647 = vpow2.f32 %v3489_v54  ;;  %v3465_v14 = vmul.f32 1.442695, %v3360_v56  ;;  %v3354_v63 = vsub.f32 %v11197_v59, %v9679_v33  ;;  %v11198_v43 = vld [vmem:[#allocation156_spill] sm:$0xff]  ;;  %v11200_v33 = vld [vmem:[#allocation158_spill] sm:$0xff] }
 0x3c3   :  { %v3107_v24 = vpop.permute.xlu1 %3106  ;;  %v11201_v56 = vld [vmem:[#allocation88_spill] sm:$0xff] }
 0x3c4   :  { %v3361_v32 = vsub.f32 %v11189_v35, %v3107_v24  ;;  %v3453_v24 = vmul.f32 1.442695, %v3354_v63 }
 0x3c5   :  { %v6638_v31 = vpop.eup %6637  ;;  %3759 = vperm.xlu1 %6607, %v6636_v53   ;;  %v11199_v53 = vld [vmem:[#allocation81_spill] sm:$0xff] }
 0x3c6   :  { %v3467_v0 = vmul.f32 1.442695, %v3361_v32  ;;  %3738 = vperm.xlu0 %6608, %v6638_v31   ;;  %v6640_v38 = vpop.eup %6639  ;;  %v3356_v35 = vsub.f32 %v11199_v53, %v9683_v42 }
 0x3c7   :  { %v3114_v50 = vpop.permute.xlu1 %3113  ;;  %v6642_v27 = vpop.eup %6641 }
 0x3c8   :  { %6649 = vpow2.f32 %v3467_v0  ;;  %v3362_v2 = vsub.f32 %v11191_v36, %v3114_v50  ;;  %v3457_v28 = vmul.f32 1.442695, %v3356_v35  ;;  %v3358_v50 = vsub.f32 %v11201_v56, %v9688_v40  ;;  %v9718_v36 = vpop.permute.xlu0 %2945 }
 0x3c9   :  { %3765 = vperm.xlu1 %6607, %v6640_v38   ;;  %6651 = vpow2.f32 %v3493_v5 }
 0x3ca   :  { %6653 = vpow2.f32 %v3465_v14  ;;  %v3469_v26 = vmul.f32 1.442695, %v3362_v2  ;;  %v11202_v2 = vld [vmem:[#allocation164_spill] sm:$0xff] }
 0x3cb   :  { %v3121_v58 = vpop.permute.xlu1 %3120 }
 0x3cc   :  { %v3363_v19 = vsub.f32 %v11192_v55, %v3121_v58  ;;  %v3461_v55 = vmul.f32 1.442695, %v3358_v50 }
 0x3cd   :  { %v6644_v13 = vpop.eup %6643  ;;  %3723 = vperm.xlu1 %6607, %v6642_v27  }
 0x3ce   :  { %v3471_v44 = vmul.f32 1.442695, %v3363_v19  ;;  %3696 = vperm.xlu0 %6608, %v6644_v13   ;;  %v6646_v8 = vpop.eup %6645  ;;  %v11203_v19 = vld [vmem:[#allocation148_spill] sm:$0xff] }
 0x3cf   :  { %v3128_v3 = vpop.permute.xlu1 %3127  ;;  %v6648_v18 = vpop.eup %6647  ;;  %v3344_v13 = vsub.f32 %v11203_v19, %v9692_v12 }
 0x3d0   :  { %6655 = vpow2.f32 %v3471_v44  ;;  %v3364_v1 = vsub.f32 %v11193_v29, %v3128_v3 }
 0x3d1   :  { %3729 = vperm.xlu1 %6607, %v6646_v8   ;;  %6657 = vpow2.f32 %v3469_v26  ;;  %v11204_v26 = vld [vmem:[#allocation86_spill] sm:$0xff]  ;;  %v9724_v8 = vpop.permute.xlu0 %2959 }
 0x3d2   :  { %v3473_v60 = vmul.f32 1.442695, %v3364_v1  ;;  %v3433_v1 = vmul.f32 1.442695, %v3344_v13 }
 0x3d3   :  { %v3135_v57 = vpop.permute.xlu1 %3134 }
 0x3d4   :  { %v3365_v30 = vsub.f32 %v11194_v61, %v3135_v57  ;;  %6659 = vpow2.f32 %v3473_v60  ;;  %v11205_v60 = vld [vmem:[#allocation153_spill] sm:$0xff] }
 0x3d5   :  { %v6650_v45 = vpop.eup %6649  ;;  %3735 = vperm.xlu1 %6607, %v6648_v18   ;;  %v3346_v57 = vsub.f32 %v11205_v60, %v9696_v15  ;;  %v11208_v15 = vld [vmem:[#allocation151_spill] sm:$0xff] }
 0x3d6   :  { %v3475_v11 = vmul.f32 1.442695, %v3365_v30  ;;  %3702 = vperm.xlu0 %6608, %v6650_v45   ;;  %v6652_v10 = vpop.eup %6651  ;;  %v11206_v30 = vld [vmem:[#allocation149_spill] sm:$0xff] }
 0x3d7   :  { %v3142_v37 = vpop.permute.xlu1 %3141  ;;  %v6654_v20 = vpop.eup %6653  ;;  %v3437_v7 = vmul.f32 1.442695, %v3346_v57 }
 0x3d8   :  { %6661 = vpow2.f32 %v3475_v11  ;;  %v3366_v22 = vsub.f32 %v11196_v62, %v3142_v37  ;;  %v3348_v37 = vsub.f32 %v11207_v9, %v9700_v34  ;;  %v11210_v34 = vld [vmem:[#allocation157_spill] sm:$0xff] }
 0x3d9   :  { %3741 = vperm.xlu1 %6607, %v6652_v10  }
 0x3da   :  { %v3477_v46 = vmul.f32 1.442695, %v3366_v22  ;;  %v9731_v22 = vpop.permute.xlu0 %2973  ;;  %v3441_v63 = vmul.f32 1.442695, %v3348_v37 }
 0x3db   :  { %v3037_v48 = vpop.permute.xlu1 %3036 }
 0x3dc   :  { %6663 = vpow2.f32 %v3477_v46  ;;  %v3351_v54 = vsub.f32 %v11198_v43, %v3037_v48  ;;  %v11209_v48 = vld [vmem:[#allocation78_spill] sm:$0xff] }
 0x3dd   :  { %v6656_v6 = vpop.eup %6655  ;;  %3699 = vperm.xlu1 %6607, %v6654_v20   ;;  %6665 = vpow2.f32 %v3449_v49  ;;  %v3350_v20 = vsub.f32 %v11209_v48, %v9705_v4 }
 0x3de   :  { %v3447_v51 = vmul.f32 1.442695, %v3351_v54  ;;  %3708 = vperm.xlu0 %6608, %v6656_v6   ;;  %v6658_v31 = vpop.eup %6657  ;;  %v9737_v35 = vpop.permute.xlu0 %2875 }
 0x3df   :  { %v3051_v32 = vpop.permute.xlu1 %3050 }
 0x3e0   :  { %6667 = vpow2.f32 %v3447_v51  ;;  %v3353_v0 = vsub.f32 %v11200_v33, %v3051_v32  ;;  %v6776_v51 = vmov 1966171168   ;;  %v11211_v33 = vld [vmem:[#allocation142_spill] sm:$0xff] }
 0x3e1   :  { %3705 = vperm.xlu1 %6607, %v6658_v31   ;;  %6669 = vpow2.f32 %v3453_v24  ;;  %v6660_v14 = vpop.eup %6659  ;;  %v4179_v24 = vunpack.c.l.s4 %v6776_v51  ;;  %v3445_v31 = vmul.f32 1.442695, %v3350_v20 }
 0x3e2   :  { %v3451_v5 = vmul.f32 1.442695, %v3353_v0  ;;  %v3336_v0 = vsub.f32 %v11211_v33, %v9711_v39  ;;  %v9744_v19 = vpop.permute.xlu0 %2889  ;;  %v11214_v39 = vld [vmem:[#allocation143_spill] sm:$0xff] }
 0x3e3   :  { %v3065_v38 = vpop.permute.xlu1 %3064  ;;  %v4180_v50 = vunpack.c.0.s8 %v4179_v24 }
 0x3e4   :  { %6671 = vpow2.f32 %v3451_v5  ;;  %v3355_v58 = vsub.f32 %v11202_v2, %v3065_v38  ;;  %v3417_v2 = vmul.f32 1.442695, %v3336_v0 }
 0x3e5   :  { %v6662_v42 = vpop.eup %6661  ;;  %3711 = vperm.xlu1 %6607, %v6660_v14   ;;  %6673 = vpow2.f32 %v3457_v28  ;;  %v11212_v28 = vld [vmem:[#allocation165_spill] sm:$0xff] }
 0x3e6   :  { %v3455_v27 = vmul.f32 1.442695, %v3355_v58  ;;  %3714 = vperm.xlu0 %6608, %v6662_v42   ;;  %v11213_v58 = vld [vmem:[#allocation150_spill] sm:$0xff] }
 0x3e7   :  { %v3079_v44 = vpop.permute.xlu1 %3078  ;;  %v3338_v42 = vsub.f32 %v11213_v58, %v9718_v36 }
 0x3e8   :  { %6675 = vpow2.f32 %v3455_v27  ;;  %v3357_v40 = vsub.f32 %v11204_v26, %v3079_v44  ;;  %v11215_v44 = vld [vmem:[#allocation69_spill] sm:$0xff] }
 0x3e9   :  { %v6664_v3 = vpop.eup %6663  ;;  %6677 = vpow2.f32 %v3461_v55  ;;  %v9748_v26 = vsub.s32 %v4180_v50, %v11215_v44  ;;  %v3421_v36 = vmul.f32 1.442695, %v3338_v42 }
 0x3ea   :  { %v3459_v29 = vmul.f32 1.442695, %v3357_v40  ;;  %3717 = vperm.xlu1 %6607, %v6664_v3   ;;  %v6666_v61 = vpop.eup %6665  ;;  %v159_v3 = vld [vmem:[%s10691_s2 + $0x38] sm:$0xff] }
 0x3eb   :  { %v2981_v18 = vpop.permute.xlu1 %2980 }
 0x3ec   :  { %6679 = vpow2.f32 %v3459_v29  ;;  %v3343_v45 = vsub.f32 %v11206_v30, %v2981_v18 }
 0x3ed   :  { %v6668_v12 = vpop.eup %6667  ;;  %6681 = vpow2.f32 %v3433_v1  ;;  %v11216_v1 = vld [vmem:[#allocation154_spill] sm:$0xff] }
 0x3ee   :  { %v3431_v11 = vmul.f32 1.442695, %v3343_v45  ;;  %3672 = vperm.xlu0 %6608, %v6668_v12   ;;  %3675 = vperm.xlu1 %6607, %v6666_v61   ;;  %v6670_v62 = vpop.eup %6669  ;;  %v3340_v60 = vsub.f32 %v11216_v1, %v9724_v8  ;;  %v11217_v61 = vld [vmem:[#allocation144_spill] sm:$0xff]  ;;  %v9757_v45 = vrot.slane %v159_v3, %v9748_v26  ;;  %v4520_v12 = vcombine.high %v159_v3, %v159_v3 }
 0x3ef   :  { %v2995_v10 = vpop.permute.xlu1 %2994 }
 0x3f0   :  { %6683 = vpow2.f32 %v3431_v11  ;;  %v3345_v46 = vsub.f32 %v11208_v15, %v2995_v10  ;;  %v3425_v37 = vmul.f32 1.442695, %v3340_v60  ;;  %v11218_v10 = vld [vmem:[#allocation159_spill] sm:$0xff] }
 0x3f1   :  { %v6672_v49 = vpop.eup %6671  ;;  %6685 = vpow2.f32 %v3437_v7  ;;  %v9759_v7 = vpop.permute.xlu0 %2903  ;;  %v3342_v8 = vsub.f32 %v11218_v10, %v9731_v22 }
 0x3f2   :  { %v3435_v59 = vmul.f32 1.442695, %v3345_v46  ;;  %3678 = vperm.xlu0 %6608, %v6672_v49   ;;  %3681 = vperm.xlu1 %6607, %v6670_v62   ;;  %v6674_v54 = vpop.eup %6673  ;;  %v11219_v46 = vld [vmem:[#allocation152_spill] sm:$0xff] }
 0x3f3   :  { %v3009_v43 = vpop.permute.xlu1 %3008 }
 0x3f4   :  { %6687 = vpow2.f32 %v3435_v59  ;;  %v3347_v6 = vsub.f32 %v11210_v34, %v3009_v43  ;;  %v4535_v59 = vcombine.high %v9757_v45, %v9757_v45  ;;  %v3429_v43 = vmul.f32 1.442695, %v3342_v8 }
 0x3f5   :  { %v6676_v53 = vpop.eup %6675  ;;  %6689 = vpow2.f32 %v3441_v63  ;;  %v9767_v63 = vrot.slane %v4520_v12, %v9748_v26  ;;  %v9774_v24 = vpop.permute.xlu0 %2917 }
 0x3f6   :  { %v3439_v32 = vmul.f32 1.442695, %v3347_v6  ;;  %3684 = vperm.xlu0 %6608, %v6676_v53   ;;  %3687 = vperm.xlu1 %6607, %v6674_v54   ;;  %v6678_v4 = vpop.eup %6677  ;;  %v11220_v54 = vld [vmem:[#allocation134_spill] sm:$0xff]  ;;  %v158_v6 = vld [vmem:[%s10691_s2 + $0x30] sm:$0xff] }
 0x3f7   :  { %v3023_v5 = vpop.permute.xlu1 %3022  ;;  %v3328_v22 = vsub.f32 %v11220_v54, %v9737_v35  ;;  %v11221_v53 = vld [vmem:[#allocation77_spill] sm:$0xff]  ;;  %v4550_v33 = vrot.slane %v9767_v63, %v9748_v26  ;;  %v9783_v35 = vrot.slane %v158_v6, %v9748_v26 }
 0x3f8   :  { %6691 = vpow2.f32 %v3439_v32  ;;  %v3349_v56 = vsub.f32 %v11212_v28, %v3023_v5  ;;  %v11222_v28 = vld [vmem:[#allocation138_spill] sm:$0xff] }
 0x3f9   :  { %v6680_v38 = vpop.eup %6679  ;;  %6693 = vpow2.f32 %v3445_v31  ;;  %v9778_v31 = vrot.slane %v4535_v59, %v9748_v26  ;;  %v4693_v42 = vadd.f32 1.0, %v4550_v33  ;;  %v4494_v3 = vrot.slane %v9783_v35, %v9748_v26 }
 0x3fa   :  { %v3443_v14 = vmul.f32 1.442695, %v3349_v56  ;;  %3690 = vperm.xlu0 %6608, %v6680_v38   ;;  %3693 = vperm.xlu1 %6607, %v6678_v4   ;;  %v6682_v55 = vpop.eup %6681  ;;  %v3401_v4 = vmul.f32 1.442695, %v3328_v22  ;;  %v3330_v56 = vsub.f32 %v11222_v28, %v9744_v19 }
 0x3fb   :  { %v2925_v27 = vpop.permute.xlu1 %2924  ;;  %v4690_v58 = vadd.f32 1.0, %v9778_v31 }
 0x3fc   :  { %6695 = vpow2.f32 %v3443_v14  ;;  %v3335_v13 = vsub.f32 %v11214_v39, %v2925_v27  ;;  %v11223_v14 = vld [vmem:[#allocation135_spill] sm:$0xff]  ;;  %v4471_v39 = vcombine.high %v158_v6, %v158_v6  ;;  %v3405_v19 = vmul.f32 1.442695, %v3330_v56 }
 0x3fd   :  { %v6684_v40 = vpop.eup %6683  ;;  %6697 = vpow2.f32 %v3417_v2 }
 0x3fe   :  { %v3415_v29 = vmul.f32 1.442695, %v3335_v13  ;;  %3648 = vperm.xlu0 %6608, %v6684_v40   ;;  %3651 = vperm.xlu1 %6607, %v6682_v55   ;;  %v6686_v18 = vpop.eup %6685  ;;  %v4566_v55 = vcombine.high %v4550_v33, %v4550_v33  ;;  %v9789_v13 = vpop.permute.xlu0 %2819  ;;  %v9801_v10 = vrot.slane %v4471_v39, %v9748_v26  ;;  %v4567_v39 = vcombine.high %v9778_v31, %v9778_v31 }
 0x3ff   :  { %v2939_v57 = vpop.permute.xlu1 %2938 }
 0x400   :  { %6699 = vpow2.f32 %v3415_v29  ;;  %v3337_v30 = vsub.f32 %v11217_v61, %v2939_v57  ;;  %v11224_v29 = vld [vmem:[#allocation139_spill] sm:$0xff]  ;;  %v11225_v57 = vld [vmem:[#allocation137_spill] sm:$0xff]  ;;  %v4992_v61 = vrot.slane %v4690_v58, %v11164_v17 }
 0x401   :  { %v6688_v11 = vpop.eup %6687  ;;  %6701 = vpow2.f32 %v3421_v36  ;;  %v3332_v36 = vsub.f32 %v11224_v29, %v9759_v7  ;;  %v6777_v7 = vmov 1983009808  }
 0x402   :  { %v3419_v9 = vmul.f32 1.442695, %v3337_v30  ;;  %3654 = vperm.xlu0 %6608, %v6688_v11   ;;  %3657 = vperm.xlu1 %6607, %v6686_v18   ;;  %v6690_v15 = vpop.eup %6689  ;;  %v5004_v30 = vrot.slane %v4693_v42, %v11164_v17  ;;  %v4695_v11 = vadd.f32 1.0, %v4566_v55  ;;  %v2834_v54 = vpop.permute.xlu0 %2833 }
 0x403   :  { %v2953_v62 = vpop.permute.xlu1 %2952 }
 0x404   :  { %6703 = vpow2.f32 %v3419_v9  ;;  %v3339_v49 = vsub.f32 %v11219_v46, %v2953_v62  ;;  %v4516_v9 = vcombine.high %v4494_v3, %v4494_v3  ;;  %v5275_v62 = vunpack.c.l.s4 %v6777_v7  ;;  %v157_v7 = vld [vmem:[%s10691_s2 + $0x28] sm:$0xff] }
 0x405   :  { %v6692_v48 = vpop.eup %6691  ;;  %6705 = vpow2.f32 %v3425_v37  ;;  %v4543_v37 = vrot.slane %v9757_v45, %v9748_v26  ;;  %v3409_v46 = vmul.f32 1.442695, %v3332_v36  ;;  %v11227_v45 = vld [vmem:[#allocation55_spill] sm:$0xff] }
 0x406   :  { %v3423_v20 = vmul.f32 1.442695, %v3339_v49  ;;  %3660 = vperm.xlu0 %6608, %v6692_v48   ;;  %3663 = vperm.xlu1 %6607, %v6690_v15   ;;  %v6694_v51 = vpop.eup %6693  ;;  %v4681_v15 = vadd.f32 1.0, %v4494_v3  ;;  %v11226_v49 = vld [vmem:[#allocation146_spill] sm:$0xff]  ;;  %v9806_v22 = vmul.f32 %v4992_v61, %v11227_v45  ;;  %v5276_v28 = vunpack.c.0.s8 %v5275_v62  ;;  %v11233_v61 = vld [vmem:[#allocation48_spill] sm:$0xff] }
 0x407   :  { %v2967_v34 = vpop.permute.xlu1 %2966  ;;  %v3334_v59 = vsub.f32 %v11226_v49, %v9774_v24  ;;  %v4683_v24 = vadd.f32 1.0, %v4516_v9  ;;  %v4692_v49 = vadd.f32 1.0, %v4567_v39 }
 0x408   :  { %6707 = vpow2.f32 %v3423_v20  ;;  %v3341_v32 = vsub.f32 %v11221_v53, %v2967_v34  ;;  %v4565_v20 = vcombine.high %v4543_v37, %v4543_v37  ;;  %v11228_v34 = vld [vmem:[#allocation140_spill] sm:$0xff]  ;;  %v4956_v56 = vrot.slane %v4681_v15, %v11164_v17  ;;  %v11235_v15 = vld [vmem:[#allocation123_spill] sm:$0xff] }
 0x409   :  { %v6696_v0 = vpop.eup %6695  ;;  %6709 = vpow2.f32 %v3429_v43  ;;  %v4964_v36 = vrot.slane %v4683_v24, %v11164_v17 }
 0x40a   :  { %v3427_v5 = vmul.f32 1.442695, %v3341_v32  ;;  %3666 = vperm.xlu0 %6608, %v6696_v0   ;;  %3669 = vperm.xlu1 %6607, %v6694_v51   ;;  %v6698_v38 = vpop.eup %6697  ;;  %v4536_v51 = vcombine.high %v9767_v63, %v9767_v63  ;;  %v11229_v32 = vld [vmem:[#allocation63_spill] sm:$0xff]  ;;  %v5012_v0 = vrot.slane %v4695_v11, %v11164_v17  ;;  %v11230_v63 = vld [vmem:[#allocation120_spill] sm:$0xff]  ;;  %v4691_v58 = vadd.f32 1.0, %v4565_v20 }
 0x40b   :  { %v2869_v50 = vpop.permute.xlu1 %2868  ;;  %v9812_v33 = vmul.f32 %v5004_v30, %v11229_v32  ;;  %v9832_v30 = vmul.f32 %v4956_v56, %v11233_v61  ;;  %v11234_v11 = vld [vmem:[#allocation127_spill] sm:$0xff]  ;;  %v11236_v20 = vld [vmem:[#allocation52_spill] sm:$0xff]  ;;  %v4486_v32 = vcombine.high %v9783_v35, %v9783_v35 }
 0x40c   :  { %6711 = vpow2.f32 %v3427_v5  ;;  %v3327_v2 = vsub.f32 %v11223_v14, %v2869_v50  ;;  %v4501_v5 = vrot.slane %v9801_v10, %v9748_v26  ;;  %v4689_v50 = vadd.f32 1.0, %v4543_v37  ;;  %v11239_v56 = vld [vmem:[#allocation60_spill] sm:$0xff] }
 0x40d   :  { %v6700_v27 = vpop.eup %6699  ;;  %6713 = vpow2.f32 %v3401_v4  ;;  %v3320_v14 = vsub.f32 %v11230_v63, %v9789_v13  ;;  %v2848_v13 = vpop.permute.xlu0 %2847  ;;  %v3322_v9 = vsub.f32 %v11234_v11, %v2834_v54  ;;  %v11243_v11 = vld [vmem:[#allocation129_spill] sm:$0xff] }
 0x40e   :  { %v3399_v40 = vmul.f32 1.442695, %v3327_v2  ;;  %3624 = vperm.xlu0 %6608, %v6700_v27   ;;  %3627 = vperm.xlu1 %6607, %v6698_v38   ;;  %v6702_v60 = vpop.eup %6701  ;;  %v3413_v38 = vmul.f32 1.442695, %v3334_v59  ;;  %v11231_v27 = vld [vmem:[#allocation147_spill] sm:$0xff]  ;;  %v4988_v31 = vrot.slane %v4689_v50, %v11164_v17 }
 0x40f   :  { %v2883_v1 = vpop.permute.xlu1 %2882  ;;  %v3389_v24 = vmul.f32 1.442695, %v3322_v9 }
 0x410   :  { %6715 = vpow2.f32 %v3399_v40  ;;  %v3329_v18 = vsub.f32 %v11225_v57, %v2883_v1  ;;  %v4564_v40 = vrot.slane %v4536_v51, %v9748_v26  ;;  %v4685_v1 = vadd.f32 1.0, %v4501_v5  ;;  %v11237_v51 = vld [vmem:[#allocation56_spill] sm:$0xff] }
 0x411   :  { %v6704_v12 = vpop.eup %6703  ;;  %6717 = vpow2.f32 %v3405_v19  ;;  %v11232_v19 = vld [vmem:[#allocation68_spill] sm:$0xff]  ;;  %v2862_v63 = vpop.permute.xlu0 %2861 }
 0x412   :  { %v3403_v8 = vmul.f32 1.442695, %v3329_v18  ;;  %3630 = vperm.xlu0 %6608, %v6704_v12   ;;  %3633 = vperm.xlu1 %6607, %v6702_v60   ;;  %v6706_v43 = vpop.eup %6705  ;;  %v9825_v29 = vmul.f32 %v5012_v0, %v11232_v19  ;;  %v4517_v60 = vcombine.high %v4501_v5, %v4501_v5  ;;  %v9829_v18 = vsub.s32 %v5276_v28, %v11215_v44  ;;  %v11238_v5 = vld [vmem:[#allocation130_spill] sm:$0xff] }
 0x413   :  { %v2897_v48 = vpop.permute.xlu1 %2896  ;;  %v3385_v12 = vmul.f32 1.442695, %v3320_v14  ;;  %v4694_v59 = vadd.f32 1.0, %v4564_v40  ;;  %v4972_v45 = vrot.slane %v4685_v1, %v11164_v17  ;;  %v4429_v0 = vrot.slane %v157_v7, %v9748_v26  ;;  %v11240_v14 = vld [vmem:[#allocation124_spill] sm:$0xff] }
 0x414   :  { %6719 = vpow2.f32 %v3403_v8  ;;  %v3331_v6 = vsub.f32 %v11228_v34, %v2897_v48  ;;  %v4996_v8 = vrot.slane %v4691_v58, %v11164_v17  ;;  %v4687_v54 = vadd.f32 1.0, %v4517_v60 }
 0x415   :  { %v6708_v53 = vpop.eup %6707  ;;  %6721 = vpow2.f32 %v3409_v46  ;;  %v4568_v34 = vcombine.high %v4564_v40, %v4564_v40  ;;  %v5000_v58 = vrot.slane %v4692_v49, %v11164_v17  ;;  %v4508_v19 = vrot.slane %v4486_v32, %v9748_v26 }
 0x416   :  { %v3407_v4 = vmul.f32 1.442695, %v3331_v6  ;;  %3636 = vperm.xlu0 %6608, %v6708_v53   ;;  %3639 = vperm.xlu1 %6607, %v6706_v43   ;;  %v6710_v42 = vpop.eup %6709  ;;  %v9842_v43 = vmul.f32 %v4964_v36, %v11236_v20  ;;  %v9846_v53 = vmul.f32 %v4988_v31, %v11237_v51  ;;  %v9853_v50 = vmul.f32 %v4996_v8, %v11239_v56 }
 0x417   :  { %v2911_v2 = vpop.permute.xlu1 %2910  ;;  %v4980_v39 = vrot.slane %v4687_v54, %v11164_v17  ;;  %v4696_v40 = vadd.f32 1.0, %v4568_v34  ;;  %v4445_v36 = vrot.slane %v4429_v0, %v9748_v26  ;;  %v4422_v1 = vcombine.high %v157_v7, %v157_v7  ;;  %v11246_v7 = vld [vmem:[#allocation64_spill] sm:$0xff] }
 0x418   :  { %6723 = vpow2.f32 %v3407_v4  ;;  %v3333_v55 = vsub.f32 %v11231_v27, %v2911_v2  ;;  %v3324_v4 = vsub.f32 %v11238_v5, %v2848_v13  ;;  %v11241_v27 = vld [vmem:[#allocation57_spill] sm:$0xff]  ;;  %v11242_v13 = vld [vmem:[#allocation136_spill] sm:$0xff]  ;;  %v4487_v31 = vcombine.high %v9801_v10, %v9801_v10  ;;  %v156_v10 = vld [vmem:[%s10691_s2 + $0x20] sm:$0xff] }
 0x419   :  { %v6712_v3 = vpop.eup %6711  ;;  %6725 = vpow2.f32 %v3413_v38  ;;  %v9875_v49 = vmul.f32 %v4980_v39, %v11246_v7  ;;  %v4682_v34 = vadd.f32 1.0, %v4508_v19  ;;  %v4436_v51 = vrot.slane %v4422_v1, %v9748_v26 }
 0x41a   :  { %v3411_v57 = vmul.f32 1.442695, %v3333_v55  ;;  %3642 = vperm.xlu0 %6608, %v6712_v3   ;;  %3645 = vperm.xlu1 %6607, %v6710_v42   ;;  %v6714_v62 = vpop.eup %6713  ;;  %v5008_v42 = vrot.slane %v4694_v59, %v11164_v17  ;;  %v9859_v55 = vmul.f32 %v4972_v45, %v11241_v27  ;;  %v3393_v60 = vmul.f32 1.442695, %v3324_v4 }
 0x41b   :  { %v2813_v37 = vpop.permute.xlu1 %2812  ;;  %v5016_v59 = vrot.slane %v4696_v40, %v11164_v17  ;;  %v4437_v45 = vcombine.high %v4429_v0, %v4429_v0  ;;  %v4673_v5 = vadd.f32 1.0, %v4445_v36  ;;  %v4515_v4 = vrot.slane %v4487_v31, %v9748_v26  ;;  %v11247_v0 = vld [vmem:[#allocation133_spill] sm:$0xff] }
 0x41c   :  { %6727 = vpow2.f32 %v3411_v57  ;;  %v3319_v46 = vsub.f32 %v11235_v15, %v2813_v37  ;;  %v3326_v57 = vsub.f32 %v11242_v13, %v2862_v63  ;;  %v11244_v37 = vld [vmem:[#allocation61_spill] sm:$0xff]  ;;  %v4380_v63 = vrot.slane %v156_v10, %v9748_v26 }
 0x41d   :  { %v6716_v48 = vpop.eup %6715  ;;  %6729 = vpow2.f32 %v3385_v12  ;;  %v9869_v8 = vmul.f32 %v5000_v58, %v11244_v37  ;;  %v4467_v58 = vcombine.high %v4445_v36, %v4445_v36  ;;  %v4960_v39 = vrot.slane %v4682_v34, %v11164_v17 }
 0x41e   :  { %v3383_v6 = vmul.f32 1.442695, %v3319_v46  ;;  %3600 = vperm.xlu0 %6608, %v6716_v48   ;;  %3603 = vperm.xlu1 %6607, %v6714_v62   ;;  %v6718_v38 = vpop.eup %6717  ;;  %v11245_v62 = vld [vmem:[#allocation65_spill] sm:$0xff]  ;;  %v6778_v48 = vmov 1934713408   ;;  %v4452_v1 = vrot.slane %v4436_v51, %v9748_v26 }
 0x41f   :  { %v2827_v28 = vpop.permute.xlu1 %2826  ;;  %v9872_v15 = vmul.f32 %v5008_v42, %v11245_v62  ;;  %v5308_v20 = vunpack.c.l.s4 %v6778_v48  ;;  %v3397_v32 = vmul.f32 1.442695, %v3326_v57  ;;  %v4459_v42 = vrot.slane %v4437_v45, %v9748_v26 }
 0x420   :  { %6731 = vpow2.f32 %v3383_v6  ;;  %v3321_v2 = vsub.f32 %v11240_v14, %v2827_v28  ;;  %v4518_v6 = vcombine.high %v4508_v19, %v4508_v19  ;;  %v4924_v19 = vrot.slane %v4673_v5, %v11164_v17 }
 0x421   :  { %v6720_v35 = vpop.eup %6719  ;;  %6733 = vpow2.f32 %v3389_v24  ;;  %v4686_v57 = vadd.f32 1.0, %v4515_v4  ;;  %v4468_v37 = vcombine.high %v4452_v1, %v4452_v1 }
 0x422   :  { %v3387_v3 = vmul.f32 1.442695, %v3321_v2  ;;  %3606 = vperm.xlu0 %6608, %v6720_v35   ;;  %3609 = vperm.xlu1 %6607, %v6718_v38   ;;  %v6722_v12 = vpop.eup %6721  ;;  %v4438_v38 = vcombine.high %v4436_v51, %v4436_v51  ;;  %v5309_v2 = vunpack.c.0.s8 %v5308_v20  ;;  %v4373_v35 = vcombine.high %v156_v10, %v156_v10 }
 0x423   :  { %v2841_v61 = vpop.permute.xlu1 %2840  ;;  %v4684_v40 = vadd.f32 1.0, %v4518_v6  ;;  %v4396_v20 = vrot.slane %v4380_v63, %v9748_v26  ;;  %v4674_v10 = vadd.f32 1.0, %v4459_v42  ;;  %v11249_v6 = vld [vmem:[#allocation47_spill] sm:$0xff]  ;;  %v4976_v5 = vrot.slane %v4686_v57, %v11164_v17 }
 0x424   :  { %6735 = vpow2.f32 %v3387_v3  ;;  %v3323_v9 = vsub.f32 %v11243_v11, %v2841_v61  ;;  %v4519_v3 = vcombine.high %v4515_v4, %v4515_v4  ;;  %v4466_v36 = vrot.slane %v4438_v38, %v9748_v26 }
 0x425   :  { %v6724_v46 = vpop.eup %6723  ;;  %6737 = vpow2.f32 %v3393_v60  ;;  %v4469_v60 = vcombine.high %v4459_v42, %v4459_v42  ;;  %v4388_v61 = vcombine.high %v4380_v63, %v4380_v63  ;;  %v4387_v62 = vrot.slane %v4373_v35, %v9748_v26  ;;  %v11251_v63 = vld [vmem:[#allocation53_spill] sm:$0xff]  ;;  %v3748_v35 = vpop.permute.xlu0 %3747 }
 0x426   :  { %v3391_v54 = vmul.f32 1.442695, %v3323_v9  ;;  %3612 = vperm.xlu0 %6608, %v6724_v46   ;;  %3615 = vperm.xlu1 %6607, %v6722_v12   ;;  %v6726_v28 = vpop.eup %6725  ;;  %v11248_v12 = vld [vmem:[#allocation67_spill] sm:$0xff]  ;;  %v4675_v9 = vadd.f32 1.0, %v4467_v58  ;;  %v4968_v46 = vrot.slane %v4684_v40, %v11164_v17  ;;  %v4688_v7 = vadd.f32 1.0, %v4519_v3 }
 0x427   :  { %v2855_v24 = vpop.permute.xlu1 %2854  ;;  %v9891_v11 = vmul.f32 %v5016_v59, %v11248_v12  ;;  %v4470_v48 = vcombine.high %v4466_v36, %v4466_v36  ;;  %v9897_v45 = vsub.s32 %v5309_v2, %v11215_v44  ;;  %v4676_v34 = vadd.f32 1.0, %v4469_v60  ;;  %v11252_v60 = vld [vmem:[#allocation62_spill] sm:$0xff]  ;;  %v11253_v12 = vld [vmem:[#allocation44_spill] sm:$0xff] }
 0x428   :  { %6739 = vpow2.f32 %v3391_v54  ;;  %v3325_v56 = vsub.f32 %v11247_v0, %v2855_v24  ;;  %v4677_v54 = vadd.f32 1.0, %v4452_v1  ;;  %v9900_v51 = vmul.f32 %v4960_v39, %v11249_v6 }
 0x429   :  { %v6728_v14 = vpop.eup %6727  ;;  %6741 = vpow2.f32 %v3397_v32  ;;  %v11250_v32 = vld [vmem:[#allocation40_spill] sm:$0xff]  ;;  %v4410_v4 = vrot.slane %v4388_v61, %v9748_v26  ;;  %v4932_v0 = vrot.slane %v4675_v9, %v11164_v17  ;;  %v4679_v44 = vadd.f32 1.0, %v4468_v37 }
 0x42a   :  { %v3395_v27 = vmul.f32 1.442695, %v3325_v56  ;;  %3618 = vperm.xlu0 %6608, %v6728_v14   ;;  %3621 = vperm.xlu1 %6607, %v6726_v28   ;;  %v6730_v13 = vpop.eup %6729  ;;  %v9903_v24 = vmul.f32 %v4924_v19, %v11250_v32  ;;  %v4678_v56 = vadd.f32 1.0, %v4466_v36  ;;  %v4389_v38 = vcombine.high %v4387_v62, %v4387_v62  ;;  %v11256_v32 = vld [vmem:[#allocation49_spill] sm:$0xff] }
 0x42b   :  { %v9909_v14 = vmul.f32 %v4968_v46, %v11251_v63  ;;  %v4984_v2 = vrot.slane %v4688_v7, %v11164_v17  ;;  %v4680_v58 = vadd.f32 1.0, %v4470_v48  ;;  %v4665_v42 = vadd.f32 1.0, %v4396_v20  ;;  %v9928_v48 = vld [vmem:[%s10691_s2 + $0x18] sm:$0xff] }
 0x42c   :  { %6743 = vpow2.f32 %v3395_v27  ;;  %v4928_v27 = vrot.slane %v4674_v10, %v11164_v17  ;;  %v4940_v39 = vrot.slane %v4677_v54, %v11164_v17  ;;  %v4936_v40 = vrot.slane %v4676_v34, %v11164_v17  ;;  %v3757_v34 = vpop.permute.xlu0 %3756 }
 0x42d   :  { %v6732_v31 = vpop.eup %6731  ;;  %v4420_v3 = vcombine.high %v4410_v4, %v4410_v4  ;;  %v4666_v57 = vadd.f32 1.0, %v4410_v4  ;;  %v4418_v36 = vcombine.high %v4396_v20, %v4396_v20  ;;  %v4403_v61 = vrot.slane %v4387_v62, %v9748_v26  ;;  %v11254_v20 = vld [vmem:[#allocation66_spill] sm:$0xff]  ;;  %v11257_v4 = vld [vmem:[#allocation45_spill] sm:$0xff] }
 0x42e   :  { %3576 = vperm.xlu0 %6608, %v6732_v31   ;;  %3579 = vperm.xlu1 %6607, %v6730_v13   ;;  %v6734_v59 = vpop.eup %6733  ;;  %v9916_v13 = vmul.f32 %v4976_v5, %v11252_v60  ;;  %v9920_v9 = vmul.f32 %v4932_v0, %v11253_v12  ;;  %v4944_v37 = vrot.slane %v4678_v56, %v11164_v17  ;;  %v11259_v60 = vld [vmem:[#allocation54_spill] sm:$0xff] }
 0x42f   :  { %v4948_v46 = vrot.slane %v4679_v44, %v11164_v17  ;;  %v4417_v7 = vrot.slane %v4389_v38, %v9748_v26  ;;  %v9931_v10 = vmul.f32 %v4984_v2, %v11254_v20  ;;  %v4952_v62 = vrot.slane %v4680_v58, %v11164_v17  ;;  %v11262_v20 = vld [vmem:[#allocation32_spill] sm:$0xff] }
 0x430   :  { %v4892_v54 = vrot.slane %v4665_v42, %v11164_v17  ;;  %v9939_v5 = vmul.f32 %v4940_v39, %v11256_v32  ;;  %v4668_v0 = vadd.f32 1.0, %v4420_v3  ;;  %v4896_v38 = vrot.slane %v4666_v57, %v11164_v17  ;;  %v11260_v39 = vld [vmem:[#allocation58_spill] sm:$0xff]  ;;  %v11261_v57 = vld [vmem:[#allocation59_spill] sm:$0xff] }
 0x431   :  { %v6736_v28 = vpop.eup %6735  ;;  %v4667_v63 = vadd.f32 1.0, %v4418_v36  ;;  %v4669_v2 = vadd.f32 1.0, %v4403_v61  ;;  %v4331_v58 = vrot.slane %v9928_v48, %v9748_v26  ;;  %v9952_v12 = vmul.f32 %v4948_v46, %v11260_v39  ;;  %v11263_v39 = vld [vmem:[#allocation31_spill] sm:$0xff] }
 0x432   :  { %3582 = vperm.xlu0 %6608, %v6736_v28   ;;  %3585 = vperm.xlu1 %6607, %v6734_v59   ;;  %v6738_v19 = vpop.eup %6737  ;;  %v11255_v59 = vld [vmem:[#allocation39_spill] sm:$0xff]  ;;  %v9942_v28 = vmul.f32 %v4936_v40, %v11257_v4  ;;  %v4670_v40 = vadd.f32 1.0, %v4417_v7  ;;  %v9956_v36 = vmul.f32 %v4952_v62, %v11261_v57  ;;  %v3763_v4 = vpop.permute.xlu0 %3762  ;;  %v4419_v52 = vcombine.high %v4403_v61, %v4403_v61 }
 0x433   :  { %v9936_v6 = vmul.f32 %v4928_v27, %v11255_v59  ;;  %v9959_v59 = vmul.f32 %v4892_v54, %v11262_v20  ;;  %v9964_v25 = vmul.f32 %v4896_v38, %v11263_v39  ;;  %v4339_v62 = vcombine.high %v4331_v58, %v4331_v58 }
 0x434   :  { %v3745_v1 = vpop.permute.xlu1 %3744  ;;  %v4912_v23 = vrot.slane %v4670_v40, %v11164_v17  ;;  %v9976_v38 = vrot.slane %v4331_v58, %v9748_v26 }
 0x435   :  { %v6740_v31 = vpop.eup %6739  ;;  %v5265_v40 = vmul.f32 %v9846_v53, %v3745_v1  ;;  %v11267_v53 = vld [vmem:[#allocation46_spill] sm:$0xff] }
 0x436   :  { %3588 = vperm.xlu0 %6608, %v6740_v31   ;;  %3591 = vperm.xlu1 %6607, %v6738_v19   ;;  %v6742_v56 = vpop.eup %6741  ;;  %v11258_v19 = vld [vmem:[#allocation121_spill] sm:$0xff]  ;;  %v9949_v31 = vmul.f32 %v4944_v37, %v11259_v60  ;;  %v4904_v37 = vrot.slane %v4668_v0, %v11164_v17  ;;  %v4421_v60 = vcombine.high %v4417_v7, %v4417_v7 }
 0x437   :  { %v3994_v27 = vrot.slane %v3745_v1, %v11258_v19  ;;  %v3998_v32 = vrot.slane %v3748_v35, %v11258_v19  ;;  %v5266_v7 = vmul.f32 %v9806_v22, %v3748_v35  ;;  %v4361_v35 = vrot.slane %v4339_v62, %v9748_v26 }
 0x438   :  { %v3751_v44 = vpop.permute.xlu1 %3750  ;;  %v9997_v1 = vmul.f32 %v4912_v23, %v11267_v53  ;;  %v4657_v62 = vadd.f32 1.0, %v9976_v38  ;;  %v4324_v23 = vcombine.high %v9928_v48, %v9928_v48  ;;  %v6751_v48 = vld [vmem:[%s10693_s4] sm:$0xff] }
 0x439   :  { %v6744_v42 = vpop.eup %6743  ;;  %v4002_v3 = vrot.slane %v3751_v44, %v11258_v19  ;;  %v4072_v57 = vsel %vm2069_vm5, %v3998_v32, %v3994_v27  ;;  %v5267_v0 = vmul.f32 %v9853_v50, %v3751_v44  ;;  %v4672_v27 = vadd.f32 1.0, %v4421_v60  ;;  %v9986_v44 = vpop.permute.xlu0 %3720  ;;  %6574 = vmatprep.mubr.msk.f32.mxu1 %vm4087_vm1, %v6751_v48  ;;  %6593 = vmatprep.mubr.msk.f32.mxu0 %vm4087_vm1, %v6751_v48 }
 0x43a   :  { %3594 = vperm.xlu0 %6608, %v6744_v42   ;;  %3597 = vperm.xlu1 %6607, %v6742_v56   ;;  %v4900_v42 = vrot.slane %v4667_v63, %v11164_v17  ;;  %v4908_v56 = vrot.slane %v4669_v2, %v11164_v17  ;;  %v11264_v2 = vld [vmem:[#allocation37_spill] sm:$0xff]  ;;  %v4671_v32 = vadd.f32 1.0, %v4419_v52  ;;  %v5271_v50 = vmul.f32 %v9825_v29, %v3763_v4 }
 0x43b   :  { %v4073_v61 = vsel %vm2071_vm7, %v4002_v3, %v4072_v57  ;;  %v9980_v39 = vmul.f32 %v4904_v37, %v11264_v2  ;;  %v11265_v3 = vld [vmem:[#allocation36_spill] sm:$0xff]  ;;  %v11266_v37 = vld [vmem:[#allocation41_spill] sm:$0xff]  ;;  %v5749_v52 = vcombine.low %v5265_v40, %v5267_v0  ;;  %v5269_v29 = vmul.f32 %v9812_v33, %v3757_v34 }
 0x43c   :  { %v3754_v46 = vpop.permute.xlu1 %3753  ;;  %v9990_v57 = vmul.f32 %v4900_v42, %v11265_v3  ;;  %v9993_v60 = vmul.f32 %v4908_v56, %v11266_v37  ;;  %v4916_v42 = vrot.slane %v4671_v32, %v11164_v17  ;;  %v10006_v2 = vadd.f32 1.0, %v4361_v35 }
 0x43d   :  { %v4006_v54 = vrot.slane %v3754_v46, %v11258_v19  ;;  %v5268_v20 = vmul.f32 %v9869_v8, %v3754_v46  ;;  %v4010_v8 = vrot.slane %v3757_v34, %v11258_v19  ;;  %v5756_v32 = vrot.slane %v5749_v52, %v9829_v18 }
 0x43e   :  { %v4860_v40 = vrot.slane %v4657_v62, %v11164_v17  ;;  %v4371_v3 = vcombine.high %v4361_v35, %v4361_v35  ;;  %v4338_v52 = vrot.slane %v4324_v23, %v9748_v26  ;;  %v3962_v35 = vrot.slane %v9986_v44, %v11258_v19 }
 0x43f   :  { %v4074_v63 = vsel %vm2073_vm9, %v4006_v54, %v4073_v61  ;;  %v5757_v46 = vcombine.low %v5266_v7, %v5268_v20  ;;  %v4920_v7 = vrot.slane %v4672_v27, %v11164_v17  ;;  %v4018_v61 = vrot.slane %v3763_v4, %v11258_v19 }
 0x440   :  { %v3760_v22 = vpop.permute.xlu1 %3759  ;;  %v4075_v54 = vsel %vm2075_vm15, %v4010_v8, %v4074_v63  ;;  %v5765_v63 = vcombine.low %v5269_v29, %v5271_v50  ;;  %v3727_v8 = vpop.permute.xlu0 %3726  ;;  %v11269_v50 = vld [vmem:[#allocation51_spill] sm:$0xff]  ;;  %v4369_v23 = vcombine.high %v9976_v38, %v9976_v38 }
 0x441   :  { %v4014_v58 = vrot.slane %v3760_v22, %v11258_v19  ;;  %v5764_v56 = vrot.slane %v5757_v46, %v9829_v18  ;;  %v5270_v33 = vmul.f32 %v9872_v15, %v3760_v22  ;;  %v10023_v37 = vmul.f32 %v4920_v7, %v11269_v50 }
 0x442   :  { %v4864_v7 = vrot.slane %v10006_v2, %v11164_v17 }
 0x443   :  { %v4076_v20 = vsel %vm2077_vm0, %v4014_v58, %v4075_v54  ;;  %v5781_v15 = vcombine.low %v5756_v32, %v5764_v56  ;;  %v5772_v54 = vrot.slane %v5765_v63, %v9829_v18 }
 0x444   :  { %v3766_v0 = vpop.permute.xlu1 %3765  ;;  %v4077_v4 = vsel %vm2079_vm4, %v4018_v61, %v4076_v20  ;;  %v3733_v53 = vpop.permute.xlu0 %3732  ;;  %v11270_v20 = vld [vmem:[#allocation50_spill] sm:$0xff] }
 0x445   :  { %v4022_v34 = vrot.slane %v3766_v0, %v11258_v19  ;;  %v5272_v27 = vmul.f32 %v9891_v11, %v3766_v0  ;;  %v5782_v11 = vcombine.high %v5756_v32, %v5764_v56  ;;  %v10032_v61 = vmul.f32 %v4916_v42, %v11270_v20  ;;  %v11271_v56 = vld [vmem:[#allocation26_spill] sm:$0xff] }
 0x446   :  { %v10037_v0 = vmul.f32 %v4860_v40, %v11271_v56  ;;  %v3970_v32 = vrot.slane %v3727_v8, %v11258_v19  ;;  %v10067_v56 = vld [vmem:[%s10691_s2 + $0x10] sm:$0xff] }
 0x447   :  { %v5773_v46 = vcombine.low %v5270_v33, %v5272_v27  ;;  %v4078_v58 = vsel %vm11268_vm2, %v4022_v34, %v4077_v4  ;;  %v10042_v27 = vadd.f32 1.0, %v4371_v3  ;;  %v5796_v42 = vrot.slane %v5782_v11, %v9897_v45 }
 0x448   :  { %v3724_v22 = vpop.permute.xlu1 %3723  ;;  %6558 = vmatprep.subr.mxu1 %v4078_v58  ;;  %v3739_v40 = vpop.permute.xlu0 %3738  ;;  %v5259_v3 = vmul.f32 %v9842_v43, %v3727_v8  ;;  %v10058_v11 = vrot.slane %v4338_v52, %v9748_v26  ;;  %v3978_v43 = vrot.slane %v3733_v53, %v11258_v19 }
 0x449   :  { %v5780_v62 = vrot.slane %v5773_v46, %v9829_v18  ;;  %v3966_v29 = vrot.slane %v3724_v22, %v11258_v19  ;;  %6559 = vmatpush3.msra.mxu1 %v4078_v58  ;;  %v10047_v46 = vrot.slane %v5781_v15, %v9897_v45  ;;  %v4340_v58 = vcombine.high %v4338_v52, %v4338_v52 }
 0x44a   :  { %v5258_v15 = vmul.f32 %v9900_v51, %v3724_v22  ;;  %v5263_v8 = vmul.f32 %v9875_v49, %v3739_v40  ;;  %v5257_v22 = vmul.f32 %v9832_v30, %v9986_v44  ;;  %v5261_v49 = vmul.f32 %v9859_v55, %v3733_v53 }
 0x44b   :  { %v5797_v63 = vcombine.low %v5772_v54, %v5780_v62  ;;  %v5798_v33 = vcombine.high %v5772_v54, %v5780_v62  ;;  %v4065_v34 = vsel %vm2069_vm5, %v3966_v29, %v3962_v35  ;;  %v4659_v62 = vadd.f32 1.0, %v4369_v23 }
 0x44c   :  { %v3730_v4 = vpop.permute.xlu1 %3729  ;;  %v4066_v35 = vsel %vm2071_vm7, %v3970_v32, %v4065_v34  ;;  %v4368_v52 = vrot.slane %v4340_v58, %v9748_v26  ;;  %v4661_v32 = vadd.f32 1.0, %v10058_v11  ;;  %v5681_v58 = vcombine.low %v5257_v22, %v5259_v3 }
 0x44d   :  { %v3974_v48 = vrot.slane %v3730_v4, %v11258_v19  ;;  %v5260_v38 = vmul.f32 %v9909_v14, %v3730_v4  ;;  %v5812_v50 = vrot.slane %v5798_v33, %v9897_v45  ;;  %v10053_v54 = vrot.slane %v5797_v63, %v9897_v45 }
 0x44e   :  { %v4282_v4 = vrot.slane %v10067_v56, %v9748_v26  ;;  %v4868_v55 = vrot.slane %v4659_v62, %v11164_v17  ;;  %v4372_v53 = vcombine.high %v4368_v52, %v4368_v52  ;;  %v4876_v62 = vrot.slane %v4661_v32, %v11164_v17 }
 0x44f   :  { %v4067_v29 = vsel %vm2073_vm9, %v3974_v48, %v4066_v35  ;;  %v5815_v20 = vcombine.low %v5796_v42, %v5812_v50  ;;  %v5814_v14 = vcombine.high %v10047_v46, %v10053_v54  ;;  %v5813_v51 = vcombine.low %v10047_v46, %v10053_v54 }
 0x450   :  { %v3736_v23 = vpop.permute.xlu1 %3735  ;;  %v5689_v63 = vcombine.low %v5258_v15, %v5260_v38  ;;  %v4068_v34 = vsel %vm2075_vm15, %v3978_v43, %v4067_v29  ;;  %v5816_v30 = vcombine.high %v5796_v42, %v5812_v50  ;;  %v4872_v48 = vrot.slane %v10042_v27, %v11164_v17  ;;  %v10089_v29 = vpop.permute.xlu0 %3696 }
 0x451   :  { %v3982_v33 = vrot.slane %v3736_v23, %v11258_v19  ;;  %5871 = vrot.lane.b32.xlu1 %v5815_v20, %s6779_s16  ;;  %5839 = vrot.lane.b32.xlu0 %v5814_v14, %s6780_s17  ;;  %v3986_v38 = vrot.slane %v3739_v40, %v11258_v19  ;;  %v5697_v35 = vcombine.low %v5261_v49, %v5263_v8  ;;  %v10099_v40 = vadd.f32 1.0, %v4368_v52  ;;  %v11274_v52 = vld [vmem:[#allocation29_spill] sm:$0xff]  ;;  %v11275_v49 = vld [vmem:[#allocation27_spill] sm:$0xff] }
 0x452   :  { %v10092_v20 = vrot.slane %v5689_v63, %v9829_v18  ;;  %v5262_v3 = vmul.f32 %v9916_v13, %v3736_v23  ;;  %v4290_v14 = vcombine.high %v4282_v4, %v4282_v4  ;;  %v5688_v43 = vrot.slane %v5681_v58, %v9829_v18 }
 0x453   :  { %v4069_v44 = vsel %vm2077_vm0, %v3982_v33, %v4068_v34  ;;  %v4370_v13 = vcombine.high %v10058_v11, %v10058_v11  ;;  %v10113_v33 = vmul.f32 %v4872_v48, %v11274_v52  ;;  %v10116_v34 = vmul.f32 %v4868_v55, %v11275_v49 }
 0x454   :  { %v3742_v15 = vpop.permute.xlu1 %3741  ;;  %v4070_v27 = vsel %vm2079_vm4, %v3986_v38, %v4069_v44  ;;  %v10118_v32 = vadd.f32 1.0, %v4372_v53  ;;  %v5704_v58 = vrot.slane %v5697_v35, %v9829_v18  ;;  %v5713_v11 = vcombine.low %v5688_v43, %v10092_v20  ;;  %v11276_v53 = vld [vmem:[#allocation33_spill] sm:$0xff] }
 0x455   :  { %v3990_v42 = vrot.slane %v3742_v15, %v11258_v19  ;;  %v5264_v50 = vmul.f32 %v9931_v10, %v3742_v15  ;;  %5903 = vrot.lane.b32.xlu1 %v5816_v30, %s6781_s18  ;;  %v11273_v10 = vld [vmem:[#allocation25_spill] sm:$0xff]  ;;  %v3703_v30 = vpop.permute.xlu0 %3702  ;;  %v3930_v2 = vrot.slane %v10089_v29, %v11258_v19  ;;  %v4312_v48 = vrot.slane %v4290_v14, %v9748_v26 }
 0x456   :  { %v10110_v63 = vmul.f32 %v4864_v7, %v11273_v10  ;;  %v4880_v7 = vrot.slane %v10099_v40, %v11164_v17  ;;  %v4298_v15 = vrot.slane %v4282_v4, %v9748_v26  ;;  %v4275_v14 = vcombine.high %v10067_v56, %v10067_v56  ;;  %v10205_v40 = vld [vmem:[%s10691_s2 + $0x8] sm:$0xff] }
 0x457   :  { %v5705_v8 = vcombine.low %v5262_v3, %v5264_v50  ;;  %v4071_v22 = vsel %vm11272_vm3, %v3990_v42, %v4070_v27  ;;  %v10131_v3 = vmul.f32 %v4876_v62, %v11276_v53  ;;  %v10133_v42 = vadd.f32 1.0, %v4370_v13 }
 0x458   :  { %v3700_v23 = vpop.permute.xlu1 %3699  ;;  %6560 = vmatprep.subr.mxu1 %v4071_v22  ;;  %v3938_v50 = vrot.slane %v3703_v30, %v11258_v19  ;;  %v5714_v4 = vcombine.high %v5688_v43, %v10092_v20  ;;  %v10144_v62 = vrot.slane %v5713_v11, %v9897_v45  ;;  %v10149_v49 = vadd.f32 1.0, %v4312_v48 }
 0x459   :  { %v5712_v44 = vrot.slane %v5705_v8, %v9829_v18  ;;  %v3934_v38 = vrot.slane %v3700_v23, %v11258_v19  ;;  %6561 = vmatpush3.msra.mxu1 %v4071_v22  ;;  %v4888_v22 = vrot.slane %v10118_v32, %v11164_v17  ;;  %v3709_v10 = vpop.permute.xlu0 %3708  ;;  %v5251_v11 = vmul.f32 %v9920_v9, %v3703_v30 }
 0x45a   :  { %v4289_v53 = vrot.slane %v4275_v14, %v9748_v26  ;;  %v5249_v9 = vmul.f32 %v9903_v24, %v10089_v29 }
 0x45b   :  { %v5729_v55 = vcombine.low %v5704_v58, %v5712_v44  ;;  %v5730_v35 = vcombine.high %v5704_v58, %v5712_v44  ;;  %v4058_v27 = vsel %vm2069_vm5, %v3934_v38, %v3930_v2  ;;  %v4649_v58 = vadd.f32 1.0, %v4298_v15 }
 0x45c   :  { %v3706_v8 = vpop.permute.xlu1 %3705  ;;  %v4322_v44 = vcombine.high %v4312_v48, %v4312_v48  ;;  %v4320_v38 = vcombine.high %v4298_v15, %v4298_v15  ;;  %v4059_v32 = vsel %vm2071_vm7, %v3938_v50, %v4058_v27  ;;  %v5250_v15 = vmul.f32 %v9936_v6, %v3700_v23 }
 0x45d   :  { %v3942_v52 = vrot.slane %v3706_v8, %v11258_v19  ;;  %v10147_v13 = vrot.slane %v5729_v55, %v9897_v45  ;;  %v5252_v56 = vmul.f32 %v9942_v28, %v3706_v8  ;;  %v5744_v43 = vrot.slane %v5730_v35, %v9897_v45 }
 0x45e   :  { %v3946_v50 = vrot.slane %v3709_v10, %v11258_v19  ;;  %v5728_v35 = vrot.slane %v5714_v4, %v9897_v45  ;;  %v4884_v8 = vrot.slane %v10133_v42, %v11164_v17  ;;  %v4652_v14 = vadd.f32 1.0, %v4322_v44 }
 0x45f   :  { %v5746_v20 = vcombine.high %v10144_v62, %v10147_v13  ;;  %v4060_v2 = vsel %vm2073_vm9, %v3942_v52, %v4059_v32  ;;  %v5621_v52 = vcombine.low %v5250_v15, %v5252_v56  ;;  %v4832_v4 = vrot.slane %v10149_v49, %v11164_v17 }
 0x460   :  { %v3712_v55 = vpop.permute.xlu1 %3711  ;;  %v5747_v23 = vcombine.low %v5728_v35, %v5744_v43  ;;  %v4061_v32 = vsel %vm2075_vm15, %v3946_v50, %v4060_v2  ;;  %v4828_v24 = vrot.slane %v4649_v58, %v11164_v17  ;;  %v4651_v42 = vadd.f32 1.0, %v4320_v38 }
 0x461   :  { %v3950_v28 = vrot.slane %v3712_v55, %v11258_v19  ;;  %5837 = vrot.lane.b32.xlu0 %v5746_v20, %s6780_s17  ;;  %v3715_v27 = vpop.permute.xlu0 %3714  ;;  %v5253_v20 = vmul.f32 %v9939_v5, %v3709_v10  ;;  %v4291_v44 = vcombine.high %v4289_v53, %v4289_v53  ;;  %v4305_v56 = vrot.slane %v4289_v53, %v9748_v26 }
 0x462   :  { %v5255_v30 = vmul.f32 %v9952_v12, %v3715_v27  ;;  %v3954_v6 = vrot.slane %v3715_v27, %v11258_v19  ;;  %v5613_v12 = vcombine.low %v5249_v9, %v5251_v11  ;;  %v5254_v15 = vmul.f32 %v9949_v31, %v3712_v55  ;;  %v11278_v27 = vld [vmem:[#allocation38_spill] sm:$0xff]  ;;  %v11279_v55 = vld [vmem:[#allocation43_spill] sm:$0xff] }
 0x463   :  { %v4062_v48 = vsel %vm2077_vm0, %v3950_v28, %v4061_v32  ;;  %v5628_v50 = vrot.slane %v5621_v52, %v9829_v18  ;;  %v5748_v49 = vcombine.high %v5728_v35, %v5744_v43  ;;  %v4840_v11 = vrot.slane %v4652_v14, %v11164_v17  ;;  %v11280_v14 = vld [vmem:[#allocation42_spill] sm:$0xff] }
 0x464   :  { %v5629_v2 = vcombine.low %v5253_v20, %v5255_v30  ;;  %v4063_v58 = vsel %vm2079_vm4, %v3954_v6, %v4062_v48  ;;  %v10191_v31 = vmul.f32 %v4880_v7, %v11278_v27  ;;  %v10194_v53 = vmul.f32 %v4888_v22, %v11279_v55  ;;  %v11281_v6 = vld [vmem:[#allocation22_spill] sm:$0xff]  ;;  %v11282_v20 = vld [vmem:[#allocation21_spill] sm:$0xff] }
 0x465   :  { %v3718_v29 = vpop.permute.xlu1 %3717  ;;  %5869 = vrot.lane.b32.xlu0 %v5747_v23, %s6779_s16  ;;  %v4836_v48 = vrot.slane %v4651_v42, %v11164_v17  ;;  %v4319_v35 = vrot.slane %v4291_v44, %v9748_v26  ;;  %v10200_v30 = vadd.f32 1.0, %v4305_v56  ;;  %v10210_v52 = vmul.f32 %v4884_v8, %v11280_v14 }
 0x466   :  { %v3958_v5 = vrot.slane %v3718_v29, %v11258_v19  ;;  %v5256_v10 = vmul.f32 %v9956_v36, %v3718_v29  ;;  %v5620_v36 = vrot.slane %v5613_v12, %v9829_v18  ;;  %v5636_v7 = vrot.slane %v5629_v2, %v9829_v18  ;;  %v11283_v29 = vld [vmem:[#allocation23_spill] sm:$0xff] }
 0x467   :  { %v10213_v23 = vmul.f32 %v4828_v24, %v11281_v6  ;;  %v10216_v12 = vmul.f32 %v4832_v4, %v11282_v20  ;;  %v10219_v42 = vmul.f32 %v4840_v11, %v11283_v29  ;;  %v4323_v44 = vcombine.high %v4319_v35, %v4319_v35 }
 0x468   :  { %v5637_v28 = vcombine.low %v5254_v15, %v5256_v10  ;;  %v4064_v38 = vsel %vm11277_vm6, %v3958_v5, %v4063_v58  ;;  %v5645_v32 = vcombine.low %v5620_v36, %v5628_v50  ;;  %v4233_v8 = vrot.slane %v10205_v40, %v9748_v26  ;;  %v11284_v58 = vld [vmem:[#allocation24_spill] sm:$0xff] }
 0x469   :  { %v3676_v9 = vpop.permute.xlu1 %3675  ;;  %5901 = vrot.lane.b32.xlu0 %v5748_v49, %s6781_s18  ;;  %6562 = vmatprep.subr.mxu1 %v4064_v38  ;;  %v3673_v43 = vpop.permute.xlu0 %3672  ;;  %v4654_v4 = vadd.f32 1.0, %v4319_v35  ;;  %v4844_v11 = vrot.slane %v10200_v30, %v11164_v17  ;;  %v4321_v14 = vcombine.high %v4305_v56, %v4305_v56 }
 0x46a   :  { %v5644_v22 = vrot.slane %v5637_v28, %v9829_v18  ;;  %6563 = vmatpush3.msra.mxu1 %v4064_v38  ;;  %v3902_v2 = vrot.slane %v3676_v9, %v11258_v19  ;;  %v3898_v5 = vrot.slane %v3673_v43, %v11258_v19  ;;  %v10226_v28 = vmul.f32 %v4836_v48, %v11284_v58 }
 0x46b   :  { %v5646_v38 = vcombine.high %v5620_v36, %v5628_v50  ;;  %v10234_v20 = vrot.slane %v5645_v32, %v9897_v45  ;;  %v4656_v48 = vadd.f32 1.0, %v4323_v44  ;;  %v5242_v35 = vmul.f32 %v9964_v25, %v3676_v9 }
 0x46c   :  { %v5661_v15 = vcombine.low %v5636_v7, %v5644_v22  ;;  %v5662_v10 = vcombine.high %v5636_v7, %v5644_v22  ;;  %v4051_v22 = vsel %vm2069_vm5, %v3902_v2, %v3898_v5  ;;  %v4241_v36 = vcombine.high %v4233_v8, %v4233_v8 }
 0x46d   :  { %v3682_v49 = vpop.permute.xlu1 %3681  ;;  %v3679_v24 = vpop.permute.xlu0 %3678  ;;  %v5660_v44 = vrot.slane %v5646_v38, %v9897_v45  ;;  %v4848_v25 = vrot.slane %v4654_v4, %v11164_v17  ;;  %v4655_v9 = vadd.f32 1.0, %v4321_v14  ;;  %v10258_v58 = vrot.slane %v4233_v8, %v9748_v26 }
 0x46e   :  { %v5244_v27 = vmul.f32 %v9980_v39, %v3682_v49  ;;  %v3906_v55 = vrot.slane %v3679_v24, %v11258_v19  ;;  %v5243_v6 = vmul.f32 %v9990_v57, %v3679_v24  ;;  %v10237_v7 = vrot.slane %v5661_v15, %v9897_v45 }
 0x46f   :  { %v3910_v50 = vrot.slane %v3682_v49, %v11258_v19  ;;  %v5241_v39 = vmul.f32 %v9959_v59, %v3673_v43  ;;  %v5676_v29 = vrot.slane %v5662_v10, %v9897_v45  ;;  %v4856_v10 = vrot.slane %v4656_v48, %v11164_v17 }
 0x470   :  { %v4052_v56 = vsel %vm2071_vm7, %v3906_v55, %v4051_v22  ;;  %v5678_v32 = vcombine.high %v10234_v20, %v10237_v7  ;;  %v5553_v15 = vcombine.low %v5242_v35, %v5244_v27  ;;  %v5677_v43 = vcombine.low %v10234_v20, %v10237_v7 }
 0x471   :  { %v3688_v30 = vpop.permute.xlu1 %3687  ;;  %v3685_v57 = vpop.permute.xlu0 %3684  ;;  %v5545_v2 = vcombine.low %v5241_v39, %v5243_v6  ;;  %v4053_v49 = vsel %vm2073_vm9, %v3910_v50, %v4052_v56  ;;  %v4263_v24 = vrot.slane %v4241_v36, %v9748_v26  ;;  %v5679_v6 = vcombine.low %v5660_v44, %v5676_v29 }
 0x472   :  { %v3918_v5 = vrot.slane %v3688_v30, %v11258_v19  ;;  %v3914_v59 = vrot.slane %v3685_v57, %v11258_v19  ;;  %5835 = vrot.lane.b32.xlu1 %v5678_v32, %s6780_s17  ;;  %v5246_v4 = vmul.f32 %v9997_v1, %v3688_v30  ;;  %v5245_v27 = vmul.f32 %v9993_v60, %v3685_v57 }
 0x473   :  { %v5560_v8 = vrot.slane %v5553_v15, %v9829_v18  ;;  %v5552_v36 = vrot.slane %v5545_v2, %v9829_v18  ;;  %v4852_v60 = vrot.slane %v4655_v9, %v11164_v17  ;;  %v4641_v2 = vadd.f32 1.0, %v10258_v58 }
 0x474   :  { %v4054_v38 = vsel %vm2075_vm15, %v3914_v59, %v4053_v49  ;;  %v10276_v59 = vadd.f32 1.0, %v4263_v24  ;;  %v11286_v49 = vld [vmem:[#allocation30_spill] sm:$0xff] }
 0x475   :  { %v3694_v55 = vpop.permute.xlu1 %3693  ;;  %v3691_v14 = vpop.permute.xlu0 %3690  ;;  %v4055_v1 = vsel %vm2077_vm0, %v3918_v5, %v4054_v38  ;;  %v11287_v38 = vld [vmem:[#allocation28_spill] sm:$0xff] }
 0x476   :  { %v3926_v35 = vrot.slane %v3694_v55, %v11258_v19  ;;  %v5248_v22 = vmul.f32 %v10023_v37, %v3694_v55  ;;  %v3922_v48 = vrot.slane %v3691_v14, %v11258_v19  ;;  %v5247_v50 = vmul.f32 %v10032_v61, %v3691_v14  ;;  %5867 = vrot.lane.b32.xlu1 %v5679_v6, %s6779_s16 }
 0x477   :  { %v4226_v37 = vcombine.high %v10205_v40, %v10205_v40  ;;  %v5680_v61 = vcombine.high %v5660_v44, %v5676_v29  ;;  %v5577_v40 = vcombine.low %v5552_v36, %v5560_v8  ;;  %v11288_v29 = vld [vmem:[#allocation35_spill] sm:$0xff]  ;;  %v4273_v55 = vcombine.high %v4263_v24, %v4263_v24 }
 0x478   :  { %v5569_v39 = vcombine.low %v5246_v4, %v5248_v22  ;;  %v5561_v56 = vcombine.low %v5245_v27, %v5247_v50  ;;  %v4056_v30 = vsel %vm2079_vm4, %v3922_v48, %v4055_v1  ;;  %v10282_v4 = vmul.f32 %v4848_v25, %v11286_v49 }
 0x479   :  { %v3652_v57 = vpop.permute.xlu1 %3651  ;;  %v3649_v32 = vpop.permute.xlu0 %3648  ;;  %v4057_v15 = vsel %vm11285_vm8, %v3926_v35, %v4056_v30  ;;  %v10285_v27 = vmul.f32 %v4844_v11, %v11287_v38  ;;  %v10289_v44 = vmul.f32 %v4856_v10, %v11288_v29  ;;  %v4240_v22 = vrot.slane %v4226_v37, %v9748_v26  ;;  %v11289_v11 = vld [vmem:[#allocation34_spill] sm:$0xff] }
 0x47a   :  { %v5576_v5 = vrot.slane %v5569_v39, %v9829_v18  ;;  %v5568_v9 = vrot.slane %v5561_v56, %v9829_v18  ;;  %6564 = vmatprep.subr.mxu1 %v4057_v15  ;;  %5899 = vrot.lane.b32.xlu1 %v5680_v61, %s6781_s18  ;;  %v3870_v6 = vrot.slane %v3652_v57, %v11258_v19 }
 0x47b   :  { %6565 = vmatpush3.msra.mxu1 %v4057_v15  ;;  %v3866_v35 = vrot.slane %v3649_v32, %v11258_v19  ;;  %v10295_v1 = vmul.f32 %v4852_v60, %v11289_v11  ;;  %v4800_v39 = vrot.slane %v10276_v59, %v11164_v17  ;;  %v4796_v10 = vrot.slane %v4641_v2, %v11164_v17 }
 0x47c   :  { %v5593_v14 = vcombine.low %v5568_v9, %v5576_v5  ;;  %v5594_v25 = vcombine.high %v5568_v9, %v5576_v5  ;;  %v5578_v56 = vcombine.high %v5552_v36, %v5560_v8  ;;  %v4271_v61 = vcombine.high %v10258_v58, %v10258_v58 }
 0x47d   :  { %v3658_v48 = vpop.permute.xlu1 %3657  ;;  %v3655_v50 = vpop.permute.xlu0 %3654  ;;  %v10306_v15 = vrot.slane %v5577_v40, %v9897_v45  ;;  %v4644_v5 = vadd.f32 1.0, %v4273_v55  ;;  %v5234_v59 = vmul.f32 %v10110_v63, %v3652_v57  ;;  %v4044_v8 = vsel %vm2069_vm5, %v3870_v6, %v3866_v35  ;;  %v11290_v63 = vld [vmem:[#allocation14_spill] sm:$0xff] }
 0x47e   :  { %v5236_v24 = vmul.f32 %v10113_v33, %v3658_v48  ;;  %v3874_v30 = vrot.slane %v3655_v50, %v11258_v19  ;;  %v5235_v37 = vmul.f32 %v10116_v34, %v3655_v50  ;;  %v10309_v60 = vrot.slane %v5593_v14, %v9897_v45 }
 0x47f   :  { %v3878_v33 = vrot.slane %v3658_v48, %v11258_v19  ;;  %v4242_v36 = vcombine.high %v4240_v22, %v4240_v22  ;;  %v5233_v2 = vmul.f32 %v10037_v0, %v3649_v32  ;;  %v5608_v38 = vrot.slane %v5594_v25, %v9897_v45 }
 0x480   :  { %v4045_v58 = vsel %vm2071_vm7, %v3874_v30, %v4044_v8  ;;  %v5610_v49 = vcombine.high %v10306_v15, %v10309_v60  ;;  %v5485_v40 = vcombine.low %v5234_v59, %v5236_v24  ;;  %v5592_v29 = vrot.slane %v5578_v56, %v9897_v45 }
 0x481   :  { %v3664_v9 = vpop.permute.xlu1 %3663  ;;  %v3661_v34 = vpop.permute.xlu0 %3660  ;;  %v10321_v57 = vmul.f32 %v4796_v10, %v11290_v63  ;;  %v4643_v55 = vadd.f32 1.0, %v4271_v61  ;;  %v5477_v14 = vcombine.low %v5233_v2, %v5235_v37  ;;  %v5609_v32 = vcombine.low %v10306_v15, %v10309_v60  ;;  %v10338_v37 = vld [vmem:[%s10691_s2] sm:$0xff] }
 0x482   :  { %v3886_v6 = vrot.slane %v3664_v9, %v11258_v19  ;;  %v3882_v0 = vrot.slane %v3661_v34, %v11258_v19  ;;  %5833 = vrot.lane.b32.xlu0 %v5610_v49, %s6780_s17  ;;  %v4046_v35 = vsel %vm2073_vm9, %v3878_v33, %v4045_v58  ;;  %v4808_v25 = vrot.slane %v4644_v5, %v11164_v17 }
 0x483   :  { %v4270_v48 = vrot.slane %v4242_v36, %v9748_v26  ;;  %v4256_v50 = vrot.slane %v4240_v22, %v9748_v26  ;;  %v5238_v11 = vmul.f32 %v10191_v31, %v3664_v9  ;;  %v5237_v56 = vmul.f32 %v10131_v3, %v3661_v34 }
 0x484   :  { %v4047_v10 = vsel %vm2075_vm15, %v3882_v0, %v4046_v35  ;;  %v5611_v61 = vcombine.low %v5592_v29, %v5608_v38  ;;  %v5492_v8 = vrot.slane %v5485_v40, %v9829_v18  ;;  %v5484_v3 = vrot.slane %v5477_v14, %v9829_v18 }
 0x485   :  { %v3670_v24 = vpop.permute.xlu1 %3669  ;;  %v3667_v30 = vpop.permute.xlu0 %3666  ;;  %v4048_v33 = vsel %vm2077_vm0, %v3886_v6, %v4047_v10  ;;  %v4804_v36 = vrot.slane %v4643_v55, %v11164_v17  ;;  %v4646_v63 = vadd.f32 1.0, %v4270_v48  ;;  %v10353_v14 = vadd.f32 1.0, %v4256_v50  ;;  %v11292_v55 = vld [vmem:[#allocation13_spill] sm:$0xff] }
 0x486   :  { %v3894_v5 = vrot.slane %v3670_v24, %v11258_v19  ;;  %v5240_v59 = vmul.f32 %v10194_v53, %v3670_v24  ;;  %v3890_v22 = vrot.slane %v3667_v30, %v11258_v19  ;;  %v5239_v31 = vmul.f32 %v10210_v52, %v3667_v30  ;;  %5865 = vrot.lane.b32.xlu0 %v5611_v61, %s6779_s16 }
 0x487   :  { %v4184_v53 = vrot.slane %v10338_v37, %v9748_v26  ;;  %v5612_v52 = vcombine.high %v5592_v29, %v5608_v38  ;;  %v10358_v35 = vmul.f32 %v4800_v39, %v11292_v55  ;;  %v5509_v10 = vcombine.low %v5484_v3, %v5492_v8  ;;  %v11294_v39 = vld [vmem:[#allocation16_spill] sm:$0xff] }
 0x488   :  { %v5501_v2 = vcombine.low %v5238_v11, %v5240_v59  ;;  %v5493_v58 = vcombine.low %v5237_v56, %v5239_v31  ;;  %v4049_v9 = vsel %vm2079_vm4, %v3890_v22, %v4048_v33  ;;  %v4274_v11 = vcombine.high %v4270_v48, %v4270_v48  ;;  %v11293_v56 = vld [vmem:[#allocation15_spill] sm:$0xff] }
 0x489   :  { %v3628_v34 = vpop.permute.xlu1 %3627  ;;  %v3625_v49 = vpop.permute.xlu0 %3624  ;;  %v4050_v40 = vsel %vm11291_vm10, %v3894_v5, %v4049_v9  ;;  %v10362_v38 = vmul.f32 %v4808_v25, %v11293_v56  ;;  %v4272_v29 = vcombine.high %v4256_v50, %v4256_v50  ;;  %v4192_v5 = vcombine.high %v4184_v53, %v4184_v53 }
 0x48a   :  { %v5508_v0 = vrot.slane %v5501_v2, %v9829_v18  ;;  %v5500_v6 = vrot.slane %v5493_v58, %v9829_v18  ;;  %6566 = vmatprep.subr.mxu1 %v4050_v40  ;;  %5897 = vrot.lane.b32.xlu0 %v5612_v52, %s6781_s18  ;;  %v3838_v30 = vrot.slane %v3628_v34, %v11258_v19  ;;  %v4648_v9 = vadd.f32 1.0, %v4274_v11 }
 0x48b   :  { %6567 = vmatpush3.msra.mxu1 %v4050_v40  ;;  %v3834_v61 = vrot.slane %v3625_v49, %v11258_v19  ;;  %v10367_v33 = vmul.f32 %v4804_v36, %v11294_v39  ;;  %v4816_v48 = vrot.slane %v4646_v63, %v11164_v17  ;;  %v4812_v2 = vrot.slane %v10353_v14, %v11164_v17 }
 0x48c   :  { %v5525_v24 = vcombine.low %v5500_v6, %v5508_v0  ;;  %v5526_v59 = vcombine.high %v5500_v6, %v5508_v0  ;;  %v5510_v25 = vcombine.high %v5484_v3, %v5492_v8  ;;  %v10376_v40 = vrot.slane %v5509_v10, %v9897_v45 }
 0x48d   :  { %v3634_v22 = vpop.permute.xlu1 %3633  ;;  %v3631_v31 = vpop.permute.xlu0 %3630  ;;  %v10381_v36 = vadd.f32 1.0, %v4272_v29  ;;  %v5226_v63 = vmul.f32 %v10216_v12, %v3628_v34  ;;  %v4037_v14 = vsel %vm2069_vm5, %v3838_v30, %v3834_v61  ;;  %v5225_v3 = vmul.f32 %v10213_v23, %v3625_v49  ;;  %v11295_v34 = vld [vmem:[#allocation17_spill] sm:$0xff] }
 0x48e   :  { %v5228_v50 = vmul.f32 %v10219_v42, %v3634_v22  ;;  %v3842_v58 = vrot.slane %v3631_v31, %v11258_v19  ;;  %v5227_v52 = vmul.f32 %v10226_v28, %v3631_v31  ;;  %v10379_v0 = vrot.slane %v5525_v24, %v9897_v45 }
 0x48f   :  { %v3846_v8 = vrot.slane %v3634_v22, %v11258_v19  ;;  %v10387_v42 = vrot.slane %v4192_v5, %v9748_v26  ;;  %v5540_v10 = vrot.slane %v5526_v59, %v9897_v45  ;;  %v5524_v12 = vrot.slane %v5510_v25, %v9897_v45 }
 0x490   :  { %v4038_v28 = vsel %vm2071_vm7, %v3842_v58, %v4037_v14  ;;  %v5542_v11 = vcombine.high %v10376_v40, %v10379_v0  ;;  %v5417_v56 = vcombine.low %v5226_v63, %v5228_v50  ;;  %v10396_v29 = vmul.f32 %v4816_v48, %v11295_v34 }
 0x491   :  { %v3640_v6 = vpop.permute.xlu1 %3639  ;;  %v3637_v55 = vpop.permute.xlu0 %3636  ;;  %v4824_v24 = vrot.slane %v4648_v9, %v11164_v17  ;;  %v5409_v30 = vcombine.low %v5225_v3, %v5227_v52  ;;  %v5541_v61 = vcombine.low %v10376_v40, %v10379_v0  ;;  %v4039_v5 = vsel %vm2073_vm9, %v3846_v8, %v4038_v28 }
 0x492   :  { %v3854_v23 = vrot.slane %v3640_v6, %v11258_v19  ;;  %v3850_v49 = vrot.slane %v3637_v55, %v11258_v19  ;;  %5831 = vrot.lane.b32.xlu1 %v5542_v11, %s6780_s17  ;;  %v4634_v59 = vadd.f32 1.0, %v10387_v42  ;;  %v4200_v22 = vrot.slane %v4184_v53, %v9748_v26 }
 0x493   :  { %v4177_v31 = vcombine.high %v10338_v37, %v10338_v37  ;;  %v5230_v39 = vmul.f32 %v10282_v4, %v3640_v6  ;;  %v5229_v25 = vmul.f32 %v10285_v27, %v3637_v55  ;;  %v5543_v9 = vcombine.low %v5524_v12, %v5540_v10 }
 0x494   :  { %v4040_v48 = vsel %vm2075_vm15, %v3850_v49, %v4039_v5  ;;  %v5424_v8 = vrot.slane %v5417_v56, %v9829_v18  ;;  %v5416_v37 = vrot.slane %v5409_v30, %v9829_v18  ;;  %v4820_v27 = vrot.slane %v10381_v36, %v11164_v17  ;;  %v11297_v49 = vld [vmem:[#allocation18_spill] sm:$0xff] }
 0x495   :  { %v3646_v50 = vpop.permute.xlu1 %3645  ;;  %v3643_v58 = vpop.permute.xlu0 %3642  ;;  %v4041_v4 = vsel %vm2077_vm0, %v3854_v23, %v4040_v48  ;;  %v4768_v34 = vrot.slane %v4634_v59, %v11164_v17  ;;  %v4224_v30 = vcombine.high %v10387_v42, %v10387_v42  ;;  %v5093_v5 = vmul.f32 %v4812_v2, %v11297_v49  ;;  %v11300_v2 = vld [vmem:[#allocation8_spill] sm:$0xff] }
 0x496   :  { %v3862_v52 = vrot.slane %v3646_v50, %v11258_v19  ;;  %v5232_v63 = vmul.f32 %v10289_v44, %v3646_v50  ;;  %v3858_v14 = vrot.slane %v3643_v58, %v11258_v19  ;;  %v5231_v53 = vmul.f32 %v10295_v1, %v3643_v58  ;;  %5863 = vrot.lane.b32.xlu1 %v5543_v9, %s6779_s16  ;;  %v11299_v58 = vld [vmem:[#allocation20_spill] sm:$0xff] }
 0x497   :  { %v10423_v44 = vadd.f32 1.0, %v4200_v22  ;;  %v5544_v1 = vcombine.high %v5524_v12, %v5540_v10  ;;  %v5441_v48 = vcombine.low %v5416_v37, %v5424_v8  ;;  %v11298_v10 = vld [vmem:[#allocation19_spill] sm:$0xff]  ;;  %v5095_v9 = vmul.f32 %v4820_v27, %v11299_v58 }
 0x498   :  { %v5433_v3 = vcombine.low %v5230_v39, %v5232_v63  ;;  %v5425_v28 = vcombine.low %v5229_v25, %v5231_v53  ;;  %v4042_v6 = vsel %vm2079_vm4, %v3858_v14, %v4041_v4  ;;  %v4191_v39 = vrot.slane %v4177_v31, %v9748_v26 }
 0x499   :  { %v3604_v55 = vpop.permute.xlu1 %3603  ;;  %v3601_v11 = vpop.permute.xlu0 %3600  ;;  %v4043_v56 = vsel %vm11296_vm11, %v3862_v52, %v4042_v6  ;;  %v5096_v12 = vmul.f32 %v4824_v24, %v11298_v10  ;;  %v4222_v25 = vcombine.high %v4200_v22, %v4200_v22  ;;  %v10439_v53 = vmul.f32 %v4768_v34, %v11300_v2 }
 0x49a   :  { %v5440_v23 = vrot.slane %v5433_v3, %v9829_v18  ;;  %v5432_v36 = vrot.slane %v5425_v28, %v9829_v18  ;;  %6568 = vmatprep.subr.mxu1 %v4043_v56  ;;  %5895 = vrot.lane.b32.xlu1 %v5544_v1, %s6781_s18  ;;  %v3806_v50 = vrot.slane %v3604_v55, %v11258_v19  ;;  %v4636_v4 = vadd.f32 1.0, %v4224_v30 }
 0x49b   :  { %6569 = vmatpush3.msra.mxu1 %v4043_v56  ;;  %v3802_v42 = vrot.slane %v3601_v11, %v11258_v19  ;;  %v4764_v31 = vrot.slane %v10423_v44, %v11164_v17  ;;  %v5442_v3 = vcombine.high %v5416_v37, %v5424_v8  ;;  %v4193_v28 = vcombine.high %v4191_v39, %v4191_v39 }
 0x49c   :  { %v5457_v59 = vcombine.low %v5432_v36, %v5440_v23  ;;  %v5458_v52 = vcombine.high %v5432_v36, %v5440_v23  ;;  %v10447_v27 = vrot.slane %v5441_v48, %v9897_v45  ;;  %v4635_v56 = vadd.f32 1.0, %v4222_v25 }
 0x49d   :  { %v3610_v63 = vpop.permute.xlu1 %3609  ;;  %v3607_v14 = vpop.permute.xlu0 %3606  ;;  %v5218_v34 = vmul.f32 %v10358_v35, %v3604_v55  ;;  %v4030_v23 = vsel %vm2069_vm5, %v3806_v50, %v3802_v42  ;;  %v5217_v37 = vmul.f32 %v10321_v57, %v3601_v11  ;;  %v5456_v35 = vrot.slane %v5442_v3, %v9897_v45 }
 0x49e   :  { %v5220_v24 = vmul.f32 %v10362_v38, %v3610_v63  ;;  %v3810_v22 = vrot.slane %v3607_v14, %v11258_v19  ;;  %v5219_v6 = vmul.f32 %v10367_v33, %v3607_v14  ;;  %v10450_v1 = vrot.slane %v5457_v59, %v9897_v45 }
 0x49f   :  { %v3814_v8 = vrot.slane %v3610_v63, %v11258_v19  ;;  %v4207_v38 = vrot.slane %v4191_v39, %v9748_v26  ;;  %v5472_v48 = vrot.slane %v5458_v52, %v9897_v45  ;;  %v4776_v55 = vrot.slane %v4636_v4, %v11164_v17 }
 0x4a0   :  { %v4031_v30 = vsel %vm2071_vm7, %v3810_v22, %v4030_v23  ;;  %v5474_v49 = vcombine.high %v10447_v27, %v10450_v1  ;;  %v5349_v10 = vcombine.low %v5218_v34, %v5220_v24  ;;  %v4221_v25 = vrot.slane %v4193_v28, %v9748_v26 }
 0x4a1   :  { %v3616_v33 = vpop.permute.xlu1 %3615  ;;  %v3613_v36 = vpop.permute.xlu0 %3612  ;;  %v5341_v59 = vcombine.low %v5217_v37, %v5219_v6  ;;  %v5473_v11 = vcombine.low %v10447_v27, %v10450_v1  ;;  %v4032_v50 = vsel %vm2073_vm9, %v3814_v8, %v4031_v30  ;;  %v4772_v42 = vrot.slane %v4635_v56, %v11164_v17 }
 0x4a2   :  { %v3822_v39 = vrot.slane %v3616_v33, %v11258_v19  ;;  %v3818_v57 = vrot.slane %v3613_v36, %v11258_v19  ;;  %5829 = vrot.lane.b32.xlu0 %v5474_v49, %s6780_s17  ;;  %v4225_v58 = vcombine.high %v4221_v25, %v4221_v25  ;;  %v4223_v52 = vcombine.high %v4207_v38, %v4207_v38 }
 0x4a3   :  { %v5222_v63 = vmul.f32 %v10396_v29, %v3616_v33  ;;  %v5221_v14 = vmul.f32 %v5093_v5, %v3613_v36  ;;  %v5475_v3 = vcombine.low %v5456_v35, %v5472_v48  ;;  %v5356_v34 = vrot.slane %v5349_v10, %v9829_v18 }
 0x4a4   :  { %v4033_v26 = vsel %vm2075_vm15, %v3818_v57, %v4032_v50  ;;  %v5348_v56 = vrot.slane %v5341_v59, %v9829_v18  ;;  %v4637_v23 = vadd.f32 1.0, %v4207_v38  ;;  %v4638_v30 = vadd.f32 1.0, %v4221_v25  ;;  %v11302_v50 = vld [vmem:[#allocation7_spill] sm:$0xff]  ;;  %v11303_v38 = vld [vmem:[#allocation5_spill] sm:$0xff] }
 0x4a5   :  { %v3622_v2 = vpop.permute.xlu1 %3621  ;;  %v3619_v4 = vpop.permute.xlu0 %3618  ;;  %v4034_v29 = vsel %vm2077_vm0, %v3822_v39, %v4033_v26  ;;  %v4639_v57 = vadd.f32 1.0, %v4223_v52  ;;  %v5084_v39 = vmul.f32 %v4776_v55, %v11302_v50 }
 0x4a6   :  { %v3830_v24 = vrot.slane %v3622_v2, %v11258_v19  ;;  %v5224_v22 = vmul.f32 %v5096_v12, %v3622_v2  ;;  %v3826_v28 = vrot.slane %v3619_v4, %v11258_v19  ;;  %v5223_v6 = vmul.f32 %v5095_v9, %v3619_v4  ;;  %5861 = vrot.lane.b32.xlu0 %v5475_v3, %s6779_s16 }
 0x4a7   :  { %v5476_v12 = vcombine.high %v5456_v35, %v5472_v48  ;;  %v4640_v9 = vadd.f32 1.0, %v4225_v58  ;;  %v5373_v26 = vcombine.low %v5348_v56, %v5356_v34  ;;  %v4780_v48 = vrot.slane %v4637_v23, %v11164_v17  ;;  %v11305_v23 = vld [vmem:[#allocation10_spill] sm:$0xff] }
 0x4a8   :  { %v5365_v8 = vcombine.low %v5222_v63, %v5224_v22  ;;  %v5357_v5 = vcombine.low %v5221_v14, %v5223_v6  ;;  %v4035_v37 = vsel %vm2079_vm4, %v3826_v28, %v4034_v29  ;;  %v5083_v63 = vmul.f32 %v4772_v42, %v11303_v38  ;;  %v11304_v14 = vld [vmem:[#allocation6_spill] sm:$0xff] }
 0x4a9   :  { %v3580_v33 = vpop.permute.xlu1 %3579  ;;  %v3577_v36 = vpop.permute.xlu0 %3576  ;;  %v4036_v49 = vsel %vm11301_vm12, %v3830_v24, %v4035_v37  ;;  %v5081_v25 = vmul.f32 %v4764_v31, %v11304_v14  ;;  %v5374_v55 = vcombine.high %v5348_v56, %v5356_v34  ;;  %v4784_v3 = vrot.slane %v4638_v30, %v11164_v17 }
 0x4aa   :  { %v5372_v10 = vrot.slane %v5365_v8, %v9829_v18  ;;  %v5364_v59 = vrot.slane %v5357_v5, %v9829_v18  ;;  %6570 = vmatprep.subr.mxu1 %v4036_v49  ;;  %5893 = vrot.lane.b32.xlu0 %v5476_v12, %s6781_s18  ;;  %v3774_v52 = vrot.slane %v3580_v33, %v11258_v19 }
 0x4ab   :  { %6571 = vmatpush3.msra.mxu1 %v4036_v49  ;;  %v3770_v2 = vrot.slane %v3577_v36, %v11258_v19  ;;  %v4792_v24 = vrot.slane %v4640_v9, %v11164_v17  ;;  %v4788_v44 = vrot.slane %v4639_v57, %v11164_v17  ;;  %v5210_v31 = vmul.f32 %v10439_v53, %v3580_v33  ;;  %v11306_v49 = vld [vmem:[#allocation9_spill] sm:$0xff] }
 0x4ac   :  { %v5389_v35 = vcombine.low %v5364_v59, %v5372_v10  ;;  %v5390_v58 = vcombine.high %v5364_v59, %v5372_v10  ;;  %v5209_v29 = vmul.f32 %v5081_v25, %v3577_v36  ;;  %v5085_v8 = vmul.f32 %v4780_v48, %v11305_v23  ;;  %v11307_v59 = vld [vmem:[#allocation11_spill] sm:$0xff] }
 0x4ad   :  { %v3586_v4 = vpop.permute.xlu1 %3585  ;;  %v3583_v42 = vpop.permute.xlu0 %3582  ;;  %v10500_v5 = vrot.slane %v5373_v26, %v9897_v45  ;;  %v4023_v56 = vsel %vm2069_vm5, %v3774_v52, %v3770_v2  ;;  %v5086_v36 = vmul.f32 %v4784_v3, %v11306_v49  ;;  %v5088_v50 = vmul.f32 %v4792_v24, %v11307_v59  ;;  %vm11309_vm5 = vmmov %vm11268_vm2 }
 0x4ae   :  { %v5212_v22 = vmul.f32 %v5084_v39, %v3586_v4  ;;  %v3778_v28 = vrot.slane %v3583_v42, %v11258_v19  ;;  %v5211_v6 = vmul.f32 %v5083_v63, %v3583_v42  ;;  %v10503_v34 = vrot.slane %v5389_v35, %v9897_v45  ;;  %v11308_v39 = vld [vmem:[#allocation12_spill] sm:$0xff] }
 0x4af   :  { %v3782_v37 = vrot.slane %v3586_v4, %v11258_v19  ;;  %v5404_v53 = vrot.slane %v5390_v58, %v9897_v45  ;;  %v5087_v38 = vmul.f32 %v4788_v44, %v11308_v39  ;;  %v5388_v63 = vrot.slane %v5374_v55, %v9897_v45 }
 0x4b0   :  { %v5281_v30 = vcombine.low %v5210_v31, %v5212_v22  ;;  %v4024_v33 = vsel %vm2071_vm7, %v3778_v28, %v4023_v56  ;;  %v5273_v12 = vcombine.low %v5209_v29, %v5211_v6  ;;  %v5406_v10 = vcombine.high %v10500_v5, %v10503_v34 }
 0x4b1   :  { %v3592_v9 = vpop.permute.xlu1 %3591  ;;  %v3589_v57 = vpop.permute.xlu0 %3588  ;;  %v5405_v25 = vcombine.low %v10500_v5, %v10503_v34  ;;  %v4025_v35 = vsel %vm2073_vm9, %v3782_v37, %v4024_v33  ;;  %v5407_v58 = vcombine.low %v5388_v63, %v5404_v53  ;;  %v5408_v56 = vcombine.high %v5388_v63, %v5404_v53 }
 0x4b2   :  { %v3790_v26 = vrot.slane %v3592_v9, %v11258_v19  ;;  %v3786_v14 = vrot.slane %v3589_v57, %v11258_v19  ;;  %5827 = vrot.lane.b32.xlu1 %v5406_v10, %s6780_s17  ;;  %v5288_v48 = vrot.slane %v5281_v30, %v9829_v18  ;;  %v5280_v52 = vrot.slane %v5273_v12, %v9829_v18 }
 0x4b3   :  { %v5214_v2 = vmul.f32 %v5086_v36, %v3592_v9  ;;  %v5213_v55 = vmul.f32 %v5085_v8, %v3589_v57  ;;  %v10536_v36 = vld [vmem:[%s10693_s4 + $0x8] sm:$0xff]  ;;  %vm5913_vm7 = vcmask 261120   ;;  %vm5930_vm9 = vcmask 785408  }
 0x4b4   :  { %v4026_v4 = vsel %vm2075_vm15, %v3786_v14, %v4025_v35  ;;  %v5305_v8 = vcombine.low %v5280_v52, %v5288_v48  ;;  %v5306_v30 = vcombine.high %v5280_v52, %v5288_v48 }
 0x4b5   :  { %v3598_v42 = vpop.permute.xlu1 %3597  ;;  %v3595_v3 = vpop.permute.xlu0 %3594  ;;  %v4027_v28 = vsel %vm2077_vm0, %v3790_v26, %v4026_v4  ;;  %v11310_v4 = vcombine.low %v10144_v62, %v10147_v13 }
 0x4b6   :  { %v3798_v24 = vrot.slane %v3598_v42, %v11258_v19  ;;  %v5216_v44 = vmul.f32 %v5088_v50, %v3598_v42  ;;  %v3794_v31 = vrot.slane %v3595_v3, %v11258_v19  ;;  %v5215_v22 = vmul.f32 %v5087_v38, %v3595_v3  ;;  %5859 = vrot.lane.b32.xlu1 %v5407_v58, %s6779_s16 }
 0x4b7   :  { %v5320_v53 = vrot.slane %v5306_v30, %v9897_v45  ;;  %v10543_v57 = vrot.slane %v5305_v8, %v9897_v45 }
 0x4b8   :  { %v5297_v6 = vcombine.low %v5214_v2, %v5216_v44  ;;  %v5289_v29 = vcombine.low %v5213_v55, %v5215_v22  ;;  %v4028_v23 = vsel %vm2079_vm4, %v3794_v31, %v4027_v28 }
 0x4b9   :  { %v4029_v37 = vsel %vm11309_vm5, %v3798_v24, %v4028_v23 }
 0x4ba   :  { %v5304_v33 = vrot.slane %v5297_v6, %v9829_v18  ;;  %v5296_v12 = vrot.slane %v5289_v29, %v9829_v18  ;;  %6572 = vmatprep.subr.mxu1 %v4029_v37  ;;  %5891 = vrot.lane.b32.xlu1 %v5408_v56, %s6781_s18 }
 0x4bb   :  { %6573 = vmatpush3.msra.mxu1 %v4029_v37 }
 0x4bc   :  { %v5321_v19 = vcombine.low %v5296_v12, %v5304_v33  ;;  %v5322_v49 = vcombine.high %v5296_v12, %v5304_v33  ;;  %6575 = vmatmul.mubr.msk.f32.vlgmr.msra.gmra.mxu1 %vm4087_vm1, %v10536_v36 }
 0x4be   :  { %v5336_v9 = vrot.slane %v5322_v49, %v9897_v45  ;;  %v10546_v10 = vrot.slane %v5321_v19, %v9897_v45 }
 0x4c0   :  { %v5340_v59 = vcombine.high %v5320_v53, %v5336_v9  ;;  %v5338_v50 = vcombine.high %v10543_v57, %v10546_v10  ;;  %v5337_v39 = vcombine.low %v10543_v57, %v10546_v10  ;;  %v5339_v14 = vcombine.low %v5320_v53, %v5336_v9 }
 0x4c2   :  { %5889 = vrot.lane.b32.xlu1 %v5340_v59, %s6781_s18  ;;  %5825 = vrot.lane.b32.xlu0 %v5338_v50, %s6780_s17 }
 0x4c3   :  { %v5872_v38 = vpop.permute.xlu1 %5871  ;;  %v5840_v63 = vpop.permute.xlu0 %5839 }
 0x4c4   :  { %v5921_v26 = vsel %vm5913_vm7, %v5813_v51, %v5840_v63 }
 0x4c5   :  { %v5929_v35 = vsel %vm4087_vm1, %v5921_v26, %v5872_v38 }
 0x4c6   :  { %5857 = vrot.lane.b32.xlu0 %v5339_v14, %s6779_s16 }
 0x4c7   :  { %v5904_v48 = vpop.permute.xlu1 %5903 }
 0x4c8   :  { %v5938_v58 = vsel %vm5930_vm9, %v5929_v35, %v5904_v48 }
 0x4c9   :  { %6577 = vmatprep.subr.mxu0 %v5938_v58 }
 0x4ca   :  { %6578 = vmatpush3.msra.mxu0 %v5938_v58  ;;  %v11311_v58 = vld [vmem:[#allocation74_spill] sm:$0xff] }
 0x4d3   :  { %v5838_v52 = vpop.permute.xlu0 %5837 }
 0x4d4   :  { %v5920_v46 = vsel %vm5913_vm7, %v11310_v4, %v5838_v52 }
 0x4d7   :  { %v5870_v2 = vpop.permute.xlu0 %5869 }
 0x4d8   :  { %v5928_v54 = vsel %vm4087_vm1, %v5920_v46, %v5870_v2  ;;  %v11312_v2 = vld [vmem:[#allocation84_spill] sm:$0xff] }
 0x4d9   :  { %v11313_v46 = vld [vmem:[#allocation76_spill] sm:$0xff] }
 0x4db   :  { %v5902_v51 = vpop.permute.xlu0 %5901 }
 0x4dc   :  { %v5937_v55 = vsel %vm5930_vm9, %v5928_v54, %v5902_v51 }
 0x4dd   :  { %6579 = vmatprep.subr.mxu0 %v5937_v55 }
 0x4de   :  { %6580 = vmatpush3.msra.mxu0 %v5937_v55 }
 0x4e4   :  { %v5836_v42 = vpop.permute.xlu1 %5835 }
 0x4e5   :  { %v5919_v24 = vsel %vm5913_vm7, %v5677_v43, %v5836_v42 }
 0x4e8   :  { %v5868_v3 = vpop.permute.xlu1 %5867 }
 0x4e9   :  { %v5927_v44 = vsel %vm4087_vm1, %v5919_v24, %v5868_v3 }
 0x4ec   :  { %v5900_v31 = vpop.permute.xlu1 %5899 }
 0x4ed   :  { %v5936_v62 = vsel %vm5930_vm9, %v5927_v44, %v5900_v31 }
 0x4ee   :  { %6581 = vmatprep.subr.mxu0 %v5936_v62 }
 0x4ef   :  { %6582 = vmatpush3.msra.mxu0 %v5936_v62 }
 0x4f4   :  { %v5834_v13 = vpop.permute.xlu0 %5833 }
 0x4f5   :  { %v5918_v28 = vsel %vm5913_vm7, %v5609_v32, %v5834_v13 }
 0x4f8   :  { %v5866_v22 = vpop.permute.xlu0 %5865 }
 0x4f9   :  { %v5926_v6 = vsel %vm4087_vm1, %v5918_v28, %v5866_v22 }
 0x4fc   :  { %v5898_v29 = vpop.permute.xlu0 %5897 }
 0x4fd   :  { %v5935_v20 = vsel %vm5930_vm9, %v5926_v6, %v5898_v29 }
 0x4fe   :  { %6583 = vmatprep.subr.mxu0 %v5935_v20 }
 0x4ff   :  { %6584 = vmatpush3.msra.mxu0 %v5935_v20 }
 0x504   :  { %v5832_v7 = vpop.permute.xlu1 %5831 }
 0x505   :  { %v5917_v23 = vsel %vm5913_vm7, %v5541_v61, %v5832_v7 }
 0x508   :  { %v5864_v43 = vpop.permute.xlu1 %5863 }
 0x509   :  { %v5925_v56 = vsel %vm4087_vm1, %v5917_v23, %v5864_v43 }
 0x50c   :  { %v5896_v37 = vpop.permute.xlu1 %5895 }
 0x50d   :  { %v5934_v15 = vsel %vm5930_vm9, %v5925_v56, %v5896_v37 }
 0x50e   :  { %6585 = vmatprep.subr.mxu0 %v5934_v15 }
 0x50f   :  { %6586 = vmatpush3.msra.mxu0 %v5934_v15 }
 0x514   :  { %v5830_v60 = vpop.permute.xlu0 %5829 }
 0x515   :  { %v5916_v8 = vsel %vm5913_vm7, %v5473_v11, %v5830_v60 }
 0x518   :  { %v5862_v32 = vpop.permute.xlu0 %5861 }
 0x519   :  { %v5924_v30 = vsel %vm4087_vm1, %v5916_v8, %v5862_v32 }
 0x51c   :  { %v5894_v33 = vpop.permute.xlu0 %5893 }
 0x51d   :  { %v5933_v40 = vsel %vm5930_vm9, %v5924_v30, %v5894_v33 }
 0x51e   :  { %6587 = vmatprep.subr.mxu0 %v5933_v40 }
 0x51f   :  { %6588 = vmatpush3.msra.mxu0 %v5933_v40 }
 0x524   :  { %v5828_v0 = vpop.permute.xlu1 %5827 }
 0x525   :  { %v5915_v12 = vsel %vm5913_vm7, %v5405_v25, %v5828_v0 }
 0x528   :  { %v5860_v61 = vpop.permute.xlu1 %5859 }
 0x529   :  { %v5923_v19 = vsel %vm4087_vm1, %v5915_v12, %v5860_v61 }
 0x52c   :  { %v5892_v49 = vpop.permute.xlu1 %5891 }
 0x52d   :  { %v5932_v27 = vsel %vm5930_vm9, %v5923_v19, %v5892_v49 }
 0x52e   :  { %6589 = vmatprep.subr.mxu0 %v5932_v27 }
 0x52f   :  { %6590 = vmatpush3.msra.mxu0 %v5932_v27 }
 0x534   :  { %v5826_v1 = vpop.permute.xlu0 %5825  ;;  %v5890_v9 = vpop.permute.xlu1 %5889 }
 0x535   :  { %v5914_v11 = vsel %vm5913_vm7, %v5337_v39, %v5826_v1 }
 0x538   :  { %v5858_v53 = vpop.permute.xlu0 %5857 }
 0x539   :  { %v5922_v59 = vsel %vm4087_vm1, %v5914_v11, %v5858_v53 }
 0x53a   :  { %v5931_v5 = vsel %vm5930_vm9, %v5922_v59, %v5890_v9 }
 0x53b   :  { %6591 = vmatprep.subr.mxu0 %v5931_v5 }
 0x53c   :  { %6592 = vmatpush3.msra.mxu0 %v5931_v5 }
 0x53d   :  { %6594 = vmatmul.mubr.msk.f32.vlgmr.msra.gmra.mxu0 %vm4087_vm1, %v10536_v36 }
 0x57c   :  { %v6576_v34 = vpop.f32.mrf.mxu1 }
 0x57d   :  { %v4166_v25 = vadd.f32 1e-16, %v6576_v34 }
 0x57e   :  { %v4160_v50 = vpop.f32.mrf.mxu1 }
 0x57f   :  { %6745 = vrcp.f32 %v4166_v25  ;;  %v4161_v38 = vadd.f32 1e-16, %v4160_v50 }
 0x581   :  { %6747 = vrcp.f32 %v4161_v38 }
 0x58c   :  { %v6746_v57 = vpop.eup %6745 }
 0x58d   :  { %v6238_v10 = vrot.slane %v6746_v57, %v11165_v47  ;;  %v6231_v39 = vrot.slane %v6746_v57, %v11164_v17  ;;  %v6252_v51 = vrot.slane %v6746_v57, %v11167_v21  ;;  %v6245_v55 = vrot.slane %v6746_v57, %v11166_v16 }
 0x58e   :  { %v6748_v63 = vpop.eup %6747  ;;  %v6266_v42 = vrot.slane %v6746_v57, %v11168_v41  ;;  %v6259_v3 = vrot.slane %v6746_v57, %v11311_v58  ;;  %v6280_v24 = vrot.slane %v6746_v57, %v11312_v2  ;;  %v6273_v44 = vrot.slane %v6746_v57, %v11313_v46 }
 0x58f   :  { %6240 = vbcast.lane.b32.xlu1 %v6238_v10, 256  ;;  %6233 = vbcast.lane.b32.xlu0 %v6231_v39, 256  ;;  %v6182_v26 = vrot.slane %v6748_v63, %v11165_v47  ;;  %v6175_v14 = vrot.slane %v6748_v63, %v11164_v17  ;;  %v6196_v36 = vrot.slane %v6748_v63, %v11167_v21 }
 0x590   :  { %v6189_v48 = vrot.slane %v6748_v63, %v11166_v16  ;;  %v6210_v35 = vrot.slane %v6748_v63, %v11168_v41  ;;  %v6203_v52 = vrot.slane %v6748_v63, %v11311_v58  ;;  %v6224_v4 = vrot.slane %v6748_v63, %v11312_v2 }
 0x591   :  { %v6217_v47 = vrot.slane %v6748_v63, %v11313_v46 }
 0x593   :  { %6184 = vbcast.lane.b32.xlu1 %v6182_v26, 256  ;;  %6177 = vbcast.lane.b32.xlu0 %v6175_v14, 256  ;;  %v6782_v14 = vmov 0.0  }
 0x597   :  { %6198 = vbcast.lane.b32.xlu1 %v6196_v36, 256  ;;  %6191 = vbcast.lane.b32.xlu0 %v6189_v48, 256 }
 0x59b   :  { %6212 = vbcast.lane.b32.xlu1 %v6210_v35, 256  ;;  %6205 = vbcast.lane.b32.xlu0 %v6203_v52, 256 }
 0x59f   :  { %6226 = vbcast.lane.b32.xlu1 %v6224_v4, 256  ;;  %6219 = vbcast.lane.b32.xlu0 %v6217_v47, 256 }
 0x5fd   :  { %v6595_v17 = vpop.f32.mrf.mxu0 }
 0x5fe   :  { %6020 = vrot.lane.b32.xlu1 %v6595_v17, %s6781_s18 }
 0x5ff   :  { %v6005_v54 = vpop.f32.mrf.mxu0 }
 0x600   :  { %6018 = vrot.lane.b32.xlu0 %v6005_v54, %s6781_s18 }
 0x601   :  { %v6241_v31 = vpop.permute.xlu1 %6240  ;;  %v6234_v62 = vpop.permute.xlu0 %6233 }
 0x602   :  { %6026 = vrot.lane.b32.xlu1 %v6595_v17, %s6779_s16 }
 0x604   :  { %6024 = vrot.lane.b32.xlu0 %v6005_v54, %s6779_s16 }
 0x605   :  { %v10627_v13 = vpop.permute.xlu1 %6184  ;;  %v6178_v21 = vpop.permute.xlu0 %6177 }
 0x606   :  { %6032 = vrot.lane.b32.xlu1 %v6595_v17, %s6780_s17 }
 0x608   :  { %6030 = vrot.lane.b32.xlu0 %v6005_v54, %s6780_s17 }
 0x609   :  { %v10629_v22 = vpop.permute.xlu1 %6198  ;;  %v6192_v16 = vpop.permute.xlu0 %6191 }
 0x60a   :  { %6254 = vbcast.lane.b32.xlu1 %v6252_v51, 256 }
 0x60c   :  { %6247 = vbcast.lane.b32.xlu0 %v6245_v55, 256 }
 0x60d   :  { %v10631_v28 = vpop.permute.xlu1 %6212  ;;  %v6206_v41 = vpop.permute.xlu0 %6205 }
 0x60e   :  { %6268 = vbcast.lane.b32.xlu1 %v6266_v42, 256 }
 0x610   :  { %6261 = vbcast.lane.b32.xlu0 %v6259_v3, 256 }
 0x611   :  { %v6227_v6 = vpop.permute.xlu1 %6226  ;;  %v6220_v29 = vpop.permute.xlu0 %6219 }
 0x612   :  { %6282 = vbcast.lane.b32.xlu1 %v6280_v24, 256 }
 0x614   :  { %6275 = vbcast.lane.b32.xlu0 %v6273_v44, 256 }
 0x670   :  { %v6021_v20 = vpop.permute.xlu1 %6020 }
 0x672   :  { %v6019_v7 = vpop.permute.xlu0 %6018 }
 0x674   :  { %v6027_v43 = vpop.permute.xlu1 %6026 }
 0x675   :  { %v6104_v23 = vcombine.low %v6595_v17, %v6027_v43  ;;  %v6105_v56 = vcombine.high %v6595_v17, %v6027_v43 }
 0x676   :  { %v6025_v37 = vpop.permute.xlu0 %6024 }
 0x677   :  { %v6112_v8 = vrot.slane %v6104_v23, %v9829_v18  ;;  %v6119_v30 = vrot.slane %v6105_v56, %v9829_v18  ;;  %v6036_v33 = vcombine.low %v6005_v54, %v6025_v37  ;;  %v6037_v40 = vcombine.high %v6005_v54, %v6025_v37 }
 0x678   :  { %v6033_v15 = vpop.permute.xlu1 %6032 }
 0x679   :  { %v6120_v60 = vcombine.low %v6021_v20, %v6033_v15  ;;  %v6121_v32 = vcombine.high %v6021_v20, %v6033_v15  ;;  %v6044_v59 = vrot.slane %v6036_v33, %v9829_v18  ;;  %v6051_v5 = vrot.slane %v6037_v40, %v9829_v18 }
 0x67a   :  { %v6031_v0 = vpop.permute.xlu0 %6030 }
 0x67b   :  { %v6128_v61 = vrot.slane %v6120_v60, %v9829_v18  ;;  %v6135_v12 = vrot.slane %v6121_v32, %v9829_v18  ;;  %v6052_v19 = vcombine.low %v6019_v7, %v6031_v0  ;;  %v6053_v49 = vcombine.high %v6019_v7, %v6031_v0 }
 0x67c   :  { %v6255_v27 = vpop.permute.xlu1 %6254 }
 0x67d   :  { %v6136_v1 = vcombine.low %v6112_v8, %v6128_v61  ;;  %v6137_v11 = vcombine.high %v6112_v8, %v6128_v61  ;;  %v6152_v53 = vcombine.low %v6119_v30, %v6135_v12  ;;  %v6153_v9 = vcombine.high %v6119_v30, %v6135_v12 }
 0x67e   :  { %v6060_v34 = vrot.slane %v6052_v19, %v9829_v18  ;;  %v6067_v25 = vrot.slane %v6053_v49, %v9829_v18  ;;  %v6248_v50 = vpop.permute.xlu0 %6247 }
 0x67f   :  { %v6144_v38 = vrot.slane %v6136_v1, %v9897_v45  ;;  %v6151_v57 = vrot.slane %v6137_v11, %v9897_v45  ;;  %v6160_v35 = vrot.slane %v6152_v53, %v9897_v45  ;;  %v6167_v58 = vrot.slane %v6153_v9, %v9897_v45 }
 0x680   :  { %v6068_v10 = vcombine.low %v6044_v59, %v6060_v34  ;;  %v6069_v39 = vcombine.high %v6044_v59, %v6060_v34  ;;  %v6084_v63 = vcombine.low %v6051_v5, %v6067_v25  ;;  %v6085_v26 = vcombine.high %v6051_v5, %v6067_v25  ;;  %v6269_v47 = vpop.permute.xlu1 %6268 }
 0x681   :  { %v6168_v36 = vcombine.high %v6144_v38, %v6782_v14  ;;  %v6169_v48 = vcombine.high %v6151_v57, %v6782_v14  ;;  %v6292_v55 = vmul.f32 %v6234_v62, %v6144_v38  ;;  %v6294_v42 = vmul.f32 %v6248_v50, %v6151_v57 }
 0x682   :  { %v6076_v52 = vrot.slane %v6068_v10, %v9897_v45  ;;  %v6083_v2 = vrot.slane %v6069_v39, %v9897_v45  ;;  %v6092_v4 = vrot.slane %v6084_v63, %v9897_v45  ;;  %v6099_v46 = vrot.slane %v6085_v26, %v9897_v45  ;;  %v6262_v17 = vpop.permute.xlu0 %6261 }
 0x683   :  { %v6293_v54 = vmul.f32 %v6241_v31, %v6168_v36  ;;  %v6295_v51 = vmul.f32 %v6255_v27, %v6169_v48  ;;  %v6170_v33 = vcombine.high %v6160_v35, %v6782_v14  ;;  %v6368_v12 = vcombine.low %v6292_v55, %v6294_v42 }
 0x684   :  { %v6100_v3 = vcombine.high %v6076_v52, %v6782_v14  ;;  %v6101_v24 = vcombine.high %v6083_v2, %v6782_v14  ;;  %v6102_v44 = vcombine.high %v6092_v4, %v6782_v14  ;;  %v6103_v20 = vcombine.high %v6099_v46, %v6782_v14  ;;  %v6283_v61 = vpop.permute.xlu1 %6282 }
 0x685   :  { %v6284_v7 = vmul.f32 %v6178_v21, %v6076_v52  ;;  %v6286_v43 = vmul.f32 %v6192_v16, %v6083_v2  ;;  %v6288_v23 = vmul.f32 %v6206_v41, %v6092_v4  ;;  %v6290_v56 = vmul.f32 %v6220_v29, %v6099_v46 }
 0x686   :  { %v6285_v37 = vmul.f32 %v10627_v13, %v6100_v3  ;;  %v6287_v15 = vmul.f32 %v10629_v22, %v6101_v24  ;;  %v6289_v60 = vmul.f32 %v10631_v28, %v6102_v44  ;;  %v6291_v32 = vmul.f32 %v6227_v6, %v6103_v20  ;;  %v6276_v8 = vpop.permute.xlu0 %6275 }
 0x687   :  { %v6300_v31 = vcombine.low %v6284_v7, %v6286_v43  ;;  %v6316_v30 = vcombine.low %v6288_v23, %v6290_v56  ;;  %v6376_v62 = vcombine.low %v6293_v54, %v6295_v51  ;;  %v6296_v21 = vmul.f32 %v6262_v17, %v6160_v35  ;;  %v6511_v7 = vld [vmem:[%s10694_s5 + $0x1] ss:$0 sm:$0xff] }
 0x688   :  { %v6308_v40 = vcombine.low %v6285_v37, %v6287_v15  ;;  %v6324_v0 = vcombine.low %v6289_v60, %v6291_v32  ;;  %v6171_v16 = vcombine.high %v6167_v58, %v6782_v14  ;;  %v6298_v41 = vmul.f32 %v6276_v8, %v6167_v58 }
 0x689   :  { %v6307_v29 = vrot.slane %v6300_v31, %v9829_v18  ;;  %v6323_v22 = vrot.slane %v6316_v30, %v9829_v18  ;;  %v6383_v6 = vrot.slane %v6376_v62, %v9829_v18  ;;  %v6297_v19 = vmul.f32 %v6269_v47, %v6170_v33 }
 0x68a   :  { %v6315_v13 = vrot.slane %v6308_v40, %v9829_v18  ;;  %v6331_v28 = vrot.slane %v6324_v0, %v9829_v18  ;;  %v6299_v49 = vmul.f32 %v6283_v61, %v6171_v16  ;;  %v6384_v27 = vcombine.low %v6296_v21, %v6298_v41 }
 0x68b   :  { %v6375_v59 = vrot.slane %v6368_v12, %v9829_v18 }
 0x68c   :  { %v6332_v1 = vcombine.low %v6307_v29, %v6315_v13  ;;  %v6348_v11 = vcombine.low %v6323_v22, %v6331_v28  ;;  %v6333_v53 = vcombine.high %v6307_v29, %v6315_v13  ;;  %v6349_v9 = vcombine.high %v6323_v22, %v6331_v28 }
 0x68d   :  { %v6392_v5 = vcombine.low %v6297_v19, %v6299_v49  ;;  %v6391_v34 = vrot.slane %v6384_v27, %v9829_v18  ;;  %v6400_v38 = vcombine.low %v6375_v59, %v6383_v6  ;;  %v6401_v48 = vcombine.high %v6375_v59, %v6383_v6 }
 0x68e   :  { %v6340_v25 = vrot.slane %v6332_v1, %v9897_v45  ;;  %v6356_v50 = vrot.slane %v6348_v11, %v9897_v45  ;;  %v6347_v39 = vrot.slane %v6333_v53, %v9897_v45  ;;  %v6363_v63 = vrot.slane %v6349_v9, %v9897_v45 }
 0x68f   :  { %v6399_v57 = vrot.slane %v6392_v5, %v9829_v18  ;;  %v6408_v35 = vrot.slane %v6400_v38, %v9897_v45  ;;  %v6415_v46 = vrot.slane %v6401_v48, %v9897_v45 }
 0x690   :  { %v6365_v10 = vcombine.high %v6340_v25, %v6356_v50  ;;  %v6364_v26 = vcombine.low %v6340_v25, %v6356_v50  ;;  %v6366_v52 = vcombine.low %v6347_v39, %v6363_v63  ;;  %v6367_v47 = vcombine.high %v6347_v39, %v6363_v63 }
 0x691   :  { %v6416_v14 = vcombine.low %v6391_v34, %v6399_v57  ;;  %v6417_v36 = vcombine.high %v6391_v34, %v6399_v57 }
 0x692   :  { %6438 = vrot.lane.b32.xlu0 %v6365_v10, %s6780_s17 }
 0x693   :  { %v6424_v58 = vrot.slane %v6416_v14, %v9897_v45  ;;  %v6431_v2 = vrot.slane %v6417_v36, %v9897_v45  ;;  %v6510_v45 = vld [vmem:[%s10694_s5] ss:$0 sm:$0xff] }
 0x695   :  { %v6433_v4 = vcombine.high %v6408_v35, %v6424_v58  ;;  %v6432_v18 = vcombine.low %v6408_v35, %v6424_v58  ;;  %v6434_v17 = vcombine.low %v6415_v46, %v6431_v2  ;;  %v6435_v54 = vcombine.high %v6415_v46, %v6431_v2 }
 0x696   :  { %6446 = vrot.lane.b32.xlu0 %v6366_v52, %s6779_s16 }
 0x697   :  { %6440 = vrot.lane.b32.xlu1 %v6433_v4, %s6780_s17 }
 0x69a   :  { %6454 = vrot.lane.b32.xlu0 %v6367_v47, %s6781_s18 }
 0x69b   :  { %6448 = vrot.lane.b32.xlu1 %v6434_v17, %s6779_s16 }
 0x69f   :  { %6456 = vrot.lane.b32.xlu1 %v6435_v54, %s6781_s18 }
 0x704   :  { %v6439_v51 = vpop.permute.xlu0 %6438 }
 0x705   :  { %v6460_v3 = vsel %vm5913_vm7, %v6364_v26, %v6439_v51 }
 0x708   :  { %v6447_v55 = vpop.permute.xlu0 %6446 }
 0x709   :  { %v6441_v42 = vpop.permute.xlu1 %6440  ;;  %v6462_v24 = vsel %vm4087_vm1, %v6460_v3, %v6447_v55 }
 0x70a   :  { %v6461_v56 = vsel %vm5913_vm7, %v6432_v18, %v6441_v42 }
 0x70c   :  { %v6455_v44 = vpop.permute.xlu0 %6454 }
 0x70d   :  { %v6449_v20 = vpop.permute.xlu1 %6448  ;;  %v6464_v43 = vsel %vm5930_vm9, %v6462_v24, %v6455_v44 }
 0x70e   :  { %v6472_v23 = vmul.f32 %v6510_v45, %v6464_v43  ;;  %v6463_v15 = vsel %vm4087_vm1, %v6461_v56, %v6449_v20 }
 0x710   :  { %v6478_v37 = vadd.f32 %v6511_v7, %v6472_v23 }
 0x711   :  { %v6457_v60 = vpop.permute.xlu1 %6456 }
 0x712   :  { %6480 = vst [vmem:[#allocation2] sm:$0xff] %v6478_v37  ;;  %v6465_v32 = vsel %vm5930_vm9, %v6463_v15, %v6457_v60 }
 0x713   :  { %v6473_v8 = vmul.f32 %v6510_v45, %v6465_v32 }
 0x715   :  { %v6479_v31 = vadd.f32 %v6511_v7, %v6473_v8 }
 0x717   :  { %6481 = vst [vmem:[#allocation2 + $0x8] sm:$0xff] %v6479_v31 }
 0x718   :  { %6764 = shalt.err (!%p6761_p4)
}
 0x719   :  { %s6784_s5 = smov 128   ;;  %s6785_s27 = smov 8  }
 0x71a   :  { %6493 = dma.vmem_to_hbm [thread:$0]  %s6488_s25, 256, %s10695_s6, [#allocation3], %s6784_s5, %s6784_s5, %s6785_s27  }
 0x71b   :  { %6773 = dma.done.wait [#allocation3], 256  }
 0x71c   :  { %6774 = vsyncadd [#allocation3], 4294967040 }
 0x71d   :  { %6497 = vsyncpa [#allocation3], 1 }

</bundles_post_ra>
